<compile_context>
chip_gen: v6e
topology: v6e:2x2x1
jax: 0.10.0
libtpu: 0.0.40
codegen_flags: <defaults>
</compile_context>

<pallas_src>
import functools

import jax
import jax.numpy as jnp
from jax.experimental import pallas as pl
from jax.experimental.pallas import tpu as pltpu


def _round_up(v, m):
    return -(-v // m) * m


# ---------------------------------------------------------------------------
# Kernel 1: tiled matmul + ReLU (BN scale pre-folded into the weights)
# ---------------------------------------------------------------------------
def _matmul_relu_kernel(x_ref, w_ref, o_ref, acc_ref):
    @pl.when(pl.program_id(2) == 0)
    def _():
        acc_ref[...] = jnp.zeros_like(acc_ref)

    acc_ref[...] += jnp.dot(x_ref[...], w_ref[...],
                            preferred_element_type=jnp.float32)

    @pl.when(pl.program_id(2) == pl.num_programs(2) - 1)
    def _():
        o_ref[...] = jnp.maximum(acc_ref[...], 0.0).astype(o_ref.dtype)


def matmul_relu(x, w, *, out_dtype=jnp.float32, bm=512, bn=256, bk=512):
    """relu(x @ w), tiled over an (M, N, K) grid.  x:(M,K) w:(K,N) -> (M,N)."""
    M, K = x.shape
    Kw, N = w.shape
    assert K == Kw
    bm = min(bm, _round_up(M, 8))
    bn = min(bn, _round_up(N, 128))      # lane-dense output tiles
    bk = min(bk, _round_up(K, 128))
    Mp, Kp, Np = _round_up(M, bm), _round_up(K, bk), _round_up(N, bn)
    if (Mp, Kp) != (M, K):
        x = jnp.pad(x, ((0, Mp - M), (0, Kp - K)))
    if (Kp, Np) != (K, N):
        w = jnp.pad(w, ((0, Kp - K), (0, Np - N)))
    out_itemsize = jnp.dtype(out_dtype).itemsize
    out = pl.pallas_call(
        _matmul_relu_kernel,
        out_shape=jax.ShapeDtypeStruct((Mp, Np), out_dtype),
        grid=(Mp // bm, Np // bn, Kp // bk),
        in_specs=[
            pl.BlockSpec((bm, bk), lambda i, j, k: (i, k)),
            pl.BlockSpec((bk, bn), lambda i, j, k: (k, j)),
        ],
        out_specs=pl.BlockSpec((bm, bn), lambda i, j, k: (i, j)),
        scratch_shapes=[pltpu.VMEM((bm, bn), jnp.float32)],
        compiler_params=pltpu.CompilerParams(
            dimension_semantics=("parallel", "parallel", "arbitrary")),
        cost_estimate=pl.CostEstimate(
            flops=2 * Mp * Np * Kp,
            transcendentals=0,
            bytes_accessed=(Mp * Kp + Kp * Np) * x.dtype.itemsize
            + Mp * Np * out_itemsize),
    )(x, w)
    if (Mp, Np) != (M, N):
        out = out[:M, :N]
    return out


# ---------------------------------------------------------------------------
# Kernel 2: global max-pool (AdaptiveMaxPool2d((1,1))), tiled spatial reduction
# ---------------------------------------------------------------------------
def _global_maxpool_kernel(x_ref, o_ref):
    @pl.when(pl.program_id(1) == 0)
    def _():
        o_ref[...] = jnp.full(o_ref.shape, -jnp.inf, dtype=o_ref.dtype)

    tile_max = jnp.max(x_ref[0].astype(jnp.float32), axis=0, keepdims=True)  # (1, C)
    o_ref[...] = jnp.maximum(o_ref[...], tile_max[None])


def global_maxpool(x_nsc, *, ts=512):
    """x:(N, S, C) -> (N, C) max over the spatial axis (output-resident accumulator)."""
    Nb, S, C = x_nsc.shape
    ts = min(ts, _round_up(S, 8))
    Sp = _round_up(S, ts)
    if Sp != S:
        x_nsc = jnp.pad(x_nsc, ((0, 0), (0, Sp - S), (0, 0)),
                        constant_values=-jnp.inf)
    out = pl.pallas_call(
        _global_maxpool_kernel,
        out_shape=jax.ShapeDtypeStruct((Nb, 1, C), jnp.float32),
        grid=(Nb, Sp // ts),
        in_specs=[pl.BlockSpec((1, ts, C), lambda n, s: (n, s, 0))],
        out_specs=pl.BlockSpec((1, 1, C), lambda n, s: (n, 0, 0)),
        compiler_params=pltpu.CompilerParams(
            dimension_semantics=("parallel", "arbitrary")),
    )(x_nsc)
    return out[:, 0, :]


# ---------------------------------------------------------------------------
# Kernel 3: dilated 3x3 grouped conv + BN + ReLU, no im2col, groups fused
# ---------------------------------------------------------------------------
def _dilated_conv_kernel(x0_ref, x1_ref, x2_ref, w_ref, o_ref, *, dilation, width):
    rows = (x0_ref, x1_ref, x2_ref)
    acc = jnp.zeros(o_ref.shape[2:], jnp.float32)          # (W, mid_c)
    for kh in range(3):
        row = rows[kh][0, 0]                                # (Wp, Cin) bf16
        for kw in range(3):
            acc += jnp.dot(row[kw * dilation:kw * dilation + width, :],
                           w_ref[kh, kw],
                           preferred_element_type=jnp.float32)
    o_ref[0, 0] = jnp.maximum(acc, 0.0).astype(o_ref.dtype)


def dilated_grouped_conv_relu(x_nhwc, w_taps, dilation):
    """x:(N,H,W,Cin) bf16, w_taps:(3,3,Cin,mid_c) bf16 block-diagonal (groups fused, BN
    folded).  Returns (N,H,W,mid_c) bf16.  One pallas_call handles all 9 taps / 4 groups."""
    Nb, H, W, Cin = x_nhwc.shape
    mid_c = w_taps.shape[-1]
    d = int(dilation)
    xp = jnp.pad(x_nhwc, ((0, 0), (d, d), (d, d), (0, 0)))
    Wp = W + 2 * d

    def row_spec(kh):
        # block size 1 along padded-H -> block index == element row h + kh*d (the kh tap).
        return pl.BlockSpec((1, 1, Wp, Cin),
                            lambda n, h, kh=kh: (n, h + kh * d, 0, 0))

    kernel = functools.partial(_dilated_conv_kernel, dilation=d, width=W)
    return pl.pallas_call(
        kernel,
        out_shape=jax.ShapeDtypeStruct((Nb, H, W, mid_c), jnp.bfloat16),
        grid=(Nb, H),
        in_specs=[row_spec(0), row_spec(1), row_spec(2),
                  pl.BlockSpec((3, 3, Cin, mid_c), lambda n, h: (0, 0, 0, 0))],
        out_specs=pl.BlockSpec((1, 1, W, mid_c), lambda n, h: (n, h, 0, 0)),
        compiler_params=pltpu.CompilerParams(
            dimension_semantics=("parallel", "parallel")),
        cost_estimate=pl.CostEstimate(
            flops=2 * Nb * H * W * 9 * Cin * mid_c,
            transcendentals=0,
            bytes_accessed=3 * Nb * H * Wp * Cin * 2
            + 9 * Cin * mid_c * 2 + Nb * H * W * mid_c * 2),
    )(xp, xp, xp, w_taps)


# ---------------------------------------------------------------------------
# Kernel 4: fused concat (channel dim) + 1x1 out_conv + BN + ReLU
# ---------------------------------------------------------------------------
def _concat_out_conv_kernel(*refs):
    gp_ref, w_ref, *branch_refs, o_ref = refs
    # Global-pool branch: bilinear upsample of a 1x1 map == broadcast over the tile rows.
    acc = jnp.dot(gp_ref[0], w_ref[0], preferred_element_type=jnp.float32)   # (1, out_c)
    acc = jnp.broadcast_to(acc, (o_ref.shape[1], acc.shape[-1]))
    for j, bref in enumerate(branch_refs):
        acc = acc + jnp.dot(bref[0], w_ref[j + 1],
                            preferred_element_type=jnp.float32)
    o_ref[0] = jnp.maximum(acc, 0.0).astype(o_ref.dtype)


def concat_out_conv_relu(gp, branches, w_stacked, *, bm=512):
    """gp:(N,1,mid_c) bf16, branches: list of (N,HW,mid_c) bf16,
    w_stacked:(1+len(branches), mid_c, out_c) bf16 (BN folded; block 0 is the gp block).
    Returns relu(concat @ w_out) as (N, HW, out_c) f32 without materializing the concat."""
    Nb, hw, mid_c = branches[0].shape
    out_c = w_stacked.shape[-1]
    bm = min(bm, _round_up(hw, 8))
    hwp = _round_up(hw, bm)
    if hwp != hw:
        branches = [jnp.pad(b, ((0, 0), (0, hwp - hw), (0, 0))) for b in branches]
    branch_spec = pl.BlockSpec((1, bm, mid_c), lambda n, i: (n, i, 0))
    out = pl.pallas_call(
        _concat_out_conv_kernel,
        out_shape=jax.ShapeDtypeStruct((Nb, hwp, out_c), jnp.float32),
        grid=(Nb, hwp // bm),
        in_specs=[pl.BlockSpec((1, 1, mid_c), lambda n, i: (n, 0, 0)),
                  pl.BlockSpec(w_stacked.shape, lambda n, i: (0, 0, 0))]
                 + [branch_spec] * len(branches),
        out_specs=pl.BlockSpec((1, bm, out_c), lambda n, i: (n, i, 0)),
        compiler_params=pltpu.CompilerParams(
            dimension_semantics=("parallel", "parallel")),
        cost_estimate=pl.CostEstimate(
            flops=2 * Nb * hwp * (len(branches) + 1) * mid_c * out_c,
            transcendentals=0,
            bytes_accessed=Nb * hwp * mid_c * 2 * len(branches)
            + Nb * hwp * out_c * 4),
    )(gp, w_stacked, *branches)
    if hwp != hw:
        out = out[:, :hw, :]
    return out


# ---------------------------------------------------------------------------
# Parameter init (deterministic, kaiming_normal_ like torch: std = sqrt(2/fan_in))
# ---------------------------------------------------------------------------
def kaiming_normal(key, shape):
    out_c, in_cg, kh, kw = shape
    fan_in = in_cg * kh * kw
    std = (2.0 / fan_in) ** 0.5
    return std * jax.random.normal(key, shape, dtype=jnp.float32)


def init_aspp_params(key, inplanes, mid_c, dilations, out_c, groups=4):
    keys = jax.random.split(key, 3 + len(dilations))
    params = {}
    params["w_1x1"] = kaiming_normal(keys[0], (mid_c, inplanes, 1, 1))
    params["w_3x3"] = [kaiming_normal(k, (mid_c, inplanes // groups, 3, 3))
                       for k in keys[1:1 + len(dilations)]]
    params["w_gp"] = kaiming_normal(keys[1 + len(dilations)], (mid_c, inplanes, 1, 1))
    params["w_out"] = kaiming_normal(
        keys[2 + len(dilations)], (out_c, mid_c * (2 + len(dilations)), 1, 1))
    return params


def _block_diag_tap_weights(w3, cin, mid_c, groups):
    """torch grouped weight (mid_c, cin//groups, 3, 3) -> block-diagonal (3, 3, cin, mid_c)."""
    cin_g = cin // groups
    cout_g = mid_c // groups
    w = jnp.zeros((3, 3, cin, mid_c), jnp.float32)
    for g in range(groups):
        wg = jnp.transpose(w3[g * cout_g:(g + 1) * cout_g], (2, 3, 1, 0))  # (3,3,cin_g,cout_g)
        w = w.at[:, :, g * cin_g:(g + 1) * cin_g,
                 g * cout_g:(g + 1) * cout_g].set(wg)
    return w


# ---------------------------------------------------------------------------
# ASPP forward
# ---------------------------------------------------------------------------
def aspp_forward(x_nchw, params, dilations, groups=4, eps=1e-5):
    x = jnp.transpose(x_nchw, (0, 2, 3, 1))                       # NCHW -> NHWC
    Nb, H, W, Cin = x.shape
    mid_c = params["w_1x1"].shape[0]
    out_c = params["w_out"].shape[0]
    hw = H * W
    M = Nb * hw

    # BN (inference, fresh stats): scale 1/sqrt(1+eps), shift 0 -> folded into weights.
    bn_scale = 1.0 / jnp.sqrt(jnp.float32(1.0) + eps)

    x_bf = x.astype(jnp.bfloat16)

    # ---- global_pool branch: AdaptiveMaxPool2d((1,1)) -> 1x1 conv -> BN -> ReLU ----
    pooled = global_maxpool(x_bf.reshape(Nb, hw, Cin))             # (N, Cin) f32
    w_gp = (params["w_gp"].reshape(mid_c, Cin).T * bn_scale).astype(jnp.bfloat16)
    gp = matmul_relu(pooled.astype(jnp.bfloat16), w_gp,
                     out_dtype=jnp.bfloat16)                       # (N, mid_c)

    # ---- aspps[0]: 1x1 conv -> BN -> ReLU ----
    w0 = (params["w_1x1"].reshape(mid_c, Cin).T * bn_scale).astype(jnp.bfloat16)
    b0 = matmul_relu(x_bf.reshape(M, Cin), w0, out_dtype=jnp.bfloat16)  # (M, mid_c)

    # ---- aspps[1:]: dilated 3x3 grouped convs -> BN -> ReLU ----
    branches = [b0.reshape(Nb, hw, mid_c)]
    for d, w3 in zip(dilations, params["w_3x3"]):
        w_taps = (_block_diag_tap_weights(w3, Cin, mid_c, groups) * bn_scale
                  ).astype(jnp.bfloat16)
        y = dilated_grouped_conv_relu(x_bf, w_taps, d)             # (N, H, W, mid_c)
        branches.append(y.reshape(Nb, hw, mid_c))

    # ---- fused concat (torch dim=1 == channels) + out_conv -> BN -> ReLU ----
    n_cat = 2 + len(dilations)
    w_out = params["w_out"].reshape(out_c, n_cat * mid_c).T * bn_scale  # (n_cat*mid_c, out_c)
    w_stacked = w_out.reshape(n_cat, mid_c, out_c).astype(jnp.bfloat16)
    out = concat_out_conv_relu(gp.reshape(Nb, 1, mid_c), branches, w_stacked)
    out = out.reshape(Nb, H, W, out_c)
    return jnp.transpose(out, (0, 3, 1, 2))                        # back to NCHW


# ---------------------------------------------------------------------------
# Main
# ---------------------------------------------------------------------------
if __name__ == "__main__":
    key = jax.random.PRNGKey(0)
    k_in, k_par = jax.random.split(key)

    # Small shapes consistent with ASPP(inplanes, mid_c, dilations)
    Nb, Cin, H, W = 2, 16, 16, 16
    mid_c = 8
    dilations = (1, 2, 3, 4)
    out_c = mid_c
    groups = 4

    x = jax.random.normal(k_in, (Nb, Cin, H, W), dtype=jnp.float32)
    params = init_aspp_params(k_par, Cin, mid_c, list(dilations), out_c, groups=groups)

    fwd = jax.jit(functools.partial(aspp_forward, dilations=dilations, groups=groups))
    y = fwd(x, params)
    jax.block_until_ready(y)
    assert y.shape == (Nb, out_c, H, W), y.shape
    assert bool(jnp.all(jnp.isfinite(y)))
    print("KERNEL_OK")
</pallas_src>

<mosaic_0001>
module attributes {stable_mosaic.version = 11 : i64} {
  func.func @_dilated_conv_kernel(%arg0: i32, %arg1: i32, %arg2: memref<1x1x24x16xbf16, #tpu.memory_space<vmem>>, %arg3: memref<1x1x24x16xbf16, #tpu.memory_space<vmem>>, %arg4: memref<1x1x24x16xbf16, #tpu.memory_space<vmem>>, %arg5: memref<3x3x16x8xbf16, #tpu.memory_space<vmem>>, %arg6: memref<1x1x16x8xbf16, #tpu.memory_space<vmem>>) attributes {dimension_semantics = [#tpu.dimension_semantics<parallel>, #tpu.dimension_semantics<parallel>], iteration_bounds = array<i64: 2, 16>, scalar_prefetch = 0 : i64, scratch_operands = 0 : i64, tpu.core_type = #tpu.core_type<tc>, window_params = [{transform_indices = @transform_0, window_bounds = array<i64: 1, 1, 24, 16>}, {transform_indices = @transform_1, window_bounds = array<i64: 1, 1, 24, 16>}, {transform_indices = @transform_2, window_bounds = array<i64: 1, 1, 24, 16>}, {pipeline_mode = #tpu.pipeline_mode<synchronous>, transform_indices = @transform_3, window_bounds = array<i64: 3, 3, 16, 8>}, {transform_indices = @transform_4, window_bounds = array<i64: 1, 1, 16, 8>}]} {
    %cst = arith.constant 0.000000e+00 : f32
    %0 = vector.broadcast %cst : f32 to vector<16x8xf32>
    %c0 = arith.constant 0 : index
    %c0_0 = arith.constant 0 : index
    %c0_1 = arith.constant 0 : index
    %c0_2 = arith.constant 0 : index
    %1 = vector.load %arg2[%c0, %c0_0, %c0_1, %c0_2] : memref<1x1x24x16xbf16, #tpu.memory_space<vmem>>, vector<1x1x24x16xbf16>
    %2 = vector.shape_cast %1 : vector<1x1x24x16xbf16> to vector<24x16xbf16>
    %3 = vector.extract_strided_slice %2 {offsets = [0, 0], sizes = [16, 16], strides = [1, 1]} : vector<24x16xbf16> to vector<16x16xbf16>
    %c0_3 = arith.constant 0 : index
    %c0_4 = arith.constant 0 : index
    %c0_5 = arith.constant 0 : index
    %c0_6 = arith.constant 0 : index
    %4 = vector.load %arg5[%c0_3, %c0_4, %c0_5, %c0_6] : memref<3x3x16x8xbf16, #tpu.memory_space<vmem>>, vector<1x1x16x8xbf16>
    %5 = vector.shape_cast %4 : vector<1x1x16x8xbf16> to vector<16x8xbf16>
    %cst_7 = arith.constant dense<0.000000e+00> : vector<16x8xf32>
    %6 = tpu.matmul %3, %5, %cst_7 {dimension_numbers = #tpu.dot_dimension_numbers<[1], [0], [0], [1], [0, 0, 1, 1], [], []>} : vector<16x16xbf16>, vector<16x8xbf16>, vector<16x8xf32> -> vector<16x8xf32>
    %7 = arith.addf %0, %6 : vector<16x8xf32>
    %8 = vector.extract_strided_slice %2 {offsets = [4, 0], sizes = [16, 16], strides = [1, 1]} : vector<24x16xbf16> to vector<16x16xbf16>
    %c0_8 = arith.constant 0 : index
    %c1 = arith.constant 1 : index
    %c0_9 = arith.constant 0 : index
    %c0_10 = arith.constant 0 : index
    %9 = vector.load %arg5[%c0_8, %c1, %c0_9, %c0_10] : memref<3x3x16x8xbf16, #tpu.memory_space<vmem>>, vector<1x1x16x8xbf16>
    %10 = vector.shape_cast %9 : vector<1x1x16x8xbf16> to vector<16x8xbf16>
    %cst_11 = arith.constant dense<0.000000e+00> : vector<16x8xf32>
    %11 = tpu.matmul %8, %10, %cst_11 {dimension_numbers = #tpu.dot_dimension_numbers<[1], [0], [0], [1], [0, 0, 1, 1], [], []>} : vector<16x16xbf16>, vector<16x8xbf16>, vector<16x8xf32> -> vector<16x8xf32>
    %12 = arith.addf %7, %11 : vector<16x8xf32>
    %13 = vector.extract_strided_slice %2 {offsets = [8, 0], sizes = [16, 16], strides = [1, 1]} : vector<24x16xbf16> to vector<16x16xbf16>
    %c0_12 = arith.constant 0 : index
    %c2 = arith.constant 2 : index
    %c0_13 = arith.constant 0 : index
    %c0_14 = arith.constant 0 : index
    %14 = vector.load %arg5[%c0_12, %c2, %c0_13, %c0_14] : memref<3x3x16x8xbf16, #tpu.memory_space<vmem>>, vector<1x1x16x8xbf16>
    %15 = vector.shape_cast %14 : vector<1x1x16x8xbf16> to vector<16x8xbf16>
    %cst_15 = arith.constant dense<0.000000e+00> : vector<16x8xf32>
    %16 = tpu.matmul %13, %15, %cst_15 {dimension_numbers = #tpu.dot_dimension_numbers<[1], [0], [0], [1], [0, 0, 1, 1], [], []>} : vector<16x16xbf16>, vector<16x8xbf16>, vector<16x8xf32> -> vector<16x8xf32>
    %17 = arith.addf %12, %16 : vector<16x8xf32>
    %c0_16 = arith.constant 0 : index
    %c0_17 = arith.constant 0 : index
    %c0_18 = arith.constant 0 : index
    %c0_19 = arith.constant 0 : index
    %18 = vector.load %arg3[%c0_16, %c0_17, %c0_18, %c0_19] : memref<1x1x24x16xbf16, #tpu.memory_space<vmem>>, vector<1x1x24x16xbf16>
    %19 = vector.shape_cast %18 : vector<1x1x24x16xbf16> to vector<24x16xbf16>
    %20 = vector.extract_strided_slice %19 {offsets = [0, 0], sizes = [16, 16], strides = [1, 1]} : vector<24x16xbf16> to vector<16x16xbf16>
    %c1_20 = arith.constant 1 : index
    %c0_21 = arith.constant 0 : index
    %c0_22 = arith.constant 0 : index
    %c0_23 = arith.constant 0 : index
    %21 = vector.load %arg5[%c1_20, %c0_21, %c0_22, %c0_23] : memref<3x3x16x8xbf16, #tpu.memory_space<vmem>>, vector<1x1x16x8xbf16>
    %22 = vector.shape_cast %21 : vector<1x1x16x8xbf16> to vector<16x8xbf16>
    %cst_24 = arith.constant dense<0.000000e+00> : vector<16x8xf32>
    %23 = tpu.matmul %20, %22, %cst_24 {dimension_numbers = #tpu.dot_dimension_numbers<[1], [0], [0], [1], [0, 0, 1, 1], [], []>} : vector<16x16xbf16>, vector<16x8xbf16>, vector<16x8xf32> -> vector<16x8xf32>
    %24 = arith.addf %17, %23 : vector<16x8xf32>
    %25 = vector.extract_strided_slice %19 {offsets = [4, 0], sizes = [16, 16], strides = [1, 1]} : vector<24x16xbf16> to vector<16x16xbf16>
    %c1_25 = arith.constant 1 : index
    %c1_26 = arith.constant 1 : index
    %c0_27 = arith.constant 0 : index
    %c0_28 = arith.constant 0 : index
    %26 = vector.load %arg5[%c1_25, %c1_26, %c0_27, %c0_28] : memref<3x3x16x8xbf16, #tpu.memory_space<vmem>>, vector<1x1x16x8xbf16>
    %27 = vector.shape_cast %26 : vector<1x1x16x8xbf16> to vector<16x8xbf16>
    %cst_29 = arith.constant dense<0.000000e+00> : vector<16x8xf32>
    %28 = tpu.matmul %25, %27, %cst_29 {dimension_numbers = #tpu.dot_dimension_numbers<[1], [0], [0], [1], [0, 0, 1, 1], [], []>} : vector<16x16xbf16>, vector<16x8xbf16>, vector<16x8xf32> -> vector<16x8xf32>
    %29 = arith.addf %24, %28 : vector<16x8xf32>
    %30 = vector.extract_strided_slice %19 {offsets = [8, 0], sizes = [16, 16], strides = [1, 1]} : vector<24x16xbf16> to vector<16x16xbf16>
    %c1_30 = arith.constant 1 : index
    %c2_31 = arith.constant 2 : index
    %c0_32 = arith.constant 0 : index
    %c0_33 = arith.constant 0 : index
    %31 = vector.load %arg5[%c1_30, %c2_31, %c0_32, %c0_33] : memref<3x3x16x8xbf16, #tpu.memory_space<vmem>>, vector<1x1x16x8xbf16>
    %32 = vector.shape_cast %31 : vector<1x1x16x8xbf16> to vector<16x8xbf16>
    %cst_34 = arith.constant dense<0.000000e+00> : vector<16x8xf32>
    %33 = tpu.matmul %30, %32, %cst_34 {dimension_numbers = #tpu.dot_dimension_numbers<[1], [0], [0], [1], [0, 0, 1, 1], [], []>} : vector<16x16xbf16>, vector<16x8xbf16>, vector<16x8xf32> -> vector<16x8xf32>
    %34 = arith.addf %29, %33 : vector<16x8xf32>
    %c0_35 = arith.constant 0 : index
    %c0_36 = arith.constant 0 : index
    %c0_37 = arith.constant 0 : index
    %c0_38 = arith.constant 0 : index
    %35 = vector.load %arg4[%c0_35, %c0_36, %c0_37, %c0_38] : memref<1x1x24x16xbf16, #tpu.memory_space<vmem>>, vector<1x1x24x16xbf16>
    %36 = vector.shape_cast %35 : vector<1x1x24x16xbf16> to vector<24x16xbf16>
    %37 = vector.extract_strided_slice %36 {offsets = [0, 0], sizes = [16, 16], strides = [1, 1]} : vector<24x16xbf16> to vector<16x16xbf16>
    %c2_39 = arith.constant 2 : index
    %c0_40 = arith.constant 0 : index
    %c0_41 = arith.constant 0 : index
    %c0_42 = arith.constant 0 : index
    %38 = vector.load %arg5[%c2_39, %c0_40, %c0_41, %c0_42] : memref<3x3x16x8xbf16, #tpu.memory_space<vmem>>, vector<1x1x16x8xbf16>
    %39 = vector.shape_cast %38 : vector<1x1x16x8xbf16> to vector<16x8xbf16>
    %cst_43 = arith.constant dense<0.000000e+00> : vector<16x8xf32>
    %40 = tpu.matmul %37, %39, %cst_43 {dimension_numbers = #tpu.dot_dimension_numbers<[1], [0], [0], [1], [0, 0, 1, 1], [], []>} : vector<16x16xbf16>, vector<16x8xbf16>, vector<16x8xf32> -> vector<16x8xf32>
    %41 = arith.addf %34, %40 : vector<16x8xf32>
    %42 = vector.extract_strided_slice %36 {offsets = [4, 0], sizes = [16, 16], strides = [1, 1]} : vector<24x16xbf16> to vector<16x16xbf16>
    %c2_44 = arith.constant 2 : index
    %c1_45 = arith.constant 1 : index
    %c0_46 = arith.constant 0 : index
    %c0_47 = arith.constant 0 : index
    %43 = vector.load %arg5[%c2_44, %c1_45, %c0_46, %c0_47] : memref<3x3x16x8xbf16, #tpu.memory_space<vmem>>, vector<1x1x16x8xbf16>
    %44 = vector.shape_cast %43 : vector<1x1x16x8xbf16> to vector<16x8xbf16>
    %cst_48 = arith.constant dense<0.000000e+00> : vector<16x8xf32>
    %45 = tpu.matmul %42, %44, %cst_48 {dimension_numbers = #tpu.dot_dimension_numbers<[1], [0], [0], [1], [0, 0, 1, 1], [], []>} : vector<16x16xbf16>, vector<16x8xbf16>, vector<16x8xf32> -> vector<16x8xf32>
    %46 = arith.addf %41, %45 : vector<16x8xf32>
    %47 = vector.extract_strided_slice %36 {offsets = [8, 0], sizes = [16, 16], strides = [1, 1]} : vector<24x16xbf16> to vector<16x16xbf16>
    %c2_49 = arith.constant 2 : index
    %c2_50 = arith.constant 2 : index
    %c0_51 = arith.constant 0 : index
    %c0_52 = arith.constant 0 : index
    %48 = vector.load %arg5[%c2_49, %c2_50, %c0_51, %c0_52] : memref<3x3x16x8xbf16, #tpu.memory_space<vmem>>, vector<1x1x16x8xbf16>
    %49 = vector.shape_cast %48 : vector<1x1x16x8xbf16> to vector<16x8xbf16>
    %cst_53 = arith.constant dense<0.000000e+00> : vector<16x8xf32>
    %50 = tpu.matmul %47, %49, %cst_53 {dimension_numbers = #tpu.dot_dimension_numbers<[1], [0], [0], [1], [0, 0, 1, 1], [], []>} : vector<16x16xbf16>, vector<16x8xbf16>, vector<16x8xf32> -> vector<16x8xf32>
    %51 = arith.addf %46, %50 : vector<16x8xf32>
    %cst_54 = arith.constant 0.000000e+00 : f32
    %52 = vector.broadcast %cst_54 : f32 to vector<16x8xf32>
    %53 = arith.maximumf %51, %52 : vector<16x8xf32>
    %54 = arith.truncf %53 : vector<16x8xf32> to vector<16x8xbf16>
    %c0_55 = arith.constant 0 : index
    %c0_56 = arith.constant 0 : index
    %c0_57 = arith.constant 0 : index
    %c0_58 = arith.constant 0 : index
    %55 = vector.load %arg6[%c0_55, %c0_56, %c0_57, %c0_58] : memref<1x1x16x8xbf16, #tpu.memory_space<vmem>>, vector<1x1x16x8xbf16>
    %56 = vector.shape_cast %55 : vector<1x1x16x8xbf16> to vector<16x8xbf16>
    %57 = vector.shape_cast %54 : vector<16x8xbf16> to vector<1x1x16x8xbf16>
    tpu.vector_store %arg6[%c0_55, %c0_56, %c0_57, %c0_58], %57 {strides = array<i32>} : memref<1x1x16x8xbf16, #tpu.memory_space<vmem>>, vector<1x1x16x8xbf16>,
    return
  }
  func.func @transform_0(%arg0: i32, %arg1: i32) -> (i32, i32, i32, i32) {
    %c0_i32 = arith.constant 0 : i32
    %0 = arith.addi %arg1, %c0_i32 : i32
    %c0_i32_0 = arith.constant 0 : i32
    %c0_i32_1 = arith.constant 0 : i32
    %c0_i32_2 = arith.constant 0 : i32
    return %arg0, %0, %c0_i32_0, %c0_i32_1 : i32, i32, i32, i32
  }
  func.func @transform_1(%arg0: i32, %arg1: i32) -> (i32, i32, i32, i32) {
    %c4_i32 = arith.constant 4 : i32
    %0 = arith.addi %arg1, %c4_i32 : i32
    %c0_i32 = arith.constant 0 : i32
    %c0_i32_0 = arith.constant 0 : i32
    %c0_i32_1 = arith.constant 0 : i32
    return %arg0, %0, %c0_i32, %c0_i32_0 : i32, i32, i32, i32
  }
  func.func @transform_2(%arg0: i32, %arg1: i32) -> (i32, i32, i32, i32) {
    %c8_i32 = arith.constant 8 : i32
    %0 = arith.addi %arg1, %c8_i32 : i32
    %c0_i32 = arith.constant 0 : i32
    %c0_i32_0 = arith.constant 0 : i32
    %c0_i32_1 = arith.constant 0 : i32
    return %arg0, %0, %c0_i32, %c0_i32_0 : i32, i32, i32, i32
  }
  func.func @transform_3(%arg0: i32, %arg1: i32) -> (i32, i32, i32, i32) {
    %c0_i32 = arith.constant 0 : i32
    %c0_i32_0 = arith.constant 0 : i32
    %c0_i32_1 = arith.constant 0 : i32
    %c0_i32_2 = arith.constant 0 : i32
    %c0_i32_3 = arith.constant 0 : i32
    return %c0_i32, %c0_i32_0, %c0_i32_1, %c0_i32_2 : i32, i32, i32, i32
  }
  func.func @transform_4(%arg0: i32, %arg1: i32) -> (i32, i32, i32, i32) {
    %c0_i32 = arith.constant 0 : i32
    %c0_i32_0 = arith.constant 0 : i32
    %c0_i32_1 = arith.constant 0 : i32
    return %arg0, %arg1, %c0_i32, %c0_i32_0 : i32, i32, i32, i32
  }
}

module attributes {stable_mosaic.version = 11 : i64} {
  func.func @_dilated_conv_kernel(%arg0: i32, %arg1: i32, %arg2: memref<1x1x22x16xbf16, #tpu.memory_space<vmem>>, %arg3: memref<1x1x22x16xbf16, #tpu.memory_space<vmem>>, %arg4: memref<1x1x22x16xbf16, #tpu.memory_space<vmem>>, %arg5: memref<3x3x16x8xbf16, #tpu.memory_space<vmem>>, %arg6: memref<1x1x16x8xbf16, #tpu.memory_space<vmem>>) attributes {dimension_semantics = [#tpu.dimension_semantics<parallel>, #tpu.dimension_semantics<parallel>], iteration_bounds = array<i64: 2, 16>, scalar_prefetch = 0 : i64, scratch_operands = 0 : i64, tpu.core_type = #tpu.core_type<tc>, window_params = [{transform_indices = @transform_0, window_bounds = array<i64: 1, 1, 22, 16>}, {transform_indices = @transform_1, window_bounds = array<i64: 1, 1, 22, 16>}, {transform_indices = @transform_2, window_bounds = array<i64: 1, 1, 22, 16>}, {pipeline_mode = #tpu.pipeline_mode<synchronous>, transform_indices = @transform_3, window_bounds = array<i64: 3, 3, 16, 8>}, {transform_indices = @transform_4, window_bounds = array<i64: 1, 1, 16, 8>}]} {
    %cst = arith.constant 0.000000e+00 : f32
    %0 = vector.broadcast %cst : f32 to vector<16x8xf32>
    %c0 = arith.constant 0 : index
    %c0_0 = arith.constant 0 : index
    %c0_1 = arith.constant 0 : index
    %c0_2 = arith.constant 0 : index
    %1 = vector.load %arg2[%c0, %c0_0, %c0_1, %c0_2] : memref<1x1x22x16xbf16, #tpu.memory_space<vmem>>, vector<1x1x22x16xbf16>
    %2 = vector.shape_cast %1 : vector<1x1x22x16xbf16> to vector<22x16xbf16>
    %3 = vector.extract_strided_slice %2 {offsets = [0, 0], sizes = [16, 16], strides = [1, 1]} : vector<22x16xbf16> to vector<16x16xbf16>
    %c0_3 = arith.constant 0 : index
    %c0_4 = arith.constant 0 : index
    %c0_5 = arith.constant 0 : index
    %c0_6 = arith.constant 0 : index
    %4 = vector.load %arg5[%c0_3, %c0_4, %c0_5, %c0_6] : memref<3x3x16x8xbf16, #tpu.memory_space<vmem>>, vector<1x1x16x8xbf16>
    %5 = vector.shape_cast %4 : vector<1x1x16x8xbf16> to vector<16x8xbf16>
    %cst_7 = arith.constant dense<0.000000e+00> : vector<16x8xf32>
    %6 = tpu.matmul %3, %5, %cst_7 {dimension_numbers = #tpu.dot_dimension_numbers<[1], [0], [0], [1], [0, 0, 1, 1], [], []>} : vector<16x16xbf16>, vector<16x8xbf16>, vector<16x8xf32> -> vector<16x8xf32>
    %7 = arith.addf %0, %6 : vector<16x8xf32>
    %8 = vector.extract_strided_slice %2 {offsets = [3, 0], sizes = [16, 16], strides = [1, 1]} : vector<22x16xbf16> to vector<16x16xbf16>
    %c0_8 = arith.constant 0 : index
    %c1 = arith.constant 1 : index
    %c0_9 = arith.constant 0 : index
    %c0_10 = arith.constant 0 : index
    %9 = vector.load %arg5[%c0_8, %c1, %c0_9, %c0_10] : memref<3x3x16x8xbf16, #tpu.memory_space<vmem>>, vector<1x1x16x8xbf16>
    %10 = vector.shape_cast %9 : vector<1x1x16x8xbf16> to vector<16x8xbf16>
    %cst_11 = arith.constant dense<0.000000e+00> : vector<16x8xf32>
    %11 = tpu.matmul %8, %10, %cst_11 {dimension_numbers = #tpu.dot_dimension_numbers<[1], [0], [0], [1], [0, 0, 1, 1], [], []>} : vector<16x16xbf16>, vector<16x8xbf16>, vector<16x8xf32> -> vector<16x8xf32>
    %12 = arith.addf %7, %11 : vector<16x8xf32>
    %13 = vector.extract_strided_slice %2 {offsets = [6, 0], sizes = [16, 16], strides = [1, 1]} : vector<22x16xbf16> to vector<16x16xbf16>
    %c0_12 = arith.constant 0 : index
    %c2 = arith.constant 2 : index
    %c0_13 = arith.constant 0 : index
    %c0_14 = arith.constant 0 : index
    %14 = vector.load %arg5[%c0_12, %c2, %c0_13, %c0_14] : memref<3x3x16x8xbf16, #tpu.memory_space<vmem>>, vector<1x1x16x8xbf16>
    %15 = vector.shape_cast %14 : vector<1x1x16x8xbf16> to vector<16x8xbf16>
    %cst_15 = arith.constant dense<0.000000e+00> : vector<16x8xf32>
    %16 = tpu.matmul %13, %15, %cst_15 {dimension_numbers = #tpu.dot_dimension_numbers<[1], [0], [0], [1], [0, 0, 1, 1], [], []>} : vector<16x16xbf16>, vector<16x8xbf16>, vector<16x8xf32> -> vector<16x8xf32>
    %17 = arith.addf %12, %16 : vector<16x8xf32>
    %c0_16 = arith.constant 0 : index
    %c0_17 = arith.constant 0 : index
    %c0_18 = arith.constant 0 : index
    %c0_19 = arith.constant 0 : index
    %18 = vector.load %arg3[%c0_16, %c0_17, %c0_18, %c0_19] : memref<1x1x22x16xbf16, #tpu.memory_space<vmem>>, vector<1x1x22x16xbf16>
    %19 = vector.shape_cast %18 : vector<1x1x22x16xbf16> to vector<22x16xbf16>
    %20 = vector.extract_strided_slice %19 {offsets = [0, 0], sizes = [16, 16], strides = [1, 1]} : vector<22x16xbf16> to vector<16x16xbf16>
    %c1_20 = arith.constant 1 : index
    %c0_21 = arith.constant 0 : index
    %c0_22 = arith.constant 0 : index
    %c0_23 = arith.constant 0 : index
    %21 = vector.load %arg5[%c1_20, %c0_21, %c0_22, %c0_23] : memref<3x3x16x8xbf16, #tpu.memory_space<vmem>>, vector<1x1x16x8xbf16>
    %22 = vector.shape_cast %21 : vector<1x1x16x8xbf16> to vector<16x8xbf16>
    %cst_24 = arith.constant dense<0.000000e+00> : vector<16x8xf32>
    %23 = tpu.matmul %20, %22, %cst_24 {dimension_numbers = #tpu.dot_dimension_numbers<[1], [0], [0], [1], [0, 0, 1, 1], [], []>} : vector<16x16xbf16>, vector<16x8xbf16>, vector<16x8xf32> -> vector<16x8xf32>
    %24 = arith.addf %17, %23 : vector<16x8xf32>
    %25 = vector.extract_strided_slice %19 {offsets = [3, 0], sizes = [16, 16], strides = [1, 1]} : vector<22x16xbf16> to vector<16x16xbf16>
    %c1_25 = arith.constant 1 : index
    %c1_26 = arith.constant 1 : index
    %c0_27 = arith.constant 0 : index
    %c0_28 = arith.constant 0 : index
    %26 = vector.load %arg5[%c1_25, %c1_26, %c0_27, %c0_28] : memref<3x3x16x8xbf16, #tpu.memory_space<vmem>>, vector<1x1x16x8xbf16>
    %27 = vector.shape_cast %26 : vector<1x1x16x8xbf16> to vector<16x8xbf16>
    %cst_29 = arith.constant dense<0.000000e+00> : vector<16x8xf32>
    %28 = tpu.matmul %25, %27, %cst_29 {dimension_numbers = #tpu.dot_dimension_numbers<[1], [0], [0], [1], [0, 0, 1, 1], [], []>} : vector<16x16xbf16>, vector<16x8xbf16>, vector<16x8xf32> -> vector<16x8xf32>
    %29 = arith.addf %24, %28 : vector<16x8xf32>
    %30 = vector.extract_strided_slice %19 {offsets = [6, 0], sizes = [16, 16], strides = [1, 1]} : vector<22x16xbf16> to vector<16x16xbf16>
    %c1_30 = arith.constant 1 : index
    %c2_31 = arith.constant 2 : index
    %c0_32 = arith.constant 0 : index
    %c0_33 = arith.constant 0 : index
    %31 = vector.load %arg5[%c1_30, %c2_31, %c0_32, %c0_33] : memref<3x3x16x8xbf16, #tpu.memory_space<vmem>>, vector<1x1x16x8xbf16>
    %32 = vector.shape_cast %31 : vector<1x1x16x8xbf16> to vector<16x8xbf16>
    %cst_34 = arith.constant dense<0.000000e+00> : vector<16x8xf32>
    %33 = tpu.matmul %30, %32, %cst_34 {dimension_numbers = #tpu.dot_dimension_numbers<[1], [0], [0], [1], [0, 0, 1, 1], [], []>} : vector<16x16xbf16>, vector<16x8xbf16>, vector<16x8xf32> -> vector<16x8xf32>
    %34 = arith.addf %29, %33 : vector<16x8xf32>
    %c0_35 = arith.constant 0 : index
    %c0_36 = arith.constant 0 : index
    %c0_37 = arith.constant 0 : index
    %c0_38 = arith.constant 0 : index
    %35 = vector.load %arg4[%c0_35, %c0_36, %c0_37, %c0_38] : memref<1x1x22x16xbf16, #tpu.memory_space<vmem>>, vector<1x1x22x16xbf16>
    %36 = vector.shape_cast %35 : vector<1x1x22x16xbf16> to vector<22x16xbf16>
    %37 = vector.extract_strided_slice %36 {offsets = [0, 0], sizes = [16, 16], strides = [1, 1]} : vector<22x16xbf16> to vector<16x16xbf16>
    %c2_39 = arith.constant 2 : index
    %c0_40 = arith.constant 0 : index
    %c0_41 = arith.constant 0 : index
    %c0_42 = arith.constant 0 : index
    %38 = vector.load %arg5[%c2_39, %c0_40, %c0_41, %c0_42] : memref<3x3x16x8xbf16, #tpu.memory_space<vmem>>, vector<1x1x16x8xbf16>
    %39 = vector.shape_cast %38 : vector<1x1x16x8xbf16> to vector<16x8xbf16>
    %cst_43 = arith.constant dense<0.000000e+00> : vector<16x8xf32>
    %40 = tpu.matmul %37, %39, %cst_43 {dimension_numbers = #tpu.dot_dimension_numbers<[1], [0], [0], [1], [0, 0, 1, 1], [], []>} : vector<16x16xbf16>, vector<16x8xbf16>, vector<16x8xf32> -> vector<16x8xf32>
    %41 = arith.addf %34, %40 : vector<16x8xf32>
    %42 = vector.extract_strided_slice %36 {offsets = [3, 0], sizes = [16, 16], strides = [1, 1]} : vector<22x16xbf16> to vector<16x16xbf16>
    %c2_44 = arith.constant 2 : index
    %c1_45 = arith.constant 1 : index
    %c0_46 = arith.constant 0 : index
    %c0_47 = arith.constant 0 : index
    %43 = vector.load %arg5[%c2_44, %c1_45, %c0_46, %c0_47] : memref<3x3x16x8xbf16, #tpu.memory_space<vmem>>, vector<1x1x16x8xbf16>
    %44 = vector.shape_cast %43 : vector<1x1x16x8xbf16> to vector<16x8xbf16>
    %cst_48 = arith.constant dense<0.000000e+00> : vector<16x8xf32>
    %45 = tpu.matmul %42, %44, %cst_48 {dimension_numbers = #tpu.dot_dimension_numbers<[1], [0], [0], [1], [0, 0, 1, 1], [], []>} : vector<16x16xbf16>, vector<16x8xbf16>, vector<16x8xf32> -> vector<16x8xf32>
    %46 = arith.addf %41, %45 : vector<16x8xf32>
    %47 = vector.extract_strided_slice %36 {offsets = [6, 0], sizes = [16, 16], strides = [1, 1]} : vector<22x16xbf16> to vector<16x16xbf16>
    %c2_49 = arith.constant 2 : index
    %c2_50 = arith.constant 2 : index
    %c0_51 = arith.constant 0 : index
    %c0_52 = arith.constant 0 : index
    %48 = vector.load %arg5[%c2_49, %c2_50, %c0_51, %c0_52] : memref<3x3x16x8xbf16, #tpu.memory_space<vmem>>, vector<1x1x16x8xbf16>
    %49 = vector.shape_cast %48 : vector<1x1x16x8xbf16> to vector<16x8xbf16>
    %cst_53 = arith.constant dense<0.000000e+00> : vector<16x8xf32>
    %50 = tpu.matmul %47, %49, %cst_53 {dimension_numbers = #tpu.dot_dimension_numbers<[1], [0], [0], [1], [0, 0, 1, 1], [], []>} : vector<16x16xbf16>, vector<16x8xbf16>, vector<16x8xf32> -> vector<16x8xf32>
    %51 = arith.addf %46, %50 : vector<16x8xf32>
    %cst_54 = arith.constant 0.000000e+00 : f32
    %52 = vector.broadcast %cst_54 : f32 to vector<16x8xf32>
    %53 = arith.maximumf %51, %52 : vector<16x8xf32>
    %54 = arith.truncf %53 : vector<16x8xf32> to vector<16x8xbf16>
    %c0_55 = arith.constant 0 : index
    %c0_56 = arith.constant 0 : index
    %c0_57 = arith.constant 0 : index
    %c0_58 = arith.constant 0 : index
    %55 = vector.load %arg6[%c0_55, %c0_56, %c0_57, %c0_58] : memref<1x1x16x8xbf16, #tpu.memory_space<vmem>>, vector<1x1x16x8xbf16>
    %56 = vector.shape_cast %55 : vector<1x1x16x8xbf16> to vector<16x8xbf16>
    %57 = vector.shape_cast %54 : vector<16x8xbf16> to vector<1x1x16x8xbf16>
    tpu.vector_store %arg6[%c0_55, %c0_56, %c0_57, %c0_58], %57 {strides = array<i32>} : memref<1x1x16x8xbf16, #tpu.memory_space<vmem>>, vector<1x1x16x8xbf16>,
    return
  }
  func.func @transform_0(%arg0: i32, %arg1: i32) -> (i32, i32, i32, i32) {
    %c0_i32 = arith.constant 0 : i32
    %0 = arith.addi %arg1, %c0_i32 : i32
    %c0_i32_0 = arith.constant 0 : i32
    %c0_i32_1 = arith.constant 0 : i32
    %c0_i32_2 = arith.constant 0 : i32
    return %arg0, %0, %c0_i32_0, %c0_i32_1 : i32, i32, i32, i32
  }
  func.func @transform_1(%arg0: i32, %arg1: i32) -> (i32, i32, i32, i32) {
    %c3_i32 = arith.constant 3 : i32
    %0 = arith.addi %arg1, %c3_i32 : i32
    %c0_i32 = arith.constant 0 : i32
    %c0_i32_0 = arith.constant 0 : i32
    %c0_i32_1 = arith.constant 0 : i32
    return %arg0, %0, %c0_i32, %c0_i32_0 : i32, i32, i32, i32
  }
  func.func @transform_2(%arg0: i32, %arg1: i32) -> (i32, i32, i32, i32) {
    %c6_i32 = arith.constant 6 : i32
    %0 = arith.addi %arg1, %c6_i32 : i32
    %c0_i32 = arith.constant 0 : i32
    %c0_i32_0 = arith.constant 0 : i32
    %c0_i32_1 = arith.constant 0 : i32
    return %arg0, %0, %c0_i32, %c0_i32_0 : i32, i32, i32, i32
  }
  func.func @transform_3(%arg0: i32, %arg1: i32) -> (i32, i32, i32, i32) {
    %c0_i32 = arith.constant 0 : i32
    %c0_i32_0 = arith.constant 0 : i32
    %c0_i32_1 = arith.constant 0 : i32
    %c0_i32_2 = arith.constant 0 : i32
    %c0_i32_3 = arith.constant 0 : i32
    return %c0_i32, %c0_i32_0, %c0_i32_1, %c0_i32_2 : i32, i32, i32, i32
  }
  func.func @transform_4(%arg0: i32, %arg1: i32) -> (i32, i32, i32, i32) {
    %c0_i32 = arith.constant 0 : i32
    %c0_i32_0 = arith.constant 0 : i32
    %c0_i32_1 = arith.constant 0 : i32
    return %arg0, %arg1, %c0_i32, %c0_i32_0 : i32, i32, i32, i32
  }
}

module attributes {stable_mosaic.version = 11 : i64} {
  func.func @_dilated_conv_kernel(%arg0: i32, %arg1: i32, %arg2: memref<1x1x20x16xbf16, #tpu.memory_space<vmem>>, %arg3: memref<1x1x20x16xbf16, #tpu.memory_space<vmem>>, %arg4: memref<1x1x20x16xbf16, #tpu.memory_space<vmem>>, %arg5: memref<3x3x16x8xbf16, #tpu.memory_space<vmem>>, %arg6: memref<1x1x16x8xbf16, #tpu.memory_space<vmem>>) attributes {dimension_semantics = [#tpu.dimension_semantics<parallel>, #tpu.dimension_semantics<parallel>], iteration_bounds = array<i64: 2, 16>, scalar_prefetch = 0 : i64, scratch_operands = 0 : i64, tpu.core_type = #tpu.core_type<tc>, window_params = [{transform_indices = @transform_0, window_bounds = array<i64: 1, 1, 20, 16>}, {transform_indices = @transform_1, window_bounds = array<i64: 1, 1, 20, 16>}, {transform_indices = @transform_2, window_bounds = array<i64: 1, 1, 20, 16>}, {pipeline_mode = #tpu.pipeline_mode<synchronous>, transform_indices = @transform_3, window_bounds = array<i64: 3, 3, 16, 8>}, {transform_indices = @transform_4, window_bounds = array<i64: 1, 1, 16, 8>}]} {
    %cst = arith.constant 0.000000e+00 : f32
    %0 = vector.broadcast %cst : f32 to vector<16x8xf32>
    %c0 = arith.constant 0 : index
    %c0_0 = arith.constant 0 : index
    %c0_1 = arith.constant 0 : index
    %c0_2 = arith.constant 0 : index
    %1 = vector.load %arg2[%c0, %c0_0, %c0_1, %c0_2] : memref<1x1x20x16xbf16, #tpu.memory_space<vmem>>, vector<1x1x20x16xbf16>
    %2 = vector.shape_cast %1 : vector<1x1x20x16xbf16> to vector<20x16xbf16>
    %3 = vector.extract_strided_slice %2 {offsets = [0, 0], sizes = [16, 16], strides = [1, 1]} : vector<20x16xbf16> to vector<16x16xbf16>
    %c0_3 = arith.constant 0 : index
    %c0_4 = arith.constant 0 : index
    %c0_5 = arith.constant 0 : index
    %c0_6 = arith.constant 0 : index
    %4 = vector.load %arg5[%c0_3, %c0_4, %c0_5, %c0_6] : memref<3x3x16x8xbf16, #tpu.memory_space<vmem>>, vector<1x1x16x8xbf16>
    %5 = vector.shape_cast %4 : vector<1x1x16x8xbf16> to vector<16x8xbf16>
    %cst_7 = arith.constant dense<0.000000e+00> : vector<16x8xf32>
    %6 = tpu.matmul %3, %5, %cst_7 {dimension_numbers = #tpu.dot_dimension_numbers<[1], [0], [0], [1], [0, 0, 1, 1], [], []>} : vector<16x16xbf16>, vector<16x8xbf16>, vector<16x8xf32> -> vector<16x8xf32>
    %7 = arith.addf %0, %6 : vector<16x8xf32>
    %8 = vector.extract_strided_slice %2 {offsets = [2, 0], sizes = [16, 16], strides = [1, 1]} : vector<20x16xbf16> to vector<16x16xbf16>
    %c0_8 = arith.constant 0 : index
    %c1 = arith.constant 1 : index
    %c0_9 = arith.constant 0 : index
    %c0_10 = arith.constant 0 : index
    %9 = vector.load %arg5[%c0_8, %c1, %c0_9, %c0_10] : memref<3x3x16x8xbf16, #tpu.memory_space<vmem>>, vector<1x1x16x8xbf16>
    %10 = vector.shape_cast %9 : vector<1x1x16x8xbf16> to vector<16x8xbf16>
    %cst_11 = arith.constant dense<0.000000e+00> : vector<16x8xf32>
    %11 = tpu.matmul %8, %10, %cst_11 {dimension_numbers = #tpu.dot_dimension_numbers<[1], [0], [0], [1], [0, 0, 1, 1], [], []>} : vector<16x16xbf16>, vector<16x8xbf16>, vector<16x8xf32> -> vector<16x8xf32>
    %12 = arith.addf %7, %11 : vector<16x8xf32>
    %13 = vector.extract_strided_slice %2 {offsets = [4, 0], sizes = [16, 16], strides = [1, 1]} : vector<20x16xbf16> to vector<16x16xbf16>
    %c0_12 = arith.constant 0 : index
    %c2 = arith.constant 2 : index
    %c0_13 = arith.constant 0 : index
    %c0_14 = arith.constant 0 : index
    %14 = vector.load %arg5[%c0_12, %c2, %c0_13, %c0_14] : memref<3x3x16x8xbf16, #tpu.memory_space<vmem>>, vector<1x1x16x8xbf16>
    %15 = vector.shape_cast %14 : vector<1x1x16x8xbf16> to vector<16x8xbf16>
    %cst_15 = arith.constant dense<0.000000e+00> : vector<16x8xf32>
    %16 = tpu.matmul %13, %15, %cst_15 {dimension_numbers = #tpu.dot_dimension_numbers<[1], [0], [0], [1], [0, 0, 1, 1], [], []>} : vector<16x16xbf16>, vector<16x8xbf16>, vector<16x8xf32> -> vector<16x8xf32>
    %17 = arith.addf %12, %16 : vector<16x8xf32>
    %c0_16 = arith.constant 0 : index
    %c0_17 = arith.constant 0 : index
    %c0_18 = arith.constant 0 : index
    %c0_19 = arith.constant 0 : index
    %18 = vector.load %arg3[%c0_16, %c0_17, %c0_18, %c0_19] : memref<1x1x20x16xbf16, #tpu.memory_space<vmem>>, vector<1x1x20x16xbf16>
    %19 = vector.shape_cast %18 : vector<1x1x20x16xbf16> to vector<20x16xbf16>
    %20 = vector.extract_strided_slice %19 {offsets = [0, 0], sizes = [16, 16], strides = [1, 1]} : vector<20x16xbf16> to vector<16x16xbf16>
    %c1_20 = arith.constant 1 : index
    %c0_21 = arith.constant 0 : index
    %c0_22 = arith.constant 0 : index
    %c0_23 = arith.constant 0 : index
    %21 = vector.load %arg5[%c1_20, %c0_21, %c0_22, %c0_23] : memref<3x3x16x8xbf16, #tpu.memory_space<vmem>>, vector<1x1x16x8xbf16>
    %22 = vector.shape_cast %21 : vector<1x1x16x8xbf16> to vector<16x8xbf16>
    %cst_24 = arith.constant dense<0.000000e+00> : vector<16x8xf32>
    %23 = tpu.matmul %20, %22, %cst_24 {dimension_numbers = #tpu.dot_dimension_numbers<[1], [0], [0], [1], [0, 0, 1, 1], [], []>} : vector<16x16xbf16>, vector<16x8xbf16>, vector<16x8xf32> -> vector<16x8xf32>
    %24 = arith.addf %17, %23 : vector<16x8xf32>
    %25 = vector.extract_strided_slice %19 {offsets = [2, 0], sizes = [16, 16], strides = [1, 1]} : vector<20x16xbf16> to vector<16x16xbf16>
    %c1_25 = arith.constant 1 : index
    %c1_26 = arith.constant 1 : index
    %c0_27 = arith.constant 0 : index
    %c0_28 = arith.constant 0 : index
    %26 = vector.load %arg5[%c1_25, %c1_26, %c0_27, %c0_28] : memref<3x3x16x8xbf16, #tpu.memory_space<vmem>>, vector<1x1x16x8xbf16>
    %27 = vector.shape_cast %26 : vector<1x1x16x8xbf16> to vector<16x8xbf16>
    %cst_29 = arith.constant dense<0.000000e+00> : vector<16x8xf32>
    %28 = tpu.matmul %25, %27, %cst_29 {dimension_numbers = #tpu.dot_dimension_numbers<[1], [0], [0], [1], [0, 0, 1, 1], [], []>} : vector<16x16xbf16>, vector<16x8xbf16>, vector<16x8xf32> -> vector<16x8xf32>
    %29 = arith.addf %24, %28 : vector<16x8xf32>
    %30 = vector.extract_strided_slice %19 {offsets = [4, 0], sizes = [16, 16], strides = [1, 1]} : vector<20x16xbf16> to vector<16x16xbf16>
    %c1_30 = arith.constant 1 : index
    %c2_31 = arith.constant 2 : index
    %c0_32 = arith.constant 0 : index
    %c0_33 = arith.constant 0 : index
    %31 = vector.load %arg5[%c1_30, %c2_31, %c0_32, %c0_33] : memref<3x3x16x8xbf16, #tpu.memory_space<vmem>>, vector<1x1x16x8xbf16>
    %32 = vector.shape_cast %31 : vector<1x1x16x8xbf16> to vector<16x8xbf16>
    %cst_34 = arith.constant dense<0.000000e+00> : vector<16x8xf32>
    %33 = tpu.matmul %30, %32, %cst_34 {dimension_numbers = #tpu.dot_dimension_numbers<[1], [0], [0], [1], [0, 0, 1, 1], [], []>} : vector<16x16xbf16>, vector<16x8xbf16>, vector<16x8xf32> -> vector<16x8xf32>
    %34 = arith.addf %29, %33 : vector<16x8xf32>
    %c0_35 = arith.constant 0 : index
    %c0_36 = arith.constant 0 : index
    %c0_37 = arith.constant 0 : index
    %c0_38 = arith.constant 0 : index
    %35 = vector.load %arg4[%c0_35, %c0_36, %c0_37, %c0_38] : memref<1x1x20x16xbf16, #tpu.memory_space<vmem>>, vector<1x1x20x16xbf16>
    %36 = vector.shape_cast %35 : vector<1x1x20x16xbf16> to vector<20x16xbf16>
    %37 = vector.extract_strided_slice %36 {offsets = [0, 0], sizes = [16, 16], strides = [1, 1]} : vector<20x16xbf16> to vector<16x16xbf16>
    %c2_39 = arith.constant 2 : index
    %c0_40 = arith.constant 0 : index
    %c0_41 = arith.constant 0 : index
    %c0_42 = arith.constant 0 : index
    %38 = vector.load %arg5[%c2_39, %c0_40, %c0_41, %c0_42] : memref<3x3x16x8xbf16, #tpu.memory_space<vmem>>, vector<1x1x16x8xbf16>
    %39 = vector.shape_cast %38 : vector<1x1x16x8xbf16> to vector<16x8xbf16>
    %cst_43 = arith.constant dense<0.000000e+00> : vector<16x8xf32>
    %40 = tpu.matmul %37, %39, %cst_43 {dimension_numbers = #tpu.dot_dimension_numbers<[1], [0], [0], [1], [0, 0, 1, 1], [], []>} : vector<16x16xbf16>, vector<16x8xbf16>, vector<16x8xf32> -> vector<16x8xf32>
    %41 = arith.addf %34, %40 : vector<16x8xf32>
    %42 = vector.extract_strided_slice %36 {offsets = [2, 0], sizes = [16, 16], strides = [1, 1]} : vector<20x16xbf16> to vector<16x16xbf16>
    %c2_44 = arith.constant 2 : index
    %c1_45 = arith.constant 1 : index
    %c0_46 = arith.constant 0 : index
    %c0_47 = arith.constant 0 : index
    %43 = vector.load %arg5[%c2_44, %c1_45, %c0_46, %c0_47] : memref<3x3x16x8xbf16, #tpu.memory_space<vmem>>, vector<1x1x16x8xbf16>
    %44 = vector.shape_cast %43 : vector<1x1x16x8xbf16> to vector<16x8xbf16>
    %cst_48 = arith.constant dense<0.000000e+00> : vector<16x8xf32>
    %45 = tpu.matmul %42, %44, %cst_48 {dimension_numbers = #tpu.dot_dimension_numbers<[1], [0], [0], [1], [0, 0, 1, 1], [], []>} : vector<16x16xbf16>, vector<16x8xbf16>, vector<16x8xf32> -> vector<16x8xf32>
    %46 = arith.addf %41, %45 : vector<16x8xf32>
    %47 = vector.extract_strided_slice %36 {offsets = [4, 0], sizes = [16, 16], strides = [1, 1]} : vector<20x16xbf16> to vector<16x16xbf16>
    %c2_49 = arith.constant 2 : index
    %c2_50 = arith.constant 2 : index
    %c0_51 = arith.constant 0 : index
    %c0_52 = arith.constant 0 : index
    %48 = vector.load %arg5[%c2_49, %c2_50, %c0_51, %c0_52] : memref<3x3x16x8xbf16, #tpu.memory_space<vmem>>, vector<1x1x16x8xbf16>
    %49 = vector.shape_cast %48 : vector<1x1x16x8xbf16> to vector<16x8xbf16>
    %cst_53 = arith.constant dense<0.000000e+00> : vector<16x8xf32>
    %50 = tpu.matmul %47, %49, %cst_53 {dimension_numbers = #tpu.dot_dimension_numbers<[1], [0], [0], [1], [0, 0, 1, 1], [], []>} : vector<16x16xbf16>, vector<16x8xbf16>, vector<16x8xf32> -> vector<16x8xf32>
    %51 = arith.addf %46, %50 : vector<16x8xf32>
    %cst_54 = arith.constant 0.000000e+00 : f32
    %52 = vector.broadcast %cst_54 : f32 to vector<16x8xf32>
    %53 = arith.maximumf %51, %52 : vector<16x8xf32>
    %54 = arith.truncf %53 : vector<16x8xf32> to vector<16x8xbf16>
    %c0_55 = arith.constant 0 : index
    %c0_56 = arith.constant 0 : index
    %c0_57 = arith.constant 0 : index
    %c0_58 = arith.constant 0 : index
    %55 = vector.load %arg6[%c0_55, %c0_56, %c0_57, %c0_58] : memref<1x1x16x8xbf16, #tpu.memory_space<vmem>>, vector<1x1x16x8xbf16>
    %56 = vector.shape_cast %55 : vector<1x1x16x8xbf16> to vector<16x8xbf16>
    %57 = vector.shape_cast %54 : vector<16x8xbf16> to vector<1x1x16x8xbf16>
    tpu.vector_store %arg6[%c0_55, %c0_56, %c0_57, %c0_58], %57 {strides = array<i32>} : memref<1x1x16x8xbf16, #tpu.memory_space<vmem>>, vector<1x1x16x8xbf16>,
    return
  }
  func.func @transform_0(%arg0: i32, %arg1: i32) -> (i32, i32, i32, i32) {
    %c0_i32 = arith.constant 0 : i32
    %0 = arith.addi %arg1, %c0_i32 : i32
    %c0_i32_0 = arith.constant 0 : i32
    %c0_i32_1 = arith.constant 0 : i32
    %c0_i32_2 = arith.constant 0 : i32
    return %arg0, %0, %c0_i32_0, %c0_i32_1 : i32, i32, i32, i32
  }
  func.func @transform_1(%arg0: i32, %arg1: i32) -> (i32, i32, i32, i32) {
    %c2_i32 = arith.constant 2 : i32
    %0 = arith.addi %arg1, %c2_i32 : i32
    %c0_i32 = arith.constant 0 : i32
    %c0_i32_0 = arith.constant 0 : i32
    %c0_i32_1 = arith.constant 0 : i32
    return %arg0, %0, %c0_i32, %c0_i32_0 : i32, i32, i32, i32
  }
  func.func @transform_2(%arg0: i32, %arg1: i32) -> (i32, i32, i32, i32) {
    %c4_i32 = arith.constant 4 : i32
    %0 = arith.addi %arg1, %c4_i32 : i32
    %c0_i32 = arith.constant 0 : i32
    %c0_i32_0 = arith.constant 0 : i32
    %c0_i32_1 = arith.constant 0 : i32
    return %arg0, %0, %c0_i32, %c0_i32_0 : i32, i32, i32, i32
  }
  func.func @transform_3(%arg0: i32, %arg1: i32) -> (i32, i32, i32, i32) {
    %c0_i32 = arith.constant 0 : i32
    %c0_i32_0 = arith.constant 0 : i32
    %c0_i32_1 = arith.constant 0 : i32
    %c0_i32_2 = arith.constant 0 : i32
    %c0_i32_3 = arith.constant 0 : i32
    return %c0_i32, %c0_i32_0, %c0_i32_1, %c0_i32_2 : i32, i32, i32, i32
  }
  func.func @transform_4(%arg0: i32, %arg1: i32) -> (i32, i32, i32, i32) {
    %c0_i32 = arith.constant 0 : i32
    %c0_i32_0 = arith.constant 0 : i32
    %c0_i32_1 = arith.constant 0 : i32
    return %arg0, %arg1, %c0_i32, %c0_i32_0 : i32, i32, i32, i32
  }
}

module attributes {stable_mosaic.version = 11 : i64} {
  func.func @_dilated_conv_kernel(%arg0: i32, %arg1: i32, %arg2: memref<1x1x18x16xbf16, #tpu.memory_space<vmem>>, %arg3: memref<1x1x18x16xbf16, #tpu.memory_space<vmem>>, %arg4: memref<1x1x18x16xbf16, #tpu.memory_space<vmem>>, %arg5: memref<3x3x16x8xbf16, #tpu.memory_space<vmem>>, %arg6: memref<1x1x16x8xbf16, #tpu.memory_space<vmem>>) attributes {dimension_semantics = [#tpu.dimension_semantics<parallel>, #tpu.dimension_semantics<parallel>], iteration_bounds = array<i64: 2, 16>, scalar_prefetch = 0 : i64, scratch_operands = 0 : i64, tpu.core_type = #tpu.core_type<tc>, window_params = [{transform_indices = @transform_0, window_bounds = array<i64: 1, 1, 18, 16>}, {transform_indices = @transform_1, window_bounds = array<i64: 1, 1, 18, 16>}, {transform_indices = @transform_2, window_bounds = array<i64: 1, 1, 18, 16>}, {pipeline_mode = #tpu.pipeline_mode<synchronous>, transform_indices = @transform_3, window_bounds = array<i64: 3, 3, 16, 8>}, {transform_indices = @transform_4, window_bounds = array<i64: 1, 1, 16, 8>}]} {
    %cst = arith.constant 0.000000e+00 : f32
    %0 = vector.broadcast %cst : f32 to vector<16x8xf32>
    %c0 = arith.constant 0 : index
    %c0_0 = arith.constant 0 : index
    %c0_1 = arith.constant 0 : index
    %c0_2 = arith.constant 0 : index
    %1 = vector.load %arg2[%c0, %c0_0, %c0_1, %c0_2] : memref<1x1x18x16xbf16, #tpu.memory_space<vmem>>, vector<1x1x18x16xbf16>
    %2 = vector.shape_cast %1 : vector<1x1x18x16xbf16> to vector<18x16xbf16>
    %3 = vector.extract_strided_slice %2 {offsets = [0, 0], sizes = [16, 16], strides = [1, 1]} : vector<18x16xbf16> to vector<16x16xbf16>
    %c0_3 = arith.constant 0 : index
    %c0_4 = arith.constant 0 : index
    %c0_5 = arith.constant 0 : index
    %c0_6 = arith.constant 0 : index
    %4 = vector.load %arg5[%c0_3, %c0_4, %c0_5, %c0_6] : memref<3x3x16x8xbf16, #tpu.memory_space<vmem>>, vector<1x1x16x8xbf16>
    %5 = vector.shape_cast %4 : vector<1x1x16x8xbf16> to vector<16x8xbf16>
    %cst_7 = arith.constant dense<0.000000e+00> : vector<16x8xf32>
    %6 = tpu.matmul %3, %5, %cst_7 {dimension_numbers = #tpu.dot_dimension_numbers<[1], [0], [0], [1], [0, 0, 1, 1], [], []>} : vector<16x16xbf16>, vector<16x8xbf16>, vector<16x8xf32> -> vector<16x8xf32>
    %7 = arith.addf %0, %6 : vector<16x8xf32>
    %8 = vector.extract_strided_slice %2 {offsets = [1, 0], sizes = [16, 16], strides = [1, 1]} : vector<18x16xbf16> to vector<16x16xbf16>
    %c0_8 = arith.constant 0 : index
    %c1 = arith.constant 1 : index
    %c0_9 = arith.constant 0 : index
    %c0_10 = arith.constant 0 : index
    %9 = vector.load %arg5[%c0_8, %c1, %c0_9, %c0_10] : memref<3x3x16x8xbf16, #tpu.memory_space<vmem>>, vector<1x1x16x8xbf16>
    %10 = vector.shape_cast %9 : vector<1x1x16x8xbf16> to vector<16x8xbf16>
    %cst_11 = arith.constant dense<0.000000e+00> : vector<16x8xf32>
    %11 = tpu.matmul %8, %10, %cst_11 {dimension_numbers = #tpu.dot_dimension_numbers<[1], [0], [0], [1], [0, 0, 1, 1], [], []>} : vector<16x16xbf16>, vector<16x8xbf16>, vector<16x8xf32> -> vector<16x8xf32>
    %12 = arith.addf %7, %11 : vector<16x8xf32>
    %13 = vector.extract_strided_slice %2 {offsets = [2, 0], sizes = [16, 16], strides = [1, 1]} : vector<18x16xbf16> to vector<16x16xbf16>
    %c0_12 = arith.constant 0 : index
    %c2 = arith.constant 2 : index
    %c0_13 = arith.constant 0 : index
    %c0_14 = arith.constant 0 : index
    %14 = vector.load %arg5[%c0_12, %c2, %c0_13, %c0_14] : memref<3x3x16x8xbf16, #tpu.memory_space<vmem>>, vector<1x1x16x8xbf16>
    %15 = vector.shape_cast %14 : vector<1x1x16x8xbf16> to vector<16x8xbf16>
    %cst_15 = arith.constant dense<0.000000e+00> : vector<16x8xf32>
    %16 = tpu.matmul %13, %15, %cst_15 {dimension_numbers = #tpu.dot_dimension_numbers<[1], [0], [0], [1], [0, 0, 1, 1], [], []>} : vector<16x16xbf16>, vector<16x8xbf16>, vector<16x8xf32> -> vector<16x8xf32>
    %17 = arith.addf %12, %16 : vector<16x8xf32>
    %c0_16 = arith.constant 0 : index
    %c0_17 = arith.constant 0 : index
    %c0_18 = arith.constant 0 : index
    %c0_19 = arith.constant 0 : index
    %18 = vector.load %arg3[%c0_16, %c0_17, %c0_18, %c0_19] : memref<1x1x18x16xbf16, #tpu.memory_space<vmem>>, vector<1x1x18x16xbf16>
    %19 = vector.shape_cast %18 : vector<1x1x18x16xbf16> to vector<18x16xbf16>
    %20 = vector.extract_strided_slice %19 {offsets = [0, 0], sizes = [16, 16], strides = [1, 1]} : vector<18x16xbf16> to vector<16x16xbf16>
    %c1_20 = arith.constant 1 : index
    %c0_21 = arith.constant 0 : index
    %c0_22 = arith.constant 0 : index
    %c0_23 = arith.constant 0 : index
    %21 = vector.load %arg5[%c1_20, %c0_21, %c0_22, %c0_23] : memref<3x3x16x8xbf16, #tpu.memory_space<vmem>>, vector<1x1x16x8xbf16>
    %22 = vector.shape_cast %21 : vector<1x1x16x8xbf16> to vector<16x8xbf16>
    %cst_24 = arith.constant dense<0.000000e+00> : vector<16x8xf32>
    %23 = tpu.matmul %20, %22, %cst_24 {dimension_numbers = #tpu.dot_dimension_numbers<[1], [0], [0], [1], [0, 0, 1, 1], [], []>} : vector<16x16xbf16>, vector<16x8xbf16>, vector<16x8xf32> -> vector<16x8xf32>
    %24 = arith.addf %17, %23 : vector<16x8xf32>
    %25 = vector.extract_strided_slice %19 {offsets = [1, 0], sizes = [16, 16], strides = [1, 1]} : vector<18x16xbf16> to vector<16x16xbf16>
    %c1_25 = arith.constant 1 : index
    %c1_26 = arith.constant 1 : index
    %c0_27 = arith.constant 0 : index
    %c0_28 = arith.constant 0 : index
    %26 = vector.load %arg5[%c1_25, %c1_26, %c0_27, %c0_28] : memref<3x3x16x8xbf16, #tpu.memory_space<vmem>>, vector<1x1x16x8xbf16>
    %27 = vector.shape_cast %26 : vector<1x1x16x8xbf16> to vector<16x8xbf16>
    %cst_29 = arith.constant dense<0.000000e+00> : vector<16x8xf32>
    %28 = tpu.matmul %25, %27, %cst_29 {dimension_numbers = #tpu.dot_dimension_numbers<[1], [0], [0], [1], [0, 0, 1, 1], [], []>} : vector<16x16xbf16>, vector<16x8xbf16>, vector<16x8xf32> -> vector<16x8xf32>
    %29 = arith.addf %24, %28 : vector<16x8xf32>
    %30 = vector.extract_strided_slice %19 {offsets = [2, 0], sizes = [16, 16], strides = [1, 1]} : vector<18x16xbf16> to vector<16x16xbf16>
    %c1_30 = arith.constant 1 : index
    %c2_31 = arith.constant 2 : index
    %c0_32 = arith.constant 0 : index
    %c0_33 = arith.constant 0 : index
    %31 = vector.load %arg5[%c1_30, %c2_31, %c0_32, %c0_33] : memref<3x3x16x8xbf16, #tpu.memory_space<vmem>>, vector<1x1x16x8xbf16>
    %32 = vector.shape_cast %31 : vector<1x1x16x8xbf16> to vector<16x8xbf16>
    %cst_34 = arith.constant dense<0.000000e+00> : vector<16x8xf32>
    %33 = tpu.matmul %30, %32, %cst_34 {dimension_numbers = #tpu.dot_dimension_numbers<[1], [0], [0], [1], [0, 0, 1, 1], [], []>} : vector<16x16xbf16>, vector<16x8xbf16>, vector<16x8xf32> -> vector<16x8xf32>
    %34 = arith.addf %29, %33 : vector<16x8xf32>
    %c0_35 = arith.constant 0 : index
    %c0_36 = arith.constant 0 : index
    %c0_37 = arith.constant 0 : index
    %c0_38 = arith.constant 0 : index
    %35 = vector.load %arg4[%c0_35, %c0_36, %c0_37, %c0_38] : memref<1x1x18x16xbf16, #tpu.memory_space<vmem>>, vector<1x1x18x16xbf16>
    %36 = vector.shape_cast %35 : vector<1x1x18x16xbf16> to vector<18x16xbf16>
    %37 = vector.extract_strided_slice %36 {offsets = [0, 0], sizes = [16, 16], strides = [1, 1]} : vector<18x16xbf16> to vector<16x16xbf16>
    %c2_39 = arith.constant 2 : index
    %c0_40 = arith.constant 0 : index
    %c0_41 = arith.constant 0 : index
    %c0_42 = arith.constant 0 : index
    %38 = vector.load %arg5[%c2_39, %c0_40, %c0_41, %c0_42] : memref<3x3x16x8xbf16, #tpu.memory_space<vmem>>, vector<1x1x16x8xbf16>
    %39 = vector.shape_cast %38 : vector<1x1x16x8xbf16> to vector<16x8xbf16>
    %cst_43 = arith.constant dense<0.000000e+00> : vector<16x8xf32>
    %40 = tpu.matmul %37, %39, %cst_43 {dimension_numbers = #tpu.dot_dimension_numbers<[1], [0], [0], [1], [0, 0, 1, 1], [], []>} : vector<16x16xbf16>, vector<16x8xbf16>, vector<16x8xf32> -> vector<16x8xf32>
    %41 = arith.addf %34, %40 : vector<16x8xf32>
    %42 = vector.extract_strided_slice %36 {offsets = [1, 0], sizes = [16, 16], strides = [1, 1]} : vector<18x16xbf16> to vector<16x16xbf16>
    %c2_44 = arith.constant 2 : index
    %c1_45 = arith.constant 1 : index
    %c0_46 = arith.constant 0 : index
    %c0_47 = arith.constant 0 : index
    %43 = vector.load %arg5[%c2_44, %c1_45, %c0_46, %c0_47] : memref<3x3x16x8xbf16, #tpu.memory_space<vmem>>, vector<1x1x16x8xbf16>
    %44 = vector.shape_cast %43 : vector<1x1x16x8xbf16> to vector<16x8xbf16>
    %cst_48 = arith.constant dense<0.000000e+00> : vector<16x8xf32>
    %45 = tpu.matmul %42, %44, %cst_48 {dimension_numbers = #tpu.dot_dimension_numbers<[1], [0], [0], [1], [0, 0, 1, 1], [], []>} : vector<16x16xbf16>, vector<16x8xbf16>, vector<16x8xf32> -> vector<16x8xf32>
    %46 = arith.addf %41, %45 : vector<16x8xf32>
    %47 = vector.extract_strided_slice %36 {offsets = [2, 0], sizes = [16, 16], strides = [1, 1]} : vector<18x16xbf16> to vector<16x16xbf16>
    %c2_49 = arith.constant 2 : index
    %c2_50 = arith.constant 2 : index
    %c0_51 = arith.constant 0 : index
    %c0_52 = arith.constant 0 : index
    %48 = vector.load %arg5[%c2_49, %c2_50, %c0_51, %c0_52] : memref<3x3x16x8xbf16, #tpu.memory_space<vmem>>, vector<1x1x16x8xbf16>
    %49 = vector.shape_cast %48 : vector<1x1x16x8xbf16> to vector<16x8xbf16>
    %cst_53 = arith.constant dense<0.000000e+00> : vector<16x8xf32>
    %50 = tpu.matmul %47, %49, %cst_53 {dimension_numbers = #tpu.dot_dimension_numbers<[1], [0], [0], [1], [0, 0, 1, 1], [], []>} : vector<16x16xbf16>, vector<16x8xbf16>, vector<16x8xf32> -> vector<16x8xf32>
    %51 = arith.addf %46, %50 : vector<16x8xf32>
    %cst_54 = arith.constant 0.000000e+00 : f32
    %52 = vector.broadcast %cst_54 : f32 to vector<16x8xf32>
    %53 = arith.maximumf %51, %52 : vector<16x8xf32>
    %54 = arith.truncf %53 : vector<16x8xf32> to vector<16x8xbf16>
    %c0_55 = arith.constant 0 : index
    %c0_56 = arith.constant 0 : index
    %c0_57 = arith.constant 0 : index
    %c0_58 = arith.constant 0 : index
    %55 = vector.load %arg6[%c0_55, %c0_56, %c0_57, %c0_58] : memref<1x1x16x8xbf16, #tpu.memory_space<vmem>>, vector<1x1x16x8xbf16>
    %56 = vector.shape_cast %55 : vector<1x1x16x8xbf16> to vector<16x8xbf16>
    %57 = vector.shape_cast %54 : vector<16x8xbf16> to vector<1x1x16x8xbf16>
    tpu.vector_store %arg6[%c0_55, %c0_56, %c0_57, %c0_58], %57 {strides = array<i32>} : memref<1x1x16x8xbf16, #tpu.memory_space<vmem>>, vector<1x1x16x8xbf16>,
    return
  }
  func.func @transform_0(%arg0: i32, %arg1: i32) -> (i32, i32, i32, i32) {
    %c0_i32 = arith.constant 0 : i32
    %0 = arith.addi %arg1, %c0_i32 : i32
    %c0_i32_0 = arith.constant 0 : i32
    %c0_i32_1 = arith.constant 0 : i32
    %c0_i32_2 = arith.constant 0 : i32
    return %arg0, %0, %c0_i32_0, %c0_i32_1 : i32, i32, i32, i32
  }
  func.func @transform_1(%arg0: i32, %arg1: i32) -> (i32, i32, i32, i32) {
    %c1_i32 = arith.constant 1 : i32
    %0 = arith.addi %arg1, %c1_i32 : i32
    %c0_i32 = arith.constant 0 : i32
    %c0_i32_0 = arith.constant 0 : i32
    %c0_i32_1 = arith.constant 0 : i32
    return %arg0, %0, %c0_i32, %c0_i32_0 : i32, i32, i32, i32
  }
  func.func @transform_2(%arg0: i32, %arg1: i32) -> (i32, i32, i32, i32) {
    %c2_i32 = arith.constant 2 : i32
    %0 = arith.addi %arg1, %c2_i32 : i32
    %c0_i32 = arith.constant 0 : i32
    %c0_i32_0 = arith.constant 0 : i32
    %c0_i32_1 = arith.constant 0 : i32
    return %arg0, %0, %c0_i32, %c0_i32_0 : i32, i32, i32, i32
  }
  func.func @transform_3(%arg0: i32, %arg1: i32) -> (i32, i32, i32, i32) {
    %c0_i32 = arith.constant 0 : i32
    %c0_i32_0 = arith.constant 0 : i32
    %c0_i32_1 = arith.constant 0 : i32
    %c0_i32_2 = arith.constant 0 : i32
    %c0_i32_3 = arith.constant 0 : i32
    return %c0_i32, %c0_i32_0, %c0_i32_1, %c0_i32_2 : i32, i32, i32, i32
  }
  func.func @transform_4(%arg0: i32, %arg1: i32) -> (i32, i32, i32, i32) {
    %c0_i32 = arith.constant 0 : i32
    %c0_i32_0 = arith.constant 0 : i32
    %c0_i32_1 = arith.constant 0 : i32
    return %arg0, %arg1, %c0_i32, %c0_i32_0 : i32, i32, i32, i32
  }
}

module attributes {stable_mosaic.version = 11 : i64} {
  func.func @_global_maxpool_kernel(%arg0: i32, %arg1: i32, %arg2: memref<1x256x16xbf16, #tpu.memory_space<vmem>>, %arg3: memref<1x1x16xf32, #tpu.memory_space<vmem>>) attributes {dimension_semantics = [#tpu.dimension_semantics<parallel>, #tpu.dimension_semantics<arbitrary>], iteration_bounds = array<i64: 2, 1>, scalar_prefetch = 0 : i64, scratch_operands = 0 : i64, tpu.core_type = #tpu.core_type<tc>, window_params = [{transform_indices = @transform_0, window_bounds = array<i64: 1, 256, 16>}, {transform_indices = @transform_1, window_bounds = array<i64: 1, 1, 16>}]} {
    %c0_i32 = arith.constant 0 : i32
    %0 = arith.cmpi eq, %arg1, %c0_i32 : i32
    %1 = arith.extui %0 : i1 to i32
    %c0_i32_0 = arith.constant 0 : i32
    %2 = arith.cmpi ne, %1, %c0_i32_0 : i32
    scf.if %2 {
      %cst_9 = arith.constant 0xFF800000 : f32
      %12 = vector.broadcast %cst_9 : f32 to vector<1x1x16xf32>
      %c0_10 = arith.constant 0 : index
      %c0_11 = arith.constant 0 : index
      %c0_12 = arith.constant 0 : index
      %13 = vector.load %arg3[%c0_10, %c0_11, %c0_12] : memref<1x1x16xf32, #tpu.memory_space<vmem>>, vector<1x1x16xf32>
      tpu.vector_store %arg3[%c0_10, %c0_11, %c0_12], %12 {strides = array<i32>} : memref<1x1x16xf32, #tpu.memory_space<vmem>>, vector<1x1x16xf32>,
    } else {
    }
    %c0 = arith.constant 0 : index
    %c0_1 = arith.constant 0 : index
    %c0_2 = arith.constant 0 : index
    %3 = vector.load %arg2[%c0, %c0_1, %c0_2] : memref<1x256x16xbf16, #tpu.memory_space<vmem>>, vector<1x256x16xbf16>
    %4 = vector.shape_cast %3 : vector<1x256x16xbf16> to vector<256x16xbf16>
    %5 = arith.extf %4 : vector<256x16xbf16> to vector<256x16xf32>
    %cst = arith.constant dense<0xFF800000> : vector<16xf32>
    %6 = vector.multi_reduction <maximumf>, %5, %cst [0] : vector<256x16xf32> to vector<16xf32>
    %7 = vector.shape_cast %6 : vector<16xf32> to vector<1x16xf32>
    %c0_3 = arith.constant 0 : index
    %c0_4 = arith.constant 0 : index
    %c0_5 = arith.constant 0 : index
    %8 = vector.load %arg3[%c0_3, %c0_4, %c0_5] : memref<1x1x16xf32, #tpu.memory_space<vmem>>, vector<1x1x16xf32>
    %9 = vector.shape_cast %7 : vector<1x16xf32> to vector<1x1x16xf32>
    %10 = arith.maximumf %8, %9 : vector<1x1x16xf32>
    %c0_6 = arith.constant 0 : index
    %c0_7 = arith.constant 0 : index
    %c0_8 = arith.constant 0 : index
    %11 = vector.load %arg3[%c0_6, %c0_7, %c0_8] : memref<1x1x16xf32, #tpu.memory_space<vmem>>, vector<1x1x16xf32>
    tpu.vector_store %arg3[%c0_6, %c0_7, %c0_8], %10 {strides = array<i32>} : memref<1x1x16xf32, #tpu.memory_space<vmem>>, vector<1x1x16xf32>,
    return
  }
  func.func @transform_0(%arg0: i32, %arg1: i32) -> (i32, i32, i32) {
    %c0_i32 = arith.constant 0 : i32
    %c0_i32_0 = arith.constant 0 : i32
    return %arg0, %arg1, %c0_i32 : i32, i32, i32
  }
  func.func @transform_1(%arg0: i32, %arg1: i32) -> (i32, i32, i32) {
    %c0_i32 = arith.constant 0 : i32
    %c0_i32_0 = arith.constant 0 : i32
    %c0_i32_1 = arith.constant 0 : i32
    return %arg0, %c0_i32, %c0_i32_0 : i32, i32, i32
  }
}

module attributes {stable_mosaic.version = 11 : i64} {
  func.func @_matmul_relu_kernel(%arg0: i32, %arg1: i32, %arg2: i32, %arg3: memref<512x128xbf16, #tpu.memory_space<vmem>>, %arg4: memref<128x128xbf16, #tpu.memory_space<vmem>>, %arg5: memref<512x128xbf16, #tpu.memory_space<vmem>>, %arg6: memref<512x128xf32, #tpu.memory_space<vmem>>) attributes {dimension_semantics = [#tpu.dimension_semantics<parallel>, #tpu.dimension_semantics<parallel>, #tpu.dimension_semantics<arbitrary>], iteration_bounds = array<i64: 1, 1, 1>, scalar_prefetch = 0 : i64, scratch_operands = 1 : i64, tpu.core_type = #tpu.core_type<tc>, window_params = [{transform_indices = @transform_0, window_bounds = array<i64: 512, 128>}, {transform_indices = @transform_1, window_bounds = array<i64: 128, 128>}, {transform_indices = @transform_2, window_bounds = array<i64: 512, 128>}]} {
    %c0_i32 = arith.constant 0 : i32
    %0 = arith.cmpi eq, %arg2, %c0_i32 : i32
    %1 = arith.extui %0 : i1 to i32
    %c0_i32_0 = arith.constant 0 : i32
    %2 = arith.cmpi ne, %1, %c0_i32_0 : i32
    scf.if %2 {
      %cst_10 = arith.constant 0.000000e+00 : f32
      %12 = vector.broadcast %cst_10 : f32 to vector<512x128xf32>
      %c0_11 = arith.constant 0 : index
      %c0_12 = arith.constant 0 : index
      %13 = vector.load %arg6[%c0_11, %c0_12] : memref<512x128xf32, #tpu.memory_space<vmem>>, vector<512x128xf32>
      tpu.vector_store %arg6[%c0_11, %c0_12], %12 {strides = array<i32>} : memref<512x128xf32, #tpu.memory_space<vmem>>, vector<512x128xf32>,
    } else {
    }
    %c0 = arith.constant 0 : index
    %c0_1 = arith.constant 0 : index
    %3 = vector.load %arg6[%c0, %c0_1] : memref<512x128xf32, #tpu.memory_space<vmem>>, vector<512x128xf32>
    %c0_2 = arith.constant 0 : index
    %c0_3 = arith.constant 0 : index
    %4 = vector.load %arg3[%c0_2, %c0_3] : memref<512x128xbf16, #tpu.memory_space<vmem>>, vector<512x128xbf16>
    %c0_4 = arith.constant 0 : index
    %c0_5 = arith.constant 0 : index
    %5 = vector.load %arg4[%c0_4, %c0_5] : memref<128x128xbf16, #tpu.memory_space<vmem>>, vector<128x128xbf16>
    %cst = arith.constant dense<0.000000e+00> : vector<512x128xf32>
    %6 = tpu.matmul %4, %5, %cst {dimension_numbers = #tpu.dot_dimension_numbers<[1], [0], [0], [1], [0, 0, 1, 1], [], []>} : vector<512x128xbf16>, vector<128x128xbf16>, vector<512x128xf32> -> vector<512x128xf32>
    %7 = arith.addf %3, %6 : vector<512x128xf32>
    %c0_6 = arith.constant 0 : index
    %c0_7 = arith.constant 0 : index
    %8 = vector.load %arg6[%c0_6, %c0_7] : memref<512x128xf32, #tpu.memory_space<vmem>>, vector<512x128xf32>
    tpu.vector_store %arg6[%c0_6, %c0_7], %7 {strides = array<i32>} : memref<512x128xf32, #tpu.memory_space<vmem>>, vector<512x128xf32>,
    %c0_i32_8 = arith.constant 0 : i32
    %9 = arith.cmpi eq, %arg2, %c0_i32_8 : i32
    %10 = arith.extui %9 : i1 to i32
    %c0_i32_9 = arith.constant 0 : i32
    %11 = arith.cmpi ne, %10, %c0_i32_9 : i32
    scf.if %11 {
      %c0_10 = arith.constant 0 : index
      %c0_11 = arith.constant 0 : index
      %12 = vector.load %arg6[%c0_10, %c0_11] : memref<512x128xf32, #tpu.memory_space<vmem>>, vector<512x128xf32>
      %cst_12 = arith.constant 0.000000e+00 : f32
      %13 = vector.broadcast %cst_12 : f32 to vector<512x128xf32>
      %14 = arith.maximumf %12, %13 : vector<512x128xf32>
      %15 = arith.truncf %14 : vector<512x128xf32> to vector<512x128xbf16>
      %c0_13 = arith.constant 0 : index
      %c0_14 = arith.constant 0 : index
      %16 = vector.load %arg5[%c0_13, %c0_14] : memref<512x128xbf16, #tpu.memory_space<vmem>>, vector<512x128xbf16>
      tpu.vector_store %arg5[%c0_13, %c0_14], %15 {strides = array<i32>} : memref<512x128xbf16, #tpu.memory_space<vmem>>, vector<512x128xbf16>,
    } else {
    }
    return
  }
  func.func @transform_0(%arg0: i32, %arg1: i32, %arg2: i32) -> (i32, i32) {
    %c0_i32 = arith.constant 0 : i32
    return %arg0, %arg2 : i32, i32
  }
  func.func @transform_1(%arg0: i32, %arg1: i32, %arg2: i32) -> (i32, i32) {
    %c0_i32 = arith.constant 0 : i32
    return %arg2, %arg1 : i32, i32
  }
  func.func @transform_2(%arg0: i32, %arg1: i32, %arg2: i32) -> (i32, i32) {
    %c0_i32 = arith.constant 0 : i32
    return %arg0, %arg1 : i32, i32
  }
}

module attributes {stable_mosaic.version = 11 : i64} {
  func.func @_matmul_relu_kernel(%arg0: i32, %arg1: i32, %arg2: i32, %arg3: memref<8x128xbf16, #tpu.memory_space<vmem>>, %arg4: memref<128x128xbf16, #tpu.memory_space<vmem>>, %arg5: memref<8x128xbf16, #tpu.memory_space<vmem>>, %arg6: memref<8x128xf32, #tpu.memory_space<vmem>>) attributes {dimension_semantics = [#tpu.dimension_semantics<parallel>, #tpu.dimension_semantics<parallel>, #tpu.dimension_semantics<arbitrary>], iteration_bounds = array<i64: 1, 1, 1>, scalar_prefetch = 0 : i64, scratch_operands = 1 : i64, tpu.core_type = #tpu.core_type<tc>, window_params = [{transform_indices = @transform_0, window_bounds = array<i64: 8, 128>}, {transform_indices = @transform_1, window_bounds = array<i64: 128, 128>}, {transform_indices = @transform_2, window_bounds = array<i64: 8, 128>}]} {
    %c0_i32 = arith.constant 0 : i32
    %0 = arith.cmpi eq, %arg2, %c0_i32 : i32
    %1 = arith.extui %0 : i1 to i32
    %c0_i32_0 = arith.constant 0 : i32
    %2 = arith.cmpi ne, %1, %c0_i32_0 : i32
    scf.if %2 {
      %cst_10 = arith.constant 0.000000e+00 : f32
      %12 = vector.broadcast %cst_10 : f32 to vector<8x128xf32>
      %c0_11 = arith.constant 0 : index
      %c0_12 = arith.constant 0 : index
      %13 = vector.load %arg6[%c0_11, %c0_12] : memref<8x128xf32, #tpu.memory_space<vmem>>, vector<8x128xf32>
      tpu.vector_store %arg6[%c0_11, %c0_12], %12 {strides = array<i32>} : memref<8x128xf32, #tpu.memory_space<vmem>>, vector<8x128xf32>,
    } else {
    }
    %c0 = arith.constant 0 : index
    %c0_1 = arith.constant 0 : index
    %3 = vector.load %arg6[%c0, %c0_1] : memref<8x128xf32, #tpu.memory_space<vmem>>, vector<8x128xf32>
    %c0_2 = arith.constant 0 : index
    %c0_3 = arith.constant 0 : index
    %4 = vector.load %arg3[%c0_2, %c0_3] : memref<8x128xbf16, #tpu.memory_space<vmem>>, vector<8x128xbf16>
    %c0_4 = arith.constant 0 : index
    %c0_5 = arith.constant 0 : index
    %5 = vector.load %arg4[%c0_4, %c0_5] : memref<128x128xbf16, #tpu.memory_space<vmem>>, vector<128x128xbf16>
    %cst = arith.constant dense<0.000000e+00> : vector<8x128xf32>
    %6 = tpu.matmul %4, %5, %cst {dimension_numbers = #tpu.dot_dimension_numbers<[1], [0], [0], [1], [0, 0, 1, 1], [], []>} : vector<8x128xbf16>, vector<128x128xbf16>, vector<8x128xf32> -> vector<8x128xf32>
    %7 = arith.addf %3, %6 : vector<8x128xf32>
    %c0_6 = arith.constant 0 : index
    %c0_7 = arith.constant 0 : index
    %8 = vector.load %arg6[%c0_6, %c0_7] : memref<8x128xf32, #tpu.memory_space<vmem>>, vector<8x128xf32>
    tpu.vector_store %arg6[%c0_6, %c0_7], %7 {strides = array<i32>} : memref<8x128xf32, #tpu.memory_space<vmem>>, vector<8x128xf32>,
    %c0_i32_8 = arith.constant 0 : i32
    %9 = arith.cmpi eq, %arg2, %c0_i32_8 : i32
    %10 = arith.extui %9 : i1 to i32
    %c0_i32_9 = arith.constant 0 : i32
    %11 = arith.cmpi ne, %10, %c0_i32_9 : i32
    scf.if %11 {
      %c0_10 = arith.constant 0 : index
      %c0_11 = arith.constant 0 : index
      %12 = vector.load %arg6[%c0_10, %c0_11] : memref<8x128xf32, #tpu.memory_space<vmem>>, vector<8x128xf32>
      %cst_12 = arith.constant 0.000000e+00 : f32
      %13 = vector.broadcast %cst_12 : f32 to vector<8x128xf32>
      %14 = arith.maximumf %12, %13 : vector<8x128xf32>
      %15 = arith.truncf %14 : vector<8x128xf32> to vector<8x128xbf16>
      %c0_13 = arith.constant 0 : index
      %c0_14 = arith.constant 0 : index
      %16 = vector.load %arg5[%c0_13, %c0_14] : memref<8x128xbf16, #tpu.memory_space<vmem>>, vector<8x128xbf16>
      tpu.vector_store %arg5[%c0_13, %c0_14], %15 {strides = array<i32>} : memref<8x128xbf16, #tpu.memory_space<vmem>>, vector<8x128xbf16>,
    } else {
    }
    return
  }
  func.func @transform_0(%arg0: i32, %arg1: i32, %arg2: i32) -> (i32, i32) {
    %c0_i32 = arith.constant 0 : i32
    return %arg0, %arg2 : i32, i32
  }
  func.func @transform_1(%arg0: i32, %arg1: i32, %arg2: i32) -> (i32, i32) {
    %c0_i32 = arith.constant 0 : i32
    return %arg2, %arg1 : i32, i32
  }
  func.func @transform_2(%arg0: i32, %arg1: i32, %arg2: i32) -> (i32, i32) {
    %c0_i32 = arith.constant 0 : i32
    return %arg0, %arg1 : i32, i32
  }
}

module attributes {stable_mosaic.version = 11 : i64} {
  func.func @_concat_out_conv_kernel(%arg0: i32, %arg1: i32, %arg2: memref<1x1x8xbf16, #tpu.memory_space<vmem>>, %arg3: memref<6x8x8xbf16, #tpu.memory_space<vmem>>, %arg4: memref<1x256x8xbf16, #tpu.memory_space<vmem>>, %arg5: memref<1x256x8xbf16, #tpu.memory_space<vmem>>, %arg6: memref<1x256x8xbf16, #tpu.memory_space<vmem>>, %arg7: memref<1x256x8xbf16, #tpu.memory_space<vmem>>, %arg8: memref<1x256x8xbf16, #tpu.memory_space<vmem>>, %arg9: memref<1x256x8xf32, #tpu.memory_space<vmem>>) attributes {dimension_semantics = [#tpu.dimension_semantics<parallel>, #tpu.dimension_semantics<parallel>], iteration_bounds = array<i64: 2, 1>, scalar_prefetch = 0 : i64, scratch_operands = 0 : i64, tpu.core_type = #tpu.core_type<tc>, window_params = [{transform_indices = @transform_0, window_bounds = array<i64: 1, 1, 8>}, {pipeline_mode = #tpu.pipeline_mode<synchronous>, transform_indices = @transform_1, window_bounds = array<i64: 6, 8, 8>}, {transform_indices = @transform_2, window_bounds = array<i64: 1, 256, 8>}, {transform_indices = @transform_3, window_bounds = array<i64: 1, 256, 8>}, {transform_indices = @transform_4, window_bounds = array<i64: 1, 256, 8>}, {transform_indices = @transform_5, window_bounds = array<i64: 1, 256, 8>}, {transform_indices = @transform_6, window_bounds = array<i64: 1, 256, 8>}, {transform_indices = @transform_7, window_bounds = array<i64: 1, 256, 8>}]} {
    %c0 = arith.constant 0 : index
    %c0_0 = arith.constant 0 : index
    %c0_1 = arith.constant 0 : index
    %0 = vector.load %arg2[%c0, %c0_0, %c0_1] : memref<1x1x8xbf16, #tpu.memory_space<vmem>>, vector<1x1x8xbf16>
    %1 = vector.shape_cast %0 : vector<1x1x8xbf16> to vector<1x8xbf16>
    %c0_2 = arith.constant 0 : index
    %c0_3 = arith.constant 0 : index
    %c0_4 = arith.constant 0 : index
    %2 = vector.load %arg3[%c0_2, %c0_3, %c0_4] : memref<6x8x8xbf16, #tpu.memory_space<vmem>>, vector<1x8x8xbf16>
    %3 = vector.shape_cast %2 : vector<1x8x8xbf16> to vector<8x8xbf16>
    %cst = arith.constant dense<0.000000e+00> : vector<1x8xf32>
    %4 = tpu.matmul %1, %3, %cst {dimension_numbers = #tpu.dot_dimension_numbers<[1], [0], [0], [1], [0, 0, 1, 1], [], []>} : vector<1x8xbf16>, vector<8x8xbf16>, vector<1x8xf32> -> vector<1x8xf32>
    %5 = vector.shape_cast %4 : vector<1x8xf32> to vector<1x8xf32>
    %6 = vector.broadcast %5 : vector<1x8xf32> to vector<256x8xf32>
    %c0_5 = arith.constant 0 : index
    %c0_6 = arith.constant 0 : index
    %c0_7 = arith.constant 0 : index
    %7 = vector.load %arg4[%c0_5, %c0_6, %c0_7] : memref<1x256x8xbf16, #tpu.memory_space<vmem>>, vector<1x256x8xbf16>
    %8 = vector.shape_cast %7 : vector<1x256x8xbf16> to vector<256x8xbf16>
    %c1 = arith.constant 1 : index
    %c0_8 = arith.constant 0 : index
    %c0_9 = arith.constant 0 : index
    %9 = vector.load %arg3[%c1, %c0_8, %c0_9] : memref<6x8x8xbf16, #tpu.memory_space<vmem>>, vector<1x8x8xbf16>
    %10 = vector.shape_cast %9 : vector<1x8x8xbf16> to vector<8x8xbf16>
    %cst_10 = arith.constant dense<0.000000e+00> : vector<256x8xf32>
    %11 = tpu.matmul %8, %10, %cst_10 {dimension_numbers = #tpu.dot_dimension_numbers<[1], [0], [0], [1], [0, 0, 1, 1], [], []>} : vector<256x8xbf16>, vector<8x8xbf16>, vector<256x8xf32> -> vector<256x8xf32>
    %12 = arith.addf %6, %11 : vector<256x8xf32>
    %c0_11 = arith.constant 0 : index
    %c0_12 = arith.constant 0 : index
    %c0_13 = arith.constant 0 : index
    %13 = vector.load %arg5[%c0_11, %c0_12, %c0_13] : memref<1x256x8xbf16, #tpu.memory_space<vmem>>, vector<1x256x8xbf16>
    %14 = vector.shape_cast %13 : vector<1x256x8xbf16> to vector<256x8xbf16>
    %c2 = arith.constant 2 : index
    %c0_14 = arith.constant 0 : index
    %c0_15 = arith.constant 0 : index
    %15 = vector.load %arg3[%c2, %c0_14, %c0_15] : memref<6x8x8xbf16, #tpu.memory_space<vmem>>, vector<1x8x8xbf16>
    %16 = vector.shape_cast %15 : vector<1x8x8xbf16> to vector<8x8xbf16>
    %cst_16 = arith.constant dense<0.000000e+00> : vector<256x8xf32>
    %17 = tpu.matmul %14, %16, %cst_16 {dimension_numbers = #tpu.dot_dimension_numbers<[1], [0], [0], [1], [0, 0, 1, 1], [], []>} : vector<256x8xbf16>, vector<8x8xbf16>, vector<256x8xf32> -> vector<256x8xf32>
    %18 = arith.addf %12, %17 : vector<256x8xf32>
    %c0_17 = arith.constant 0 : index
    %c0_18 = arith.constant 0 : index
    %c0_19 = arith.constant 0 : index
    %19 = vector.load %arg6[%c0_17, %c0_18, %c0_19] : memref<1x256x8xbf16, #tpu.memory_space<vmem>>, vector<1x256x8xbf16>
    %20 = vector.shape_cast %19 : vector<1x256x8xbf16> to vector<256x8xbf16>
    %c3 = arith.constant 3 : index
    %c0_20 = arith.constant 0 : index
    %c0_21 = arith.constant 0 : index
    %21 = vector.load %arg3[%c3, %c0_20, %c0_21] : memref<6x8x8xbf16, #tpu.memory_space<vmem>>, vector<1x8x8xbf16>
    %22 = vector.shape_cast %21 : vector<1x8x8xbf16> to vector<8x8xbf16>
    %cst_22 = arith.constant dense<0.000000e+00> : vector<256x8xf32>
    %23 = tpu.matmul %20, %22, %cst_22 {dimension_numbers = #tpu.dot_dimension_numbers<[1], [0], [0], [1], [0, 0, 1, 1], [], []>} : vector<256x8xbf16>, vector<8x8xbf16>, vector<256x8xf32> -> vector<256x8xf32>
    %24 = arith.addf %18, %23 : vector<256x8xf32>
    %c0_23 = arith.constant 0 : index
    %c0_24 = arith.constant 0 : index
    %c0_25 = arith.constant 0 : index
    %25 = vector.load %arg7[%c0_23, %c0_24, %c0_25] : memref<1x256x8xbf16, #tpu.memory_space<vmem>>, vector<1x256x8xbf16>
    %26 = vector.shape_cast %25 : vector<1x256x8xbf16> to vector<256x8xbf16>
    %c4 = arith.constant 4 : index
    %c0_26 = arith.constant 0 : index
    %c0_27 = arith.constant 0 : index
    %27 = vector.load %arg3[%c4, %c0_26, %c0_27] : memref<6x8x8xbf16, #tpu.memory_space<vmem>>, vector<1x8x8xbf16>
    %28 = vector.shape_cast %27 : vector<1x8x8xbf16> to vector<8x8xbf16>
    %cst_28 = arith.constant dense<0.000000e+00> : vector<256x8xf32>
    %29 = tpu.matmul %26, %28, %cst_28 {dimension_numbers = #tpu.dot_dimension_numbers<[1], [0], [0], [1], [0, 0, 1, 1], [], []>} : vector<256x8xbf16>, vector<8x8xbf16>, vector<256x8xf32> -> vector<256x8xf32>
    %30 = arith.addf %24, %29 : vector<256x8xf32>
    %c0_29 = arith.constant 0 : index
    %c0_30 = arith.constant 0 : index
    %c0_31 = arith.constant 0 : index
    %31 = vector.load %arg8[%c0_29, %c0_30, %c0_31] : memref<1x256x8xbf16, #tpu.memory_space<vmem>>, vector<1x256x8xbf16>
    %32 = vector.shape_cast %31 : vector<1x256x8xbf16> to vector<256x8xbf16>
    %c5 = arith.constant 5 : index
    %c0_32 = arith.constant 0 : index
    %c0_33 = arith.constant 0 : index
    %33 = vector.load %arg3[%c5, %c0_32, %c0_33] : memref<6x8x8xbf16, #tpu.memory_space<vmem>>, vector<1x8x8xbf16>
    %34 = vector.shape_cast %33 : vector<1x8x8xbf16> to vector<8x8xbf16>
    %cst_34 = arith.constant dense<0.000000e+00> : vector<256x8xf32>
    %35 = tpu.matmul %32, %34, %cst_34 {dimension_numbers = #tpu.dot_dimension_numbers<[1], [0], [0], [1], [0, 0, 1, 1], [], []>} : vector<256x8xbf16>, vector<8x8xbf16>, vector<256x8xf32> -> vector<256x8xf32>
    %36 = arith.addf %30, %35 : vector<256x8xf32>
    %cst_35 = arith.constant 0.000000e+00 : f32
    %37 = vector.broadcast %cst_35 : f32 to vector<256x8xf32>
    %38 = arith.maximumf %36, %37 : vector<256x8xf32>
    %c0_36 = arith.constant 0 : index
    %c0_37 = arith.constant 0 : index
    %c0_38 = arith.constant 0 : index
    %39 = vector.load %arg9[%c0_36, %c0_37, %c0_38] : memref<1x256x8xf32, #tpu.memory_space<vmem>>, vector<1x256x8xf32>
    %40 = vector.shape_cast %39 : vector<1x256x8xf32> to vector<256x8xf32>
    %41 = vector.shape_cast %38 : vector<256x8xf32> to vector<1x256x8xf32>
    tpu.vector_store %arg9[%c0_36, %c0_37, %c0_38], %41 {strides = array<i32>} : memref<1x256x8xf32, #tpu.memory_space<vmem>>, vector<1x256x8xf32>,
    return
  }
  func.func @transform_0(%arg0: i32, %arg1: i32) -> (i32, i32, i32) {
    %c0_i32 = arith.constant 0 : i32
    %c0_i32_0 = arith.constant 0 : i32
    %c0_i32_1 = arith.constant 0 : i32
    return %arg0, %c0_i32, %c0_i32_0 : i32, i32, i32
  }
  func.func @transform_1(%arg0: i32, %arg1: i32) -> (i32, i32, i32) {
    %c0_i32 = arith.constant 0 : i32
    %c0_i32_0 = arith.constant 0 : i32
    %c0_i32_1 = arith.constant 0 : i32
    %c0_i32_2 = arith.constant 0 : i32
    return %c0_i32, %c0_i32_0, %c0_i32_1 : i32, i32, i32
  }
  func.func @transform_2(%arg0: i32, %arg1: i32) -> (i32, i32, i32) {
    %c0_i32 = arith.constant 0 : i32
    %c0_i32_0 = arith.constant 0 : i32
    return %arg0, %arg1, %c0_i32 : i32, i32, i32
  }
  func.func @transform_3(%arg0: i32, %arg1: i32) -> (i32, i32, i32) {
    %c0_i32 = arith.constant 0 : i32
    %c0_i32_0 = arith.constant 0 : i32
    return %arg0, %arg1, %c0_i32 : i32, i32, i32
  }
  func.func @transform_4(%arg0: i32, %arg1: i32) -> (i32, i32, i32) {
    %c0_i32 = arith.constant 0 : i32
    %c0_i32_0 = arith.constant 0 : i32
    return %arg0, %arg1, %c0_i32 : i32, i32, i32
  }
  func.func @transform_5(%arg0: i32, %arg1: i32) -> (i32, i32, i32) {
    %c0_i32 = arith.constant 0 : i32
    %c0_i32_0 = arith.constant 0 : i32
    return %arg0, %arg1, %c0_i32 : i32, i32, i32
  }
  func.func @transform_6(%arg0: i32, %arg1: i32) -> (i32, i32, i32) {
    %c0_i32 = arith.constant 0 : i32
    %c0_i32_0 = arith.constant 0 : i32
    return %arg0, %arg1, %c0_i32 : i32, i32, i32
  }
  func.func @transform_7(%arg0: i32, %arg1: i32) -> (i32, i32, i32) {
    %c0_i32 = arith.constant 0 : i32
    %c0_i32_0 = arith.constant 0 : i32
    return %arg0, %arg1, %c0_i32 : i32, i32, i32
  }
}

</mosaic_0001>

<bundles_post_ra>
// kernel: aspp_forward.13
= control target key start
LH: loop header
LB: loop body
LE: loop exit
PB: predicated region body
PF: predicated region fallthrough
CT: control target
= control target key end

     0   :  { %s1307_s15 = smov 0   ;;  %s1309_s16 = smov 0   ;;  %s1450_s0 = inlined_call_operand.vmem [shape: bf16[2,22,22,16], index: 0, kind: input, shape index: {}, may-alias: {0,1,2}]   ;;  %s1451_s1 = inlined_call_operand.vmem [shape: bf16[2,22,22,16], index: 1, kind: input, shape index: {}, may-alias: {0,1,2}]   ;;  %s1452_s2 = inlined_call_operand.vmem [shape: bf16[2,22,22,16], index: 2, kind: input, shape index: {}, may-alias: {0,1,2}]   ;;  %s1453_s3 = inlined_call_operand.vmem [shape: bf16[3,3,16,8], index: 3, kind: input, shape index: {}]   ;;  %s1454_s4 = inlined_call_operand.vmem [shape: bf16[2,16,16,8], index: 4, kind: output, shape index: {}]  }
   0x1   :  { %s1311_s17 = smov 0   ;;  %s1313_s18 = smov 0  }
   0x2   :  { %s1315_s19 = smov 0  }
   0x3 LB: > { %s23_s20 = sadd.s32 1, %s1270_s17  ;;  %s26_s21 = sadd.s32 1, %s1274_s18  ;;  %s1278_s19 = sphi %s1315_s19, %s14_s19   ;;  %s1274_s18 = sphi %s1313_s18, %s1458_s18   ;;  %s1270_s17 = sphi %s1311_s17, %s1457_s17   ;;  %s1266_s16 = sphi %s1309_s16, %s1456_s16   ;;  %s1262_s15 = sphi %s1307_s15, %s1455_s15  }
   0x4   : > { %p24_p0 = scmp.ge.s32.totalorder %s23_s20, 16  ;;  %p1054_p1 = scmp.ge.s32.totalorder %s1278_s19, 1 }
   0x5   : > { %p222_p2 = scmp.lt.s32.totalorder %s1278_s19, 33 }
   0x6   : > { %s1460_s20 = smov (%p24_p0, %s23_s20), 0  ;;  %s1462_s21 = smov (!%p24_p0, %s26_s21), %s1274_s18 }
   0x7   : > { %p223_p3 = pnand %p1054_p1, %p222_p2  ;;  %p28_p4 = scmp.ge.s32.totalorder %s1462_s21, 2 }
   0x8   : > { %p276_p5 = scmp.lt.s32.totalorder (!%p223_p3), %s1266_s16, 1  ;;  %p278_p6 = scmp.lt.s32.totalorder (!%p223_p3), %s1262_s15, 21 }
   0x9   : > { %s1464_s21 = smov (%p28_p4, %s1462_s21), 0  ;;  %226 = sbr.rel (%p223_p3) target bundleno = 266 (0x10a), region = 36 }
   0xa   : > { %s285_s28 = sadd.s32 (!%p223_p3), 3, %s1262_s15  ;;  %s296_s30 = sadd.s32 (!%p223_p3), 6, %s1262_s15 }
   0xb   : > { %p288_p7 = scmp.lt.s32.totalorder (!%p223_p3), %s285_s28, 21  ;;  %p299_p8 = scmp.lt.s32.totalorder (!%p223_p3), %s296_s30, 21 }
   0xc   : > { %p309_p9 = scmp.lt.s32.totalorder (!%p223_p3), %s1262_s15, 15 }
   0xe   : > { %v1225_v0 = vld [vmem:[%s1453_s3 + $0x8] sm:$0xff]   ;;  %v1280_v1 = vmov 0.0   ;;  %v1226_v2 = vld [vmem:[%s1453_s3] sm:$0xff]   ;;  %vm1281_vm0 = vmmov 0   ;;  %s1466_s16 = smov (!%p276_p5, %s1266_s16), 1  ;;  %vm357_vm1 = vcmask 130048  }
   0xf   : > { %1125 = vmatprep.subr.bf16.mxu0 %v1280_v1  ;;  %1131 = vmatprep.subr.bf16.mxu1 %v1280_v1  ;;  %s279_s26 = scalar_select %p278_p6, %s1262_s15, 21  ;;  %v1230_v3 = vld [vmem:[%s1453_s3 + $0x18] sm:$0xff]   ;;  %vm333_vm2 = vsmask.f32 6400  ;;  %v1229_v16 = vld [vmem:[%s1453_s3 + $0x10] sm:$0xff]   ;;  %v1233_v17 = vld [vmem:[%s1453_s3 + $0x28] sm:$0xff]  }
  0x10   : > { %1126 = vmatpush3.bf16.msra.mxu0 %v1225_v0  ;;  %1127 = vmatprep.mubr.msk.bf16.mxu0 %vm1281_vm0, %v1280_v1  ;;  %s1358_s27 = smul.u32 66, %s1466_s16  ;;  %s1468_s28 = smov (!%p288_p7, %s285_s28), 21  ;;  %vm454_vm3 = vcmask 1044480   ;;  %v1232_v36 = vld [vmem:[%s1453_s3 + $0x20] sm:$0xff]   ;;  %v1236_v42 = vld [vmem:[%s1453_s3 + $0x38] sm:$0xff]   ;;  %v1235_v52 = vld [vmem:[%s1453_s3 + $0x30] sm:$0xff]  }
  0x11   : > { %1132 = vmatpush3.bf16.msra.mxu1 %v1226_v2  ;;  %1133 = vmatprep.mubr.msk.bf16.mxu1 %vm1281_vm0, %v1280_v1  ;;  %s1179_s29 = smul.u32 3, %s279_s26  ;;  %s1470_s30 = smov (!%p299_p8, %s296_s30), 21  ;;  %v1239_v54 = vld [vmem:[%s1453_s3 + $0x40] sm:$0xff]   ;;  %vm910_vm4 = vcmask 60416  }
  0x12   : > { %1137 = vmatprep.subr.bf16.mxu0 %v1280_v1  ;;  %1143 = vmatprep.subr.bf16.mxu1 %v1280_v1  ;;  %s1181_s12 = smul.u32 3, %s1468_s28  ;;  %s1472_s15 = smov (!%p309_p9, %s1262_s15), 15 }
  0x13   : > { %s282_s5 = sadd.s32 %s1358_s27, %s1179_s29  ;;  %s1182_s13 = smul.u32 3, %s1470_s30 }
  0x14   : > { %s1055_s6 = sshll.u32 %s282_s5, 2  ;;  %s292_s14 = sadd.s32 %s1181_s12, %s1358_s27 }
  0x15   : > { %s284_s9 = scalar_lea.vmem %s1450_s0, %s1055_s6  ;;  %s1056_s22 = sshll.u32 %s292_s14, 2 }
  0x16   : > { %v1227_v4 = vld [vmem:[%s284_s9] sm:$0xff]   ;;  %v1228_v5 = vld [vmem:[%s284_s9 + $0x8] ss:$0 sps:$4 sm:$0x77]   ;;  %s303_s23 = sadd.s32 %s1182_s13, %s1358_s27  ;;  %s294_s29 = scalar_lea.vmem %s1451_s1, %s1056_s22 }
  0x17   : > { %v335_v6 = vshrl.u32 %v1227_v4, 16  ;;  %v338_v7 = vshll.u32 %v1227_v4, 16  ;;  %v343_v8 = vshrl.u32 %v1228_v5, 16  ;;  %v346_v9 = vshll.u32 %v1228_v5, 16  ;;  %1134 = vmatmul.mubr.msk.bf16.vlgmr.msra.gmra.mxu1 %vm357_vm1, %v1227_v4  ;;  %s1057_s6 = sshll.u32 %s303_s23, 2  ;;  %v1231_v18 = vld [vmem:[%s294_s29] sm:$0xff]  }
  0x18   : > { %1144 = vmatpush3.bf16.msra.mxu1 %v1230_v3  ;;  %1145 = vmatprep.mubr.msk.bf16.mxu1 %vm1281_vm0, %v1280_v1  ;;  %s305_s27 = scalar_lea.vmem %s1452_s2, %s1057_s6  ;;  %v1234_v20 = vld [vmem:[%s294_s29 + $0x8] ss:$0 sps:$4 sm:$0x77]   ;;  %v455_v22 = vrot.slane %v1227_v4, 3  ;;  %v456_v23 = vrot.slane %v1228_v5, 3  ;;  %v579_v24 = vshrl.u32 %v1231_v18, 16 }
  0x19   : > { %v337_v10 = vrot.slane %v335_v6, 1  ;;  %v340_v11 = vrot.slane %v338_v7, 2  ;;  %v345_v12 = vrot.slane %v343_v8, 1  ;;  %v348_v13 = vrot.slane %v346_v9, 2  ;;  %1155 = vmatprep.subr.bf16.mxu1 %v1280_v1  ;;  %v1237_v21 = vld [vmem:[%s305_s27] sm:$0xff]   ;;  %s1058_s24 = sshll.u32 %s1472_s15, 1 }
  0x1a   : > { %v582_v25 = vshll.u32 %v1231_v18, 16  ;;  %v587_v26 = vshrl.u32 %v1234_v20, 16  ;;  %v590_v27 = vshll.u32 %v1234_v20, 16  ;;  %v650_v28 = vrot.slane %v1231_v18, 3  ;;  %s1059_s25 = sshll.u32 %s1466_s16, 5 }
  0x1b   : > { %v341_v14 = vor.u32 %v340_v11, %v337_v10  ;;  %v349_v15 = vor.u32 %v348_v13, %v345_v12  ;;  %v651_v29 = vrot.slane %v1234_v20, 3  ;;  %v1238_v30 = vld [vmem:[%s305_s27 + $0x8] ss:$0 sps:$4 sm:$0x77]   ;;  %v774_v31 = vshrl.u32 %v1237_v21, 16  ;;  %s313_s26 = sadd.s32 %s1059_s25, %s1058_s24 }
  0x1c   : > { %v777_v32 = vshll.u32 %v1237_v21, 16  ;;  %v457_v33 = vsel %vm454_vm3, %v455_v22, %v456_v23  ;;  %v581_v34 = vrot.slane %v579_v24, 1  ;;  %v584_v35 = vrot.slane %v582_v25, 2  ;;  %s1060_s28 = sshll.u32 %s313_s26, 2 }
  0x1d   : > { %v350_v19 = vsel %vm333_vm2, %v341_v14, %v349_v15  ;;  %v589_v37 = vrot.slane %v587_v26, 1  ;;  %v592_v38 = vrot.slane %v590_v27, 2  ;;  %v782_v39 = vshrl.u32 %v1238_v30, 16  ;;  %s315_s5 = scalar_lea.vmem %s1454_s4, %s1060_s28 }
  0x1e   : > { %1128 = vmatmul.mubr.msk.bf16.vlgmr.msra.gmra.mxu0 %vm357_vm1, %v350_v19  ;;  %v785_v40 = vshll.u32 %v1238_v30, 16  ;;  %v652_v41 = vsel %vm454_vm3, %v650_v28, %v651_v29  ;;  %v776_v43 = vrot.slane %v774_v31, 1  ;;  %v779_v44 = vrot.slane %v777_v32, 2 }
  0x1f   : > { %1138 = vmatpush3.bf16.msra.mxu0 %v1229_v16  ;;  %1139 = vmatprep.mubr.msk.bf16.mxu0 %vm1281_vm0, %v1280_v1  ;;  %v784_v45 = vrot.slane %v782_v39, 1  ;;  %v585_v47 = vor.u32 %v584_v35, %v581_v34  ;;  %v593_v48 = vor.u32 %v592_v38, %v589_v37  ;;  %v845_v55 = vrot.slane %v1237_v21, 3 }
  0x20   : > { %1149 = vmatprep.subr.bf16.mxu0 %v1280_v1  ;;  %1146 = vmatmul.mubr.msk.bf16.vlgmr.msra.gmra.mxu1 %vm357_vm1, %v1231_v18  ;;  %v787_v46 = vrot.slane %v785_v40, 2  ;;  %v780_v49 = vor.u32 %v779_v44, %v776_v43  ;;  %v846_v56 = vrot.slane %v1238_v30, 3 }
  0x21   : > { %1156 = vmatpush3.bf16.msra.mxu1 %v1233_v17  ;;  %1157 = vmatprep.mubr.msk.bf16.mxu1 %vm1281_vm0, %v1280_v1  ;;  %v594_v51 = vsel %vm333_vm2, %v585_v47, %v593_v48 }
  0x22   : > { %1167 = vmatprep.subr.bf16.mxu1 %v1280_v1  ;;  %v788_v50 = vor.u32 %v787_v46, %v784_v45  ;;  %v847_v57 = vsel %vm454_vm3, %v845_v55, %v846_v56 }
  0x24   : > { %v789_v53 = vsel %vm333_vm2, %v780_v49, %v788_v50 }
  0x26   : > { %1140 = vmatmul.mubr.msk.bf16.vlgmr.msra.gmra.mxu0 %vm357_vm1, %v457_v33 }
  0x27   : > { %1150 = vmatpush3.bf16.msra.mxu0 %v1232_v36  ;;  %1151 = vmatprep.mubr.msk.bf16.mxu0 %vm1281_vm0, %v1280_v1 }
  0x28   : > { %1161 = vmatprep.subr.bf16.mxu0 %v1280_v1  ;;  %1158 = vmatmul.mubr.msk.bf16.vlgmr.msra.gmra.mxu1 %vm357_vm1, %v652_v41 }
  0x29   : > { %1168 = vmatpush3.bf16.msra.mxu1 %v1236_v42  ;;  %1169 = vmatprep.mubr.msk.bf16.mxu1 %vm1281_vm0, %v1280_v1 }
  0x2e   : > { %1152 = vmatmul.mubr.msk.bf16.vlgmr.msra.gmra.mxu0 %vm357_vm1, %v594_v51 }
  0x2f   : > { %1162 = vmatpush3.bf16.msra.mxu0 %v1235_v52  ;;  %1163 = vmatprep.mubr.msk.bf16.mxu0 %vm1281_vm0, %v1280_v1 }
  0x30   : > { %1173 = vmatprep.subr.bf16.mxu0 %v1280_v1  ;;  %1170 = vmatmul.mubr.msk.bf16.vlgmr.msra.gmra.mxu1 %vm357_vm1, %v789_v53 }
  0x36   : > { %1164 = vmatmul.mubr.msk.bf16.vlgmr.msra.gmra.mxu0 %vm357_vm1, %v1237_v21 }
  0x37   : > { %1174 = vmatpush3.bf16.msra.mxu0 %v1239_v54  ;;  %1175 = vmatprep.mubr.msk.bf16.mxu0 %vm1281_vm0, %v1280_v1 }
  0x3e   : > { %1176 = vmatmul.mubr.msk.bf16.vlgmr.msra.gmra.mxu0 %vm357_vm1, %v847_v57 }
  0xd7   : > { %v444_v58 = vpop.f32.mrf.mxu1 }
  0xd9   : > { %v1135_v59 = vpop.f32.mrf.mxu1 }
  0xdb   : > { %v447_v60 = vpop.f32.mrf.mxu1 }
  0xdd   : > { %v1136_v61 = vpop.f32.mrf.mxu1 }
  0xde   : > { %v395_v62 = vpop.f32.mrf.mxu0 }
  0xdf   : > { %v445_v11 = vadd.f32 %v444_v58, %v395_v62 }
  0xe0   : > { %v1129_v63 = vpop.f32.mrf.mxu0  ;;  %v564_v0 = vpop.f32.mrf.mxu1 }
  0xe2   : > { %v398_v2 = vpop.f32.mrf.mxu0  ;;  %v1147_v3 = vpop.f32.mrf.mxu1 }
  0xe3   : > { %v448_v17 = vadd.f32 %v447_v60, %v398_v2 }
  0xe4   : > { %v1130_v4 = vpop.f32.mrf.mxu0  ;;  %v567_v5 = vpop.f32.mrf.mxu1 }
  0xe6   : > { %v501_v6 = vpop.f32.mrf.mxu0  ;;  %v1148_v7 = vpop.f32.mrf.mxu1 }
  0xe7   : > { %v508_v14 = vadd.f32 %v501_v6, %v445_v11 }
  0xe8   : > { %v1141_v1 = vpop.f32.mrf.mxu0  ;;  %v696_v8 = vpop.f32.mrf.mxu1 }
  0xe9   : > { %v571_v20 = vadd.f32 %v564_v0, %v508_v14 }
  0xea   : > { %v504_v9 = vpop.f32.mrf.mxu0  ;;  %v1159_v10 = vpop.f32.mrf.mxu1 }
  0xeb   : > { %v509_v21 = vadd.f32 %v504_v9, %v448_v17 }
  0xec   : > { %v1142_v12 = vpop.f32.mrf.mxu0  ;;  %v699_v13 = vpop.f32.mrf.mxu1 }
  0xed   : > { %v572_v27 = vadd.f32 %v567_v5, %v509_v21 }
  0xee   : > { %v638_v15 = vpop.f32.mrf.mxu0  ;;  %v1160_v16 = vpop.f32.mrf.mxu1 }
  0xef   : > { %v645_v24 = vadd.f32 %v638_v15, %v571_v20 }
  0xf0   : > { %v1153_v18 = vpop.f32.mrf.mxu0  ;;  %v833_v19 = vpop.f32.mrf.mxu1 }
  0xf1   : > { %v703_v30 = vadd.f32 %v696_v8, %v645_v24 }
  0xf2   : > { %v641_v22 = vpop.f32.mrf.mxu0  ;;  %v1171_v23 = vpop.f32.mrf.mxu1 }
  0xf3   : > { %v646_v31 = vadd.f32 %v641_v22, %v572_v27 }
  0xf4   : > { %v1154_v25 = vpop.f32.mrf.mxu0  ;;  %v836_v26 = vpop.f32.mrf.mxu1 }
  0xf5   : > { %v704_v35 = vadd.f32 %v699_v13, %v646_v31 }
  0xf6   : > { %v759_v28 = vpop.f32.mrf.mxu0  ;;  %v1172_v29 = vpop.f32.mrf.mxu1 }
  0xf7   : > { %v766_v33 = vadd.f32 %v759_v28, %v703_v30 }
  0xf8   : > { %v1165_v32 = vpop.f32.mrf.mxu0 }
  0xf9   : > { %v840_v37 = vadd.f32 %v833_v19, %v766_v33 }
  0xfa   : > { %v762_v34 = vpop.f32.mrf.mxu0 }
  0xfb   : > { %v767_v38 = vadd.f32 %v762_v34, %v704_v35 }
  0xfc   : > { %v1166_v36 = vpop.f32.mrf.mxu0 }
  0xfd   : > { %v841_v42 = vadd.f32 %v836_v26, %v767_v38 }
  0xfe   : > { %v891_v39 = vpop.f32.mrf.mxu0 }
  0xff   : > { %v898_v40 = vadd.f32 %v891_v39, %v840_v37 }
 0x100   : > { %v1177_v41 = vpop.f32.mrf.mxu0 }
 0x101   : > { %v900_v43 = vmax.f32 %v898_v40, 0.0 }
 0x102   : > { %v894_v44 = vpop.f32.mrf.mxu0 }
 0x103   : > { %v1105_v45 = vpack.c.bf16 %v900_v43, %v900_v43  ;;  %v899_v46 = vadd.f32 %v894_v44, %v841_v42 }
 0x104   : > { %v1178_v47 = vpop.f32.mrf.mxu0 }
 0x105   : > { %911 = vst.msk [vmem:[%s315_s5] sm:$0xf] %vm910_vm4, %v1105_v45  ;;  %v901_v48 = vmax.f32 %v899_v46, 0.0 }
 0x107   : > { %v1106_v49 = vpack.c.bf16 %v901_v48, %v901_v48 }
 0x109   : > { %912 = vst.msk [vmem:[%s315_s5 + $0x4] sm:$0xf] %vm910_vm4, %v1106_v49 }
 0x10a PF: > { %s14_s19 = sadd.s32 1, %s1278_s19   ;;  %s1455_s15 = smov %s1270_s17 }
 0x10b   : > { %p11_p10 = scmp.ge.s32.totalorder %s14_s19, 34   ;;  %s1456_s16 = smov %s1274_s18 }
 0x10c   : > { %s1457_s17 = smov %s1460_s20  ;;  %s1458_s18 = smov %s1464_s21 }
 0x10d   :  { %13 = sbr.rel (!%p11_p10) target bundleno = 3 (0x3), region = 80 }

// kernel: aspp_forward.14
= control target key start
LH: loop header
LB: loop body
LE: loop exit
PB: predicated region body
PF: predicated region fallthrough
CT: control target
= control target key end

     0   :  { %s1267_s15 = smov 0   ;;  %s1269_s16 = smov 0   ;;  %s1413_s0 = inlined_call_operand.vmem [shape: bf16[2,24,24,16], index: 0, kind: input, shape index: {}, may-alias: {0,1,2}]   ;;  %s1414_s1 = inlined_call_operand.vmem [shape: bf16[2,24,24,16], index: 1, kind: input, shape index: {}, may-alias: {0,1,2}]   ;;  %s1415_s2 = inlined_call_operand.vmem [shape: bf16[2,24,24,16], index: 2, kind: input, shape index: {}, may-alias: {0,1,2}]   ;;  %s1416_s3 = inlined_call_operand.vmem [shape: bf16[3,3,16,8], index: 3, kind: input, shape index: {}]   ;;  %s1417_s4 = inlined_call_operand.vmem [shape: bf16[2,16,16,8], index: 4, kind: output, shape index: {}]  }
   0x1   :  { %s1271_s17 = smov 0   ;;  %s1273_s18 = smov 0  }
   0x2   :  { %s1275_s19 = smov 0  }
   0x3 LB: > { %s23_s20 = sadd.s32 1, %s1230_s17  ;;  %s26_s21 = sadd.s32 1, %s1234_s18  ;;  %s1238_s19 = sphi %s1275_s19, %s14_s19   ;;  %s1234_s18 = sphi %s1273_s18, %s1422_s18   ;;  %s1230_s17 = sphi %s1271_s17, %s1421_s17   ;;  %s1226_s16 = sphi %s1269_s16, %s1420_s16   ;;  %s1222_s15 = sphi %s1267_s15, %s1419_s15  }
   0x4   : > { %p24_p0 = scmp.ge.s32.totalorder %s23_s20, 16  ;;  %p1008_p1 = scmp.ge.s32.totalorder %s1238_s19, 1 }
   0x5   : > { %p222_p2 = scmp.lt.s32.totalorder %s1238_s19, 33 }
   0x6   : > { %s1424_s20 = smov (%p24_p0, %s23_s20), 0  ;;  %s1426_s21 = smov (!%p24_p0, %s26_s21), %s1234_s18 }
   0x7   : > { %p223_p3 = pnand %p1008_p1, %p222_p2  ;;  %p28_p4 = scmp.ge.s32.totalorder %s1426_s21, 2 }
   0x8   : > { %p276_p5 = scmp.lt.s32.totalorder (!%p223_p3), %s1226_s16, 1  ;;  %p278_p6 = scmp.lt.s32.totalorder (!%p223_p3), %s1222_s15, 23 }
   0x9   : > { %s1428_s21 = smov (%p28_p4, %s1426_s21), 0  ;;  %226 = sbr.rel (%p223_p3) target bundleno = 264 (0x108), region = 36 }
   0xa   : > { %s285_s26 = sadd.s32 (!%p223_p3), 4, %s1222_s15  ;;  %s296_s5 = sadd.s32 (!%p223_p3), 8, %s1222_s15 }
   0xb   : > { %p288_p7 = scmp.lt.s32.totalorder (!%p223_p3), %s285_s26, 23  ;;  %p1329_p8 = scmp.lt.s32.totalorder (!%p223_p3), %s296_s5, 23 }
   0xc   : > { %p309_p9 = scmp.lt.s32.totalorder (!%p223_p3), %s1222_s15, 15 }
   0xe   : > { %v1182_v0 = vld [vmem:[%s1416_s3 + $0x8] sm:$0xff]   ;;  %v1240_v1 = vmov 0.0   ;;  %v1183_v2 = vld [vmem:[%s1416_s3] sm:$0xff]   ;;  %vm1241_vm0 = vmmov 0   ;;  %s1430_s16 = smov (!%p276_p5, %s1226_s16), 1  ;;  %s1432_s26 = smov (!%p288_p7, %s285_s26), 23 }
   0xf   : > { %1082 = vmatprep.subr.bf16.mxu0 %v1240_v1  ;;  %1088 = vmatprep.subr.bf16.mxu1 %v1240_v1  ;;  %s279_s27 = scalar_select %p278_p6, %s1222_s15, 23  ;;  %vm343_vm1 = vcmask 130048   ;;  %v1188_v3 = vld [vmem:[%s1416_s3 + $0x18] sm:$0xff]   ;;  %vm333_vm2 = vcmask 1045504   ;;  %v1187_v11 = vld [vmem:[%s1416_s3 + $0x10] sm:$0xff]   ;;  %v1191_v16 = vld [vmem:[%s1416_s3 + $0x28] sm:$0xff]  }
  0x10   : > { %1083 = vmatpush3.bf16.msra.mxu0 %v1182_v0  ;;  %1084 = vmatprep.mubr.msk.bf16.mxu0 %vm1241_vm0, %v1240_v1  ;;  %s1319_s28 = smul.u32 72, %s1430_s16  ;;  %s1434_s5 = smov (!%p1329_p8, %s296_s5), 23  ;;  %v1190_v19 = vld [vmem:[%s1416_s3 + $0x20] sm:$0xff]   ;;  %v1195_v27 = vld [vmem:[%s1416_s3 + $0x38] sm:$0xff]   ;;  %v1194_v31 = vld [vmem:[%s1416_s3 + $0x30] sm:$0xff]   ;;  %vm864_vm3 = vcmask 60416  }
  0x11   : > { %1089 = vmatpush3.bf16.msra.mxu1 %v1183_v2  ;;  %1090 = vmatprep.mubr.msk.bf16.mxu1 %vm1241_vm0, %v1240_v1  ;;  %s1136_s29 = smul.u32 3, %s279_s27  ;;  %v1198_v35 = vld [vmem:[%s1416_s3 + $0x40] sm:$0xff]   ;;  %s1436_s15 = smov (!%p309_p9, %s1222_s15), 15 }
  0x12   : > { %1094 = vmatprep.subr.bf16.mxu0 %v1240_v1  ;;  %1100 = vmatprep.subr.bf16.mxu1 %v1240_v1  ;;  %s1138_s7 = smul.u32 3, %s1432_s26  ;;  %s1013_s26 = sshll.u32 %s1430_s16, 5 }
  0x13   : > { %s282_s30 = sadd.s32 %s1319_s28, %s1136_s29  ;;  %s1139_s29 = smul.u32 3, %s1434_s5 }
  0x14   : > { %s1009_s6 = sshll.u32 %s282_s30, 2  ;;  %s292_s14 = sadd.s32 %s1138_s7, %s1319_s28 }
  0x15   : > { %s284_s10 = scalar_lea.vmem %s1413_s0, %s1009_s6  ;;  %s1010_s22 = sshll.u32 %s292_s14, 2 }
  0x16   : > { %v317_v4 = vld [vmem:[%s284_s10] sm:$0xf]  ;;  %v318_v5 = vld [vmem:[%s284_s10 + $0x4] sm:$0xf]  ;;  %v319_v6 = vld [vmem:[%s284_s10 + $0x8] sm:$0xf]  ;;  %s294_s25 = scalar_lea.vmem %s1414_s1, %s1010_s22  ;;  %s303_s7 = sadd.s32 %s1139_s29, %s1319_s28 }
  0x17   : > { %v1017_v7 = vcombine.low %v317_v4, %v318_v5  ;;  %v1018_v8 = vcombine.low %v319_v6, %v319_v6  ;;  %v494_v12 = vld [vmem:[%s294_s25] sm:$0xf]  ;;  %v495_v13 = vld [vmem:[%s294_s25 + $0x4] sm:$0xf]  ;;  %v496_v17 = vld [vmem:[%s294_s25 + $0x8] sm:$0xf]  ;;  %v1025_v18 = vcombine.low %v318_v5, %v319_v6 }
  0x18   : > { %v1030_v15 = vcombine.low %v494_v12, %v495_v13  ;;  %s1011_s8 = sshll.u32 %s303_s7, 2  ;;  %v1035_v20 = vcombine.low %v496_v17, %v496_v17  ;;  %v1040_v26 = vcombine.low %v495_v13, %v496_v17  ;;  %s1012_s25 = sshll.u32 %s1436_s15, 1 }
  0x19   : > { %v334_v9 = vrot.slane %v1017_v7, 2  ;;  %v335_v10 = vrot.slane %v1018_v8, 2  ;;  %1091 = vmatmul.mubr.msk.bf16.vlgmr.msra.gmra.mxu1 %vm343_vm1, %v1017_v7  ;;  %s305_s11 = scalar_lea.vmem %s1415_s2, %s1011_s8  ;;  %s313_s27 = sadd.s32 %s1013_s26, %s1012_s25 }
  0x1a   : > { %1101 = vmatpush3.bf16.msra.mxu1 %v1188_v3  ;;  %1102 = vmatprep.mubr.msk.bf16.mxu1 %vm1241_vm0, %v1240_v1  ;;  %v674_v21 = vld [vmem:[%s305_s11] sm:$0xf]  ;;  %v675_v22 = vld [vmem:[%s305_s11 + $0x4] sm:$0xf]  ;;  %v676_v23 = vld [vmem:[%s305_s11 + $0x8] sm:$0xf] }
  0x1b   : > { %v336_v14 = vsel %vm333_vm2, %v334_v9, %v335_v10  ;;  %1112 = vmatprep.subr.bf16.mxu1 %v1240_v1  ;;  %v563_v24 = vrot.slane %v1030_v15, 2  ;;  %v564_v25 = vrot.slane %v1035_v20, 2  ;;  %v1045_v28 = vcombine.low %v674_v21, %v675_v22  ;;  %s1014_s29 = sshll.u32 %s313_s27, 2 }
  0x1c   : > { %1085 = vmatmul.mubr.msk.bf16.vlgmr.msra.gmra.mxu0 %vm343_vm1, %v336_v14  ;;  %v1050_v29 = vcombine.low %v676_v23, %v676_v23  ;;  %v1055_v36 = vcombine.low %v675_v22, %v676_v23  ;;  %s315_s7 = scalar_lea.vmem %s1417_s4, %s1014_s29 }
  0x1d   : > { %1095 = vmatpush3.bf16.msra.mxu0 %v1187_v11  ;;  %1096 = vmatprep.mubr.msk.bf16.mxu0 %vm1241_vm0, %v1240_v1  ;;  %v565_v30 = vsel %vm333_vm2, %v563_v24, %v564_v25  ;;  %v743_v32 = vrot.slane %v1045_v28, 2 }
  0x1e   : > { %1106 = vmatprep.subr.bf16.mxu0 %v1240_v1  ;;  %v744_v33 = vrot.slane %v1050_v29, 2 }
  0x20   : > { %v745_v34 = vsel %vm333_vm2, %v743_v32, %v744_v33 }
  0x21   : > { %1103 = vmatmul.mubr.msk.bf16.vlgmr.msra.gmra.mxu1 %vm343_vm1, %v1030_v15 }
  0x22   : > { %1113 = vmatpush3.bf16.msra.mxu1 %v1191_v16  ;;  %1114 = vmatprep.mubr.msk.bf16.mxu1 %vm1241_vm0, %v1240_v1 }
  0x23   : > { %1124 = vmatprep.subr.bf16.mxu1 %v1240_v1 }
  0x24   : > { %1097 = vmatmul.mubr.msk.bf16.vlgmr.msra.gmra.mxu0 %vm343_vm1, %v1025_v18 }
  0x25   : > { %1107 = vmatpush3.bf16.msra.mxu0 %v1190_v19  ;;  %1108 = vmatprep.mubr.msk.bf16.mxu0 %vm1241_vm0, %v1240_v1 }
  0x26   : > { %1118 = vmatprep.subr.bf16.mxu0 %v1240_v1 }
  0x29   : > { %1115 = vmatmul.mubr.msk.bf16.vlgmr.msra.gmra.mxu1 %vm343_vm1, %v1040_v26 }
  0x2a   : > { %1125 = vmatpush3.bf16.msra.mxu1 %v1195_v27  ;;  %1126 = vmatprep.mubr.msk.bf16.mxu1 %vm1241_vm0, %v1240_v1 }
  0x2c   : > { %1109 = vmatmul.mubr.msk.bf16.vlgmr.msra.gmra.mxu0 %vm343_vm1, %v565_v30 }
  0x2d   : > { %1119 = vmatpush3.bf16.msra.mxu0 %v1194_v31  ;;  %1120 = vmatprep.mubr.msk.bf16.mxu0 %vm1241_vm0, %v1240_v1 }
  0x2e   : > { %1130 = vmatprep.subr.bf16.mxu0 %v1240_v1 }
  0x31   : > { %1127 = vmatmul.mubr.msk.bf16.vlgmr.msra.gmra.mxu1 %vm343_vm1, %v745_v34 }
  0x34   : > { %1121 = vmatmul.mubr.msk.bf16.vlgmr.msra.gmra.mxu0 %vm343_vm1, %v1045_v28 }
  0x35   : > { %1131 = vmatpush3.bf16.msra.mxu0 %v1198_v35  ;;  %1132 = vmatprep.mubr.msk.bf16.mxu0 %vm1241_vm0, %v1240_v1 }
  0x3c   : > { %1133 = vmatmul.mubr.msk.bf16.vlgmr.msra.gmra.mxu0 %vm343_vm1, %v1055_v36 }
  0xd9   : > { %v431_v37 = vpop.f32.mrf.mxu1 }
  0xdb   : > { %v1092_v38 = vpop.f32.mrf.mxu1 }
  0xdc   : > { %v381_v39 = vpop.f32.mrf.mxu0 }
  0xdd   : > { %v434_v40 = vpop.f32.mrf.mxu1  ;;  %v432_v52 = vadd.f32 %v431_v37, %v381_v39 }
  0xde   : > { %v1086_v41 = vpop.f32.mrf.mxu0 }
  0xdf   : > { %v1093_v42 = vpop.f32.mrf.mxu1 }
  0xe0   : > { %v384_v43 = vpop.f32.mrf.mxu0 }
  0xe1   : > { %v548_v44 = vpop.f32.mrf.mxu1  ;;  %v435_v58 = vadd.f32 %v434_v40, %v384_v43 }
  0xe2   : > { %v1087_v45 = vpop.f32.mrf.mxu0 }
  0xe3   : > { %v1104_v46 = vpop.f32.mrf.mxu1 }
  0xe4   : > { %v485_v47 = vpop.f32.mrf.mxu0 }
  0xe5   : > { %v551_v48 = vpop.f32.mrf.mxu1  ;;  %v492_v55 = vadd.f32 %v485_v47, %v432_v52 }
  0xe6   : > { %v1098_v49 = vpop.f32.mrf.mxu0 }
  0xe7   : > { %v1105_v50 = vpop.f32.mrf.mxu1  ;;  %v555_v61 = vadd.f32 %v548_v44, %v492_v55 }
  0xe8   : > { %v488_v51 = vpop.f32.mrf.mxu0 }
  0xe9   : > { %v665_v53 = vpop.f32.mrf.mxu1  ;;  %v493_v62 = vadd.f32 %v488_v51, %v435_v58 }
  0xea   : > { %v1099_v54 = vpop.f32.mrf.mxu0 }
  0xeb   : > { %v1116_v56 = vpop.f32.mrf.mxu1  ;;  %v556_v4 = vadd.f32 %v551_v48, %v493_v62 }
  0xec   : > { %v609_v57 = vpop.f32.mrf.mxu0 }
  0xed   : > { %v668_v59 = vpop.f32.mrf.mxu1  ;;  %v616_v1 = vadd.f32 %v609_v57, %v555_v61 }
  0xee   : > { %v1110_v60 = vpop.f32.mrf.mxu0 }
  0xef   : > { %v1117_v63 = vpop.f32.mrf.mxu1  ;;  %v672_v7 = vadd.f32 %v665_v53, %v616_v1 }
  0xf0   : > { %v612_v0 = vpop.f32.mrf.mxu0 }
  0xf1   : > { %v789_v2 = vpop.f32.mrf.mxu1  ;;  %v617_v8 = vadd.f32 %v612_v0, %v556_v4 }
  0xf2   : > { %v1111_v3 = vpop.f32.mrf.mxu0 }
  0xf3   : > { %v1128_v5 = vpop.f32.mrf.mxu1  ;;  %v673_v14 = vadd.f32 %v668_v59, %v617_v8 }
  0xf4   : > { %v728_v6 = vpop.f32.mrf.mxu0 }
  0xf5   : > { %v792_v9 = vpop.f32.mrf.mxu1  ;;  %v735_v11 = vadd.f32 %v728_v6, %v672_v7 }
  0xf6   : > { %v1122_v10 = vpop.f32.mrf.mxu0 }
  0xf7   : > { %v1129_v12 = vpop.f32.mrf.mxu1  ;;  %v796_v16 = vadd.f32 %v789_v2, %v735_v11 }
  0xf8   : > { %v731_v13 = vpop.f32.mrf.mxu0 }
  0xf9   : > { %v736_v17 = vadd.f32 %v731_v13, %v673_v14 }
  0xfa   : > { %v1123_v15 = vpop.f32.mrf.mxu0 }
  0xfb   : > { %v797_v21 = vadd.f32 %v792_v9, %v736_v17 }
  0xfc   : > { %v845_v18 = vpop.f32.mrf.mxu0 }
  0xfd   : > { %v852_v19 = vadd.f32 %v845_v18, %v796_v16 }
  0xfe   : > { %v1134_v20 = vpop.f32.mrf.mxu0 }
  0xff   : > { %v854_v22 = vmax.f32 %v852_v19, 0.0 }
 0x100   : > { %v848_v23 = vpop.f32.mrf.mxu0 }
 0x101   : > { %v1062_v24 = vpack.c.bf16 %v854_v22, %v854_v22  ;;  %v853_v25 = vadd.f32 %v848_v23, %v797_v21 }
 0x102   : > { %v1135_v26 = vpop.f32.mrf.mxu0 }
 0x103   : > { %865 = vst.msk [vmem:[%s315_s7] sm:$0xf] %vm864_vm3, %v1062_v24  ;;  %v855_v27 = vmax.f32 %v853_v25, 0.0 }
 0x105   : > { %v1063_v28 = vpack.c.bf16 %v855_v27, %v855_v27 }
 0x107   : > { %866 = vst.msk [vmem:[%s315_s7 + $0x4] sm:$0xf] %vm864_vm3, %v1063_v28 }
 0x108 PF: > { %s14_s19 = sadd.s32 1, %s1238_s19   ;;  %s1419_s15 = smov %s1230_s17 }
 0x109   : > { %p11_p10 = scmp.ge.s32.totalorder %s14_s19, 34   ;;  %s1420_s16 = smov %s1234_s18 }
 0x10a   : > { %s1421_s17 = smov %s1424_s20  ;;  %s1422_s18 = smov %s1428_s21 }
 0x10b   :  { %13 = sbr.rel (!%p11_p10) target bundleno = 3 (0x3), region = 80 }

// kernel: aspp_forward.12
= control target key start
LH: loop header
LB: loop body
LE: loop exit
PB: predicated region body
PF: predicated region fallthrough
CT: control target
= control target key end

     0   :  { %s1268_s15 = smov 0   ;;  %s1270_s16 = smov 0   ;;  %s1411_s0 = inlined_call_operand.vmem [shape: bf16[2,20,20,16], index: 0, kind: input, shape index: {}, may-alias: {0,1,2}]   ;;  %s1412_s1 = inlined_call_operand.vmem [shape: bf16[2,20,20,16], index: 1, kind: input, shape index: {}, may-alias: {0,1,2}]   ;;  %s1413_s2 = inlined_call_operand.vmem [shape: bf16[2,20,20,16], index: 2, kind: input, shape index: {}, may-alias: {0,1,2}]   ;;  %s1414_s3 = inlined_call_operand.vmem [shape: bf16[3,3,16,8], index: 3, kind: input, shape index: {}]   ;;  %s1415_s4 = inlined_call_operand.vmem [shape: bf16[2,16,16,8], index: 4, kind: output, shape index: {}]  }
   0x1   :  { %s1272_s17 = smov 0   ;;  %s1274_s18 = smov 0  }
   0x2   :  { %s1276_s19 = smov 0  }
   0x3 LB: > { %s23_s20 = sadd.s32 1, %s1231_s17  ;;  %s26_s21 = sadd.s32 1, %s1235_s18  ;;  %s1239_s19 = sphi %s1276_s19, %s14_s19   ;;  %s1235_s18 = sphi %s1274_s18, %s1419_s18   ;;  %s1231_s17 = sphi %s1272_s17, %s1418_s17   ;;  %s1227_s16 = sphi %s1270_s16, %s1417_s16   ;;  %s1223_s15 = sphi %s1268_s15, %s1416_s15  }
   0x4   : > { %p24_p0 = scmp.ge.s32.totalorder %s23_s20, 16  ;;  %p1015_p1 = scmp.ge.s32.totalorder %s1239_s19, 1 }
   0x5   : > { %p222_p2 = scmp.lt.s32.totalorder %s1239_s19, 33 }
   0x6   : > { %s1421_s20 = smov (%p24_p0, %s23_s20), 0  ;;  %s1423_s21 = smov (!%p24_p0, %s26_s21), %s1235_s18 }
   0x7   : > { %p223_p3 = pnand %p1015_p1, %p222_p2  ;;  %p28_p4 = scmp.ge.s32.totalorder %s1423_s21, 2 }
   0x8   : > { %p276_p5 = scmp.lt.s32.totalorder (!%p223_p3), %s1227_s16, 1  ;;  %p278_p6 = scmp.lt.s32.totalorder (!%p223_p3), %s1223_s15, 19 }
   0x9   : > { %s1425_s21 = smov (%p28_p4, %s1423_s21), 0  ;;  %226 = sbr.rel (%p223_p3) target bundleno = 262 (0x106), region = 36 }
   0xa   : > { %s285_s28 = sadd.s32 (!%p223_p3), 2, %s1223_s15  ;;  %s296_s30 = sadd.s32 (!%p223_p3), 4, %s1223_s15 }
   0xb   : > { %p288_p7 = scmp.lt.s32.totalorder (!%p223_p3), %s285_s28, 19  ;;  %p299_p8 = scmp.lt.s32.totalorder (!%p223_p3), %s296_s30, 19 }
   0xc   : > { %p309_p9 = scmp.lt.s32.totalorder (!%p223_p3), %s1223_s15, 15 }
   0xe   : > { %v1186_v0 = vld [vmem:[%s1414_s3 + $0x8] sm:$0xff]   ;;  %v1241_v1 = vmov 0.0   ;;  %v1187_v2 = vld [vmem:[%s1414_s3] sm:$0xff]   ;;  %vm1242_vm0 = vmmov 0   ;;  %s1427_s16 = smov (!%p276_p5, %s1227_s16), 1  ;;  %vm343_vm1 = vcmask 130048  }
   0xf   : > { %1086 = vmatprep.subr.bf16.mxu0 %v1241_v1  ;;  %1092 = vmatprep.subr.bf16.mxu1 %v1241_v1  ;;  %s279_s26 = scalar_select %p278_p6, %s1223_s15, 19  ;;  %v1191_v3 = vld [vmem:[%s1414_s3 + $0x18] sm:$0xff]   ;;  %vm333_vm2 = vcmask 1046528   ;;  %v1190_v8 = vld [vmem:[%s1414_s3 + $0x10] sm:$0xff]   ;;  %v1194_v12 = vld [vmem:[%s1414_s3 + $0x28] sm:$0xff]   ;;  %vm441_vm3 = vcmask 1045504  }
  0x10   : > { %1087 = vmatpush3.bf16.msra.mxu0 %v1186_v0  ;;  %1088 = vmatprep.mubr.msk.bf16.mxu0 %vm1242_vm0, %v1241_v1  ;;  %s1319_s27 = smul.u32 60, %s1427_s16  ;;  %s1429_s28 = smov (!%p288_p7, %s285_s28), 19  ;;  %v1193_v16 = vld [vmem:[%s1414_s3 + $0x20] sm:$0xff]   ;;  %v1197_v22 = vld [vmem:[%s1414_s3 + $0x38] sm:$0xff]   ;;  %v1196_v26 = vld [vmem:[%s1414_s3 + $0x30] sm:$0xff]   ;;  %vm871_vm4 = vcmask 60416  }
  0x11   : > { %1093 = vmatpush3.bf16.msra.mxu1 %v1187_v2  ;;  %1094 = vmatprep.mubr.msk.bf16.mxu1 %vm1242_vm0, %v1241_v1  ;;  %s1140_s29 = smul.u32 3, %s279_s26  ;;  %s1431_s30 = smov (!%p299_p8, %s296_s30), 19  ;;  %v1200_v30 = vld [vmem:[%s1414_s3 + $0x40] sm:$0xff]  }
  0x12   : > { %1098 = vmatprep.subr.bf16.mxu0 %v1241_v1  ;;  %1104 = vmatprep.subr.bf16.mxu1 %v1241_v1  ;;  %s1142_s14 = smul.u32 3, %s1429_s28  ;;  %s1433_s15 = smov (!%p309_p9, %s1223_s15), 15 }
  0x13   : > { %s282_s5 = sadd.s32 %s1319_s27, %s1140_s29  ;;  %s1143_s22 = smul.u32 3, %s1431_s30 }
  0x14   : > { %s1016_s6 = sshll.u32 %s282_s5, 2  ;;  %s292_s23 = sadd.s32 %s1142_s14, %s1319_s27 }
  0x15   : > { %s284_s9 = scalar_lea.vmem %s1411_s0, %s1016_s6  ;;  %s1017_s24 = sshll.u32 %s292_s23, 2 }
  0x16   : > { %v1188_v4 = vld [vmem:[%s284_s9] sm:$0xff]   ;;  %v1189_v5 = vld [vmem:[%s284_s9 + $0x8] ss:$0 sps:$4 sm:$0x33]   ;;  %s303_s25 = sadd.s32 %s1143_s22, %s1319_s27  ;;  %s294_s29 = scalar_lea.vmem %s1412_s1, %s1017_s24 }
  0x17   : > { %v334_v6 = vrot.slane %v1188_v4, 1  ;;  %v335_v7 = vrot.slane %v1189_v5, 1  ;;  %1095 = vmatmul.mubr.msk.bf16.vlgmr.msra.gmra.mxu1 %vm343_vm1, %v1188_v4  ;;  %v442_v10 = vrot.slane %v1188_v4, 2  ;;  %v443_v11 = vrot.slane %v1189_v5, 2  ;;  %s1018_s6 = sshll.u32 %s303_s25, 2  ;;  %v1192_v13 = vld [vmem:[%s294_s29] sm:$0xff]  }
  0x18   : > { %1105 = vmatpush3.bf16.msra.mxu1 %v1191_v3  ;;  %1106 = vmatprep.mubr.msk.bf16.mxu1 %vm1242_vm0, %v1241_v1  ;;  %v1195_v14 = vld [vmem:[%s294_s29 + $0x8] ss:$0 sps:$4 sm:$0x33]   ;;  %s305_s8 = scalar_lea.vmem %s1413_s2, %s1018_s6  ;;  %v624_v17 = vrot.slane %v1192_v13, 2  ;;  %v566_v19 = vrot.slane %v1192_v13, 1  ;;  %s1019_s24 = sshll.u32 %s1433_s15, 1 }
  0x19   : > { %v336_v9 = vsel %vm333_vm2, %v334_v6, %v335_v7  ;;  %1116 = vmatprep.subr.bf16.mxu1 %v1241_v1  ;;  %v444_v15 = vsel %vm441_vm3, %v442_v10, %v443_v11  ;;  %v625_v18 = vrot.slane %v1195_v14, 2  ;;  %v567_v20 = vrot.slane %v1195_v14, 1  ;;  %v1198_v23 = vld [vmem:[%s305_s8] sm:$0xff]   ;;  %v1199_v24 = vld [vmem:[%s305_s8 + $0x8] ss:$0 sps:$4 sm:$0x33]  }
  0x1a   : > { %1089 = vmatmul.mubr.msk.bf16.vlgmr.msra.gmra.mxu0 %vm343_vm1, %v336_v9  ;;  %v748_v27 = vrot.slane %v1198_v23, 1  ;;  %v749_v28 = vrot.slane %v1199_v24, 1  ;;  %v806_v31 = vrot.slane %v1198_v23, 2  ;;  %v807_v32 = vrot.slane %v1199_v24, 2  ;;  %s1020_s25 = sshll.u32 %s1427_s16, 5 }
  0x1b   : > { %1099 = vmatpush3.bf16.msra.mxu0 %v1190_v8  ;;  %1100 = vmatprep.mubr.msk.bf16.mxu0 %vm1242_vm0, %v1241_v1  ;;  %v626_v21 = vsel %vm441_vm3, %v624_v17, %v625_v18  ;;  %v568_v25 = vsel %vm333_vm2, %v566_v19, %v567_v20  ;;  %s313_s26 = sadd.s32 %s1020_s25, %s1019_s24 }
  0x1c   : > { %1110 = vmatprep.subr.bf16.mxu0 %v1241_v1  ;;  %v750_v29 = vsel %vm333_vm2, %v748_v27, %v749_v28  ;;  %v808_v33 = vsel %vm441_vm3, %v806_v31, %v807_v32  ;;  %s1021_s28 = sshll.u32 %s313_s26, 2 }
  0x1d   : > { %s315_s5 = scalar_lea.vmem %s1415_s4, %s1021_s28 }
  0x1f   : > { %1107 = vmatmul.mubr.msk.bf16.vlgmr.msra.gmra.mxu1 %vm343_vm1, %v1192_v13 }
  0x20   : > { %1117 = vmatpush3.bf16.msra.mxu1 %v1194_v12  ;;  %1118 = vmatprep.mubr.msk.bf16.mxu1 %vm1242_vm0, %v1241_v1 }
  0x21   : > { %1128 = vmatprep.subr.bf16.mxu1 %v1241_v1 }
  0x22   : > { %1101 = vmatmul.mubr.msk.bf16.vlgmr.msra.gmra.mxu0 %vm343_vm1, %v444_v15 }
  0x23   : > { %1111 = vmatpush3.bf16.msra.mxu0 %v1193_v16  ;;  %1112 = vmatprep.mubr.msk.bf16.mxu0 %vm1242_vm0, %v1241_v1 }
  0x24   : > { %1122 = vmatprep.subr.bf16.mxu0 %v1241_v1 }
  0x27   : > { %1119 = vmatmul.mubr.msk.bf16.vlgmr.msra.gmra.mxu1 %vm343_vm1, %v626_v21 }
  0x28   : > { %1129 = vmatpush3.bf16.msra.mxu1 %v1197_v22  ;;  %1130 = vmatprep.mubr.msk.bf16.mxu1 %vm1242_vm0, %v1241_v1 }
  0x2a   : > { %1113 = vmatmul.mubr.msk.bf16.vlgmr.msra.gmra.mxu0 %vm343_vm1, %v568_v25 }
  0x2b   : > { %1123 = vmatpush3.bf16.msra.mxu0 %v1196_v26  ;;  %1124 = vmatprep.mubr.msk.bf16.mxu0 %vm1242_vm0, %v1241_v1 }
  0x2c   : > { %1134 = vmatprep.subr.bf16.mxu0 %v1241_v1 }
  0x2f   : > { %1131 = vmatmul.mubr.msk.bf16.vlgmr.msra.gmra.mxu1 %vm343_vm1, %v750_v29 }
  0x32   : > { %1125 = vmatmul.mubr.msk.bf16.vlgmr.msra.gmra.mxu0 %vm343_vm1, %v1198_v23 }
  0x33   : > { %1135 = vmatpush3.bf16.msra.mxu0 %v1200_v30  ;;  %1136 = vmatprep.mubr.msk.bf16.mxu0 %vm1242_vm0, %v1241_v1 }
  0x3a   : > { %1137 = vmatmul.mubr.msk.bf16.vlgmr.msra.gmra.mxu0 %vm343_vm1, %v808_v33 }
  0xd7   : > { %v431_v34 = vpop.f32.mrf.mxu1 }
  0xd9   : > { %v1096_v35 = vpop.f32.mrf.mxu1 }
  0xda   : > { %v381_v36 = vpop.f32.mrf.mxu0 }
  0xdb   : > { %v434_v37 = vpop.f32.mrf.mxu1  ;;  %v432_v49 = vadd.f32 %v431_v34, %v381_v36 }
  0xdc   : > { %v1090_v38 = vpop.f32.mrf.mxu0 }
  0xdd   : > { %v1097_v39 = vpop.f32.mrf.mxu1 }
  0xde   : > { %v384_v40 = vpop.f32.mrf.mxu0 }
  0xdf   : > { %v551_v41 = vpop.f32.mrf.mxu1  ;;  %v435_v55 = vadd.f32 %v434_v37, %v384_v40 }
  0xe0   : > { %v1091_v42 = vpop.f32.mrf.mxu0 }
  0xe1   : > { %v1108_v43 = vpop.f32.mrf.mxu1 }
  0xe2   : > { %v488_v44 = vpop.f32.mrf.mxu0 }
  0xe3   : > { %v554_v45 = vpop.f32.mrf.mxu1  ;;  %v495_v52 = vadd.f32 %v488_v44, %v432_v49 }
  0xe4   : > { %v1102_v46 = vpop.f32.mrf.mxu0 }
  0xe5   : > { %v1109_v47 = vpop.f32.mrf.mxu1  ;;  %v558_v58 = vadd.f32 %v551_v41, %v495_v52 }
  0xe6   : > { %v491_v48 = vpop.f32.mrf.mxu0 }
  0xe7   : > { %v670_v50 = vpop.f32.mrf.mxu1  ;;  %v496_v59 = vadd.f32 %v491_v48, %v435_v55 }
  0xe8   : > { %v1103_v51 = vpop.f32.mrf.mxu0 }
  0xe9   : > { %v1120_v53 = vpop.f32.mrf.mxu1  ;;  %v559_v1 = vadd.f32 %v554_v45, %v496_v59 }
  0xea   : > { %v612_v54 = vpop.f32.mrf.mxu0 }
  0xeb   : > { %v673_v56 = vpop.f32.mrf.mxu1  ;;  %v619_v62 = vadd.f32 %v612_v54, %v558_v58 }
  0xec   : > { %v1114_v57 = vpop.f32.mrf.mxu0 }
  0xed   : > { %v1121_v60 = vpop.f32.mrf.mxu1  ;;  %v677_v4 = vadd.f32 %v670_v50, %v619_v62 }
  0xee   : > { %v615_v61 = vpop.f32.mrf.mxu0 }
  0xef   : > { %v794_v63 = vpop.f32.mrf.mxu1  ;;  %v620_v5 = vadd.f32 %v615_v61, %v559_v1 }
  0xf0   : > { %v1115_v0 = vpop.f32.mrf.mxu0 }
  0xf1   : > { %v1132_v2 = vpop.f32.mrf.mxu1  ;;  %v678_v11 = vadd.f32 %v673_v56, %v620_v5 }
  0xf2   : > { %v733_v3 = vpop.f32.mrf.mxu0 }
  0xf3   : > { %v797_v6 = vpop.f32.mrf.mxu1  ;;  %v740_v8 = vadd.f32 %v733_v3, %v677_v4 }
  0xf4   : > { %v1126_v7 = vpop.f32.mrf.mxu0 }
  0xf5   : > { %v1133_v9 = vpop.f32.mrf.mxu1  ;;  %v801_v13 = vadd.f32 %v794_v63, %v740_v8 }
  0xf6   : > { %v736_v10 = vpop.f32.mrf.mxu0 }
  0xf7   : > { %v741_v14 = vadd.f32 %v736_v10, %v678_v11 }
  0xf8   : > { %v1127_v12 = vpop.f32.mrf.mxu0 }
  0xf9   : > { %v802_v18 = vadd.f32 %v797_v6, %v741_v14 }
  0xfa   : > { %v852_v15 = vpop.f32.mrf.mxu0 }
  0xfb   : > { %v859_v16 = vadd.f32 %v852_v15, %v801_v13 }
  0xfc   : > { %v1138_v17 = vpop.f32.mrf.mxu0 }
  0xfd   : > { %v861_v19 = vmax.f32 %v859_v16, 0.0 }
  0xfe   : > { %v855_v20 = vpop.f32.mrf.mxu0 }
  0xff   : > { %v1066_v21 = vpack.c.bf16 %v861_v19, %v861_v19  ;;  %v860_v22 = vadd.f32 %v855_v20, %v802_v18 }
 0x100   : > { %v1139_v23 = vpop.f32.mrf.mxu0 }
 0x101   : > { %872 = vst.msk [vmem:[%s315_s5] sm:$0xf] %vm871_vm4, %v1066_v21  ;;  %v862_v24 = vmax.f32 %v860_v22, 0.0 }
 0x103   : > { %v1067_v25 = vpack.c.bf16 %v862_v24, %v862_v24 }
 0x105   : > { %873 = vst.msk [vmem:[%s315_s5 + $0x4] sm:$0xf] %vm871_vm4, %v1067_v25 }
 0x106 PF: > { %s14_s19 = sadd.s32 1, %s1239_s19   ;;  %s1416_s15 = smov %s1231_s17 }
 0x107   : > { %p11_p10 = scmp.ge.s32.totalorder %s14_s19, 34   ;;  %s1417_s16 = smov %s1235_s18 }
 0x108   : > { %s1418_s17 = smov %s1421_s20  ;;  %s1419_s18 = smov %s1425_s21 }
 0x109   :  { %13 = sbr.rel (!%p11_p10) target bundleno = 3 (0x3), region = 80 }

// kernel: aspp_forward.11
= control target key start
LH: loop header
LB: loop body
LE: loop exit
PB: predicated region body
PF: predicated region fallthrough
CT: control target
= control target key end

     0   :  { %s1292_s15 = smov 0   ;;  %s1294_s16 = smov 0   ;;  %s1435_s0 = inlined_call_operand.vmem [shape: bf16[2,18,18,16], index: 0, kind: input, shape index: {}, may-alias: {0,1,2}]   ;;  %s1436_s1 = inlined_call_operand.vmem [shape: bf16[2,18,18,16], index: 1, kind: input, shape index: {}, may-alias: {0,1,2}]   ;;  %s1437_s2 = inlined_call_operand.vmem [shape: bf16[2,18,18,16], index: 2, kind: input, shape index: {}, may-alias: {0,1,2}]   ;;  %s1438_s3 = inlined_call_operand.vmem [shape: bf16[3,3,16,8], index: 3, kind: input, shape index: {}]   ;;  %s1439_s4 = inlined_call_operand.vmem [shape: bf16[2,16,16,8], index: 4, kind: output, shape index: {}]  }
   0x1   :  { %s1296_s17 = smov 0   ;;  %s1298_s18 = smov 0  }
   0x2   :  { %s1300_s19 = smov 0  }
   0x3 LB: > { %s23_s20 = sadd.s32 1, %s1255_s17  ;;  %s26_s21 = sadd.s32 1, %s1259_s18  ;;  %s1263_s19 = sphi %s1300_s19, %s14_s19   ;;  %s1259_s18 = sphi %s1298_s18, %s1443_s18   ;;  %s1255_s17 = sphi %s1296_s17, %s1442_s17   ;;  %s1251_s16 = sphi %s1294_s16, %s1441_s16   ;;  %s1247_s15 = sphi %s1292_s15, %s1440_s15  }
   0x4   : > { %p24_p0 = scmp.ge.s32.totalorder %s23_s20, 16  ;;  %p1039_p1 = scmp.ge.s32.totalorder %s1263_s19, 1 }
   0x5   : > { %p222_p2 = scmp.lt.s32.totalorder %s1263_s19, 33 }
   0x6   : > { %s1445_s20 = smov (%p24_p0, %s23_s20), 0  ;;  %s1447_s21 = smov (!%p24_p0, %s26_s21), %s1259_s18 }
   0x7   : > { %p223_p3 = pnand %p1039_p1, %p222_p2  ;;  %p28_p4 = scmp.ge.s32.totalorder %s1447_s21, 2 }
   0x8   : > { %p276_p5 = scmp.lt.s32.totalorder (!%p223_p3), %s1251_s16, 1  ;;  %p278_p6 = scmp.lt.s32.totalorder (!%p223_p3), %s1247_s15, 17 }
   0x9   : > { %s1449_s21 = smov (%p28_p4, %s1447_s21), 0  ;;  %226 = sbr.rel (%p223_p3) target bundleno = 266 (0x10a), region = 36 }
   0xa   : > { %s285_s28 = sadd.s32 (!%p223_p3), 1, %s1247_s15  ;;  %s296_s30 = sadd.s32 (!%p223_p3), 2, %s1247_s15 }
   0xb   : > { %p288_p7 = scmp.lt.s32.totalorder (!%p223_p3), %s285_s28, 17  ;;  %p299_p8 = scmp.lt.s32.totalorder (!%p223_p3), %s296_s30, 17 }
   0xc   : > { %p309_p9 = scmp.lt.s32.totalorder (!%p223_p3), %s1247_s15, 15 }
   0xe   : > { %v1210_v0 = vld [vmem:[%s1438_s3 + $0x8] sm:$0xff]   ;;  %v1265_v1 = vmov 0.0   ;;  %v1211_v2 = vld [vmem:[%s1438_s3] sm:$0xff]   ;;  %vm1266_vm0 = vmmov 0   ;;  %s1451_s16 = smov (!%p276_p5, %s1251_s16), 1  ;;  %vm352_vm1 = vcmask 130048  }
   0xf   : > { %1110 = vmatprep.subr.bf16.mxu0 %v1265_v1  ;;  %1116 = vmatprep.subr.bf16.mxu1 %v1265_v1  ;;  %s279_s26 = scalar_select %p278_p6, %s1247_s15, 17  ;;  %v1215_v3 = vld [vmem:[%s1438_s3 + $0x18] sm:$0xff]   ;;  %vm333_vm2 = vsmask.f32 7424  ;;  %v1214_v12 = vld [vmem:[%s1438_s3 + $0x10] sm:$0xff]   ;;  %v1218_v15 = vld [vmem:[%s1438_s3 + $0x28] sm:$0xff]  }
  0x10   : > { %1111 = vmatpush3.bf16.msra.mxu0 %v1210_v0  ;;  %1112 = vmatprep.mubr.msk.bf16.mxu0 %vm1266_vm0, %v1265_v1  ;;  %s1343_s27 = smul.u32 54, %s1451_s16  ;;  %s1453_s28 = smov (!%p288_p7, %s285_s28), 17  ;;  %vm449_vm3 = vcmask 1046528   ;;  %v1217_v26 = vld [vmem:[%s1438_s3 + $0x20] sm:$0xff]   ;;  %v1221_v31 = vld [vmem:[%s1438_s3 + $0x38] sm:$0xff]   ;;  %v1220_v40 = vld [vmem:[%s1438_s3 + $0x30] sm:$0xff]  }
  0x11   : > { %1117 = vmatpush3.bf16.msra.mxu1 %v1211_v2  ;;  %1118 = vmatprep.mubr.msk.bf16.mxu1 %vm1266_vm0, %v1265_v1  ;;  %s1164_s29 = smul.u32 3, %s279_s26  ;;  %s1455_s30 = smov (!%p299_p8, %s296_s30), 17  ;;  %v1224_v42 = vld [vmem:[%s1438_s3 + $0x40] sm:$0xff]   ;;  %vm895_vm4 = vcmask 60416  }
  0x12   : > { %1122 = vmatprep.subr.bf16.mxu0 %v1265_v1  ;;  %1128 = vmatprep.subr.bf16.mxu1 %v1265_v1  ;;  %s1166_s12 = smul.u32 3, %s1453_s28  ;;  %s1457_s15 = smov (!%p309_p9, %s1247_s15), 15 }
  0x13   : > { %s282_s5 = sadd.s32 %s1343_s27, %s1164_s29  ;;  %s1167_s13 = smul.u32 3, %s1455_s30 }
  0x14   : > { %s1040_s6 = sshll.u32 %s282_s5, 2  ;;  %s292_s14 = sadd.s32 %s1166_s12, %s1343_s27 }
  0x15   : > { %s284_s9 = scalar_lea.vmem %s1435_s0, %s1040_s6  ;;  %s1041_s22 = sshll.u32 %s292_s14, 2 }
  0x16   : > { %v1212_v4 = vld [vmem:[%s284_s9] sm:$0xff]   ;;  %v1213_v5 = vld [vmem:[%s284_s9 + $0x8] ss:$0 sps:$4 sm:$0x11]   ;;  %s303_s23 = sadd.s32 %s1167_s13, %s1343_s27  ;;  %s294_s29 = scalar_lea.vmem %s1436_s1, %s1041_s22 }
  0x17   : > { %v335_v6 = vshrl.u32 %v1212_v4, 16  ;;  %v337_v7 = vshll.u32 %v1212_v4, 16  ;;  %v342_v8 = vshll.u32 %v1213_v5, 16  ;;  %1119 = vmatmul.mubr.msk.bf16.vlgmr.msra.gmra.mxu1 %vm352_vm1, %v1212_v4  ;;  %s1042_s5 = sshll.u32 %s303_s23, 2  ;;  %v1216_v13 = vld [vmem:[%s294_s29] sm:$0xff]   ;;  %v450_v17 = vrot.slane %v1212_v4, 1 }
  0x18   : > { %1129 = vmatpush3.bf16.msra.mxu1 %v1215_v3  ;;  %1130 = vmatprep.mubr.msk.bf16.mxu1 %vm1266_vm0, %v1265_v1  ;;  %s305_s7 = scalar_lea.vmem %s1437_s2, %s1042_s5  ;;  %v1219_v18 = vld [vmem:[%s294_s29 + $0x8] ss:$0 sps:$4 sm:$0x11]   ;;  %v451_v19 = vrot.slane %v1213_v5, 1  ;;  %v576_v20 = vshll.u32 %v1216_v13, 16  ;;  %v640_v21 = vrot.slane %v1216_v13, 1 }
  0x19   : > { %v339_v9 = vrot.slane %v337_v7, 1  ;;  %v344_v10 = vrot.slane %v342_v8, 1  ;;  %1140 = vmatprep.subr.bf16.mxu1 %v1265_v1  ;;  %v1222_v16 = vld [vmem:[%s305_s7] sm:$0xff]   ;;  %v641_v22 = vrot.slane %v1219_v18, 1  ;;  %v574_v27 = vshrl.u32 %v1216_v13, 16  ;;  %s1043_s24 = sshll.u32 %s1457_s15, 1 }
  0x1a   : > { %v1223_v23 = vld [vmem:[%s305_s7 + $0x8] ss:$0 sps:$4 sm:$0x11]   ;;  %v766_v24 = vshll.u32 %v1222_v16, 16  ;;  %v452_v25 = vsel %vm449_vm3, %v450_v17, %v451_v19  ;;  %v578_v28 = vrot.slane %v576_v20, 1  ;;  %v581_v29 = vshll.u32 %v1219_v18, 16 }
  0x1b   : > { %v340_v11 = vor.u32 %v339_v9, %v335_v6  ;;  %v642_v30 = vsel %vm449_vm3, %v640_v21, %v641_v22  ;;  %v764_v32 = vshrl.u32 %v1222_v16, 16  ;;  %v771_v34 = vshll.u32 %v1223_v23, 16  ;;  %s1044_s25 = sshll.u32 %s1451_s16, 5 }
  0x1c   : > { %v768_v33 = vrot.slane %v766_v24, 1  ;;  %v579_v35 = vor.u32 %v578_v28, %v574_v27  ;;  %v583_v36 = vrot.slane %v581_v29, 1  ;;  %v830_v43 = vrot.slane %v1222_v16, 1  ;;  %s313_s26 = sadd.s32 %s1044_s25, %s1043_s24 }
  0x1d   : > { %v345_v14 = vsel %vm333_vm2, %v340_v11, %v344_v10  ;;  %v773_v38 = vrot.slane %v771_v34, 1  ;;  %v831_v44 = vrot.slane %v1223_v23, 1  ;;  %s1045_s28 = sshll.u32 %s313_s26, 2 }
  0x1e   : > { %1113 = vmatmul.mubr.msk.bf16.vlgmr.msra.gmra.mxu0 %vm352_vm1, %v345_v14  ;;  %v769_v37 = vor.u32 %v768_v33, %v764_v32  ;;  %v584_v39 = vsel %vm333_vm2, %v579_v35, %v583_v36  ;;  %s315_s30 = scalar_lea.vmem %s1439_s4, %s1045_s28 }
  0x1f   : > { %1123 = vmatpush3.bf16.msra.mxu0 %v1214_v12  ;;  %1124 = vmatprep.mubr.msk.bf16.mxu0 %vm1266_vm0, %v1265_v1  ;;  %v832_v45 = vsel %vm449_vm3, %v830_v43, %v831_v44 }
  0x20   : > { %1134 = vmatprep.subr.bf16.mxu0 %v1265_v1  ;;  %1131 = vmatmul.mubr.msk.bf16.vlgmr.msra.gmra.mxu1 %vm352_vm1, %v1216_v13  ;;  %v774_v41 = vsel %vm333_vm2, %v769_v37, %v773_v38 }
  0x21   : > { %1141 = vmatpush3.bf16.msra.mxu1 %v1218_v15  ;;  %1142 = vmatprep.mubr.msk.bf16.mxu1 %vm1266_vm0, %v1265_v1 }
  0x22   : > { %1152 = vmatprep.subr.bf16.mxu1 %v1265_v1 }
  0x26   : > { %1125 = vmatmul.mubr.msk.bf16.vlgmr.msra.gmra.mxu0 %vm352_vm1, %v452_v25 }
  0x27   : > { %1135 = vmatpush3.bf16.msra.mxu0 %v1217_v26  ;;  %1136 = vmatprep.mubr.msk.bf16.mxu0 %vm1266_vm0, %v1265_v1 }
  0x28   : > { %1146 = vmatprep.subr.bf16.mxu0 %v1265_v1  ;;  %1143 = vmatmul.mubr.msk.bf16.vlgmr.msra.gmra.mxu1 %vm352_vm1, %v642_v30 }
  0x29   : > { %1153 = vmatpush3.bf16.msra.mxu1 %v1221_v31  ;;  %1154 = vmatprep.mubr.msk.bf16.mxu1 %vm1266_vm0, %v1265_v1 }
  0x2e   : > { %1137 = vmatmul.mubr.msk.bf16.vlgmr.msra.gmra.mxu0 %vm352_vm1, %v584_v39 }
  0x2f   : > { %1147 = vmatpush3.bf16.msra.mxu0 %v1220_v40  ;;  %1148 = vmatprep.mubr.msk.bf16.mxu0 %vm1266_vm0, %v1265_v1 }
  0x30   : > { %1158 = vmatprep.subr.bf16.mxu0 %v1265_v1  ;;  %1155 = vmatmul.mubr.msk.bf16.vlgmr.msra.gmra.mxu1 %vm352_vm1, %v774_v41 }
  0x36   : > { %1149 = vmatmul.mubr.msk.bf16.vlgmr.msra.gmra.mxu0 %vm352_vm1, %v1222_v16 }
  0x37   : > { %1159 = vmatpush3.bf16.msra.mxu0 %v1224_v42  ;;  %1160 = vmatprep.mubr.msk.bf16.mxu0 %vm1266_vm0, %v1265_v1 }
  0x3e   : > { %1161 = vmatmul.mubr.msk.bf16.vlgmr.msra.gmra.mxu0 %vm352_vm1, %v832_v45 }
  0xd7   : > { %v439_v46 = vpop.f32.mrf.mxu1 }
  0xd9   : > { %v1120_v47 = vpop.f32.mrf.mxu1 }
  0xdb   : > { %v442_v48 = vpop.f32.mrf.mxu1 }
  0xdd   : > { %v1121_v49 = vpop.f32.mrf.mxu1 }
  0xde   : > { %v390_v50 = vpop.f32.mrf.mxu0 }
  0xdf   : > { %v440_v63 = vadd.f32 %v439_v46, %v390_v50 }
  0xe0   : > { %v1114_v51 = vpop.f32.mrf.mxu0  ;;  %v559_v52 = vpop.f32.mrf.mxu1 }
  0xe2   : > { %v393_v53 = vpop.f32.mrf.mxu0  ;;  %v1132_v54 = vpop.f32.mrf.mxu1 }
  0xe3   : > { %v443_v5 = vadd.f32 %v442_v48, %v393_v53 }
  0xe4   : > { %v1115_v55 = vpop.f32.mrf.mxu0  ;;  %v562_v56 = vpop.f32.mrf.mxu1 }
  0xe6   : > { %v496_v57 = vpop.f32.mrf.mxu0  ;;  %v1133_v58 = vpop.f32.mrf.mxu1 }
  0xe7   : > { %v503_v2 = vadd.f32 %v496_v57, %v440_v63 }
  0xe8   : > { %v1126_v59 = vpop.f32.mrf.mxu0  ;;  %v686_v60 = vpop.f32.mrf.mxu1 }
  0xe9   : > { %v566_v8 = vadd.f32 %v559_v52, %v503_v2 }
  0xea   : > { %v499_v61 = vpop.f32.mrf.mxu0  ;;  %v1144_v62 = vpop.f32.mrf.mxu1 }
  0xeb   : > { %v504_v9 = vadd.f32 %v499_v61, %v443_v5 }
  0xec   : > { %v1127_v0 = vpop.f32.mrf.mxu0  ;;  %v689_v1 = vpop.f32.mrf.mxu1 }
  0xed   : > { %v567_v15 = vadd.f32 %v562_v56, %v504_v9 }
  0xee   : > { %v628_v3 = vpop.f32.mrf.mxu0  ;;  %v1145_v4 = vpop.f32.mrf.mxu1 }
  0xef   : > { %v635_v12 = vadd.f32 %v628_v3, %v566_v8 }
  0xf0   : > { %v1138_v6 = vpop.f32.mrf.mxu0  ;;  %v818_v7 = vpop.f32.mrf.mxu1 }
  0xf1   : > { %v693_v18 = vadd.f32 %v686_v60, %v635_v12 }
  0xf2   : > { %v631_v10 = vpop.f32.mrf.mxu0  ;;  %v1156_v11 = vpop.f32.mrf.mxu1 }
  0xf3   : > { %v636_v19 = vadd.f32 %v631_v10, %v567_v15 }
  0xf4   : > { %v1139_v13 = vpop.f32.mrf.mxu0  ;;  %v821_v14 = vpop.f32.mrf.mxu1 }
  0xf5   : > { %v694_v23 = vadd.f32 %v689_v1, %v636_v19 }
  0xf6   : > { %v749_v16 = vpop.f32.mrf.mxu0  ;;  %v1157_v17 = vpop.f32.mrf.mxu1 }
  0xf7   : > { %v756_v21 = vadd.f32 %v749_v16, %v693_v18 }
  0xf8   : > { %v1150_v20 = vpop.f32.mrf.mxu0 }
  0xf9   : > { %v825_v25 = vadd.f32 %v818_v7, %v756_v21 }
  0xfa   : > { %v752_v22 = vpop.f32.mrf.mxu0 }
  0xfb   : > { %v757_v26 = vadd.f32 %v752_v22, %v694_v23 }
  0xfc   : > { %v1151_v24 = vpop.f32.mrf.mxu0 }
  0xfd   : > { %v826_v30 = vadd.f32 %v821_v14, %v757_v26 }
  0xfe   : > { %v876_v27 = vpop.f32.mrf.mxu0 }
  0xff   : > { %v883_v28 = vadd.f32 %v876_v27, %v825_v25 }
 0x100   : > { %v1162_v29 = vpop.f32.mrf.mxu0 }
 0x101   : > { %v885_v31 = vmax.f32 %v883_v28, 0.0 }
 0x102   : > { %v879_v32 = vpop.f32.mrf.mxu0 }
 0x103   : > { %v1090_v33 = vpack.c.bf16 %v885_v31, %v885_v31  ;;  %v884_v34 = vadd.f32 %v879_v32, %v826_v30 }
 0x104   : > { %v1163_v35 = vpop.f32.mrf.mxu0 }
 0x105   : > { %896 = vst.msk [vmem:[%s315_s30] sm:$0xf] %vm895_vm4, %v1090_v33  ;;  %v886_v36 = vmax.f32 %v884_v34, 0.0 }
 0x107   : > { %v1091_v37 = vpack.c.bf16 %v886_v36, %v886_v36 }
 0x109   : > { %897 = vst.msk [vmem:[%s315_s30 + $0x4] sm:$0xf] %vm895_vm4, %v1091_v37 }
 0x10a PF: > { %s14_s19 = sadd.s32 1, %s1263_s19   ;;  %s1440_s15 = smov %s1255_s17 }
 0x10b   : > { %p11_p10 = scmp.ge.s32.totalorder %s14_s19, 34   ;;  %s1441_s16 = smov %s1259_s18 }
 0x10c   : > { %s1442_s17 = smov %s1445_s20  ;;  %s1443_s18 = smov %s1449_s21 }
 0x10d   :  { %13 = sbr.rel (!%p11_p10) target bundleno = 3 (0x3), region = 80 }

// kernel: aspp_forward.8
= control target key start
LH: loop header
LB: loop body
LE: loop exit
PB: predicated region body
PF: predicated region fallthrough
CT: control target
= control target key end

     0   :  { %s495_s6 = smov 0   ;;  %s497_s7 = smov 0   ;;  %s609_s0 = inlined_call_operand.vmem [shape: bf16[2,256,16], index: 0, kind: input, shape index: {}]   ;;  %s610_s1 = inlined_call_operand.vmem [shape: f32[2,1,16], index: 1, kind: output, shape index: {}]  }
   0x1   :  { %s499_s8 = smov 0  }
   0x2 LB: > { %s23_s9 = sadd.s32 1, %s478_s7  ;;  %p350_p0 = scmp.ge.s32.totalorder %s482_s8, 1  ;;  %s482_s8 = sphi %s499_s8, %s11_s8   ;;  %s478_s7 = sphi %s497_s7, %s612_s7   ;;  %s474_s6 = sphi %s495_s6, %s611_s6  }
   0x3   : > { %p25_p1 = scmp.ge.s32.totalorder %s23_s9, 2  ;;  %p106_p2 = scmp.lt.s32.totalorder %s482_s8, 3 }
   0x5   : > { %s614_s9 = smov (%p25_p1, %s23_s9), 0  ;;  %p107_p3 = pnand %p350_p0, %p106_p2 }
   0x6   : > { %p129_p4 = scmp.lt.s32.totalorder (!%p107_p3), %s474_s6, 1 }
   0x7   : > { %110 = sbr.rel (%p107_p3) target bundleno = 59 (0x3b), region = 24 }
   0xc   : > { %s616_s6 = smov (!%p129_p4, %s474_s6), 1  ;;  %vm145_vm0 = vcmask 122880   ;;  %v484_v0 = vmov -inf   ;;  %vm211_vm1 = vcmask 130048  }
   0xd   : > { %s355_s10 = sshll.u32 %s616_s6, 7  ;;  %s516_s13 = scalar_lea.vmem %s610_s1, %s616_s6 }
   0xe   : > { %s521_s16 = scalar_lea.vmem %s609_s0, %s355_s10  ;;  %146 = vst.msk [vmem:[%s516_s13] sm:$0x1] %vm145_vm0, %v484_v0 }
   0xf   : > { %v357_v1 = vld [vmem:[%s521_s16] sm:$0xff]   ;;  %v420_v2 = vld [vmem:[%s521_s16 + $0x8] sm:$0xff]   ;;  %v421_v3 = vld [vmem:[%s521_s16 + $0x10] sm:$0xff]  }
  0x10   : > { %v358_v4 = vunpack.c.l.bf16 %v357_v1  ;;  %v359_v5 = vunpack.c.h.bf16 %v357_v1  ;;  %v362_v6 = vunpack.c.l.bf16 %v420_v2  ;;  %v363_v7 = vunpack.c.h.bf16 %v420_v2  ;;  %v422_v8 = vld [vmem:[%s521_s16 + $0x18] sm:$0xff]   ;;  %v423_v9 = vld [vmem:[%s521_s16 + $0x20] sm:$0xff]   ;;  %v424_v10 = vld [vmem:[%s521_s16 + $0x28] sm:$0xff]  }
  0x11   : > { %v366_v11 = vunpack.c.l.bf16 %v421_v3  ;;  %v367_v12 = vunpack.c.h.bf16 %v421_v3  ;;  %v370_v13 = vunpack.c.l.bf16 %v422_v8  ;;  %v371_v14 = vunpack.c.h.bf16 %v422_v8  ;;  %v425_v15 = vld [vmem:[%s521_s16 + $0x30] sm:$0xff]   ;;  %v426_v16 = vld [vmem:[%s521_s16 + $0x38] sm:$0xff]   ;;  %v427_v17 = vld [vmem:[%s521_s16 + $0x40] sm:$0xff]  }
  0x12   : > { %v374_v18 = vunpack.c.l.bf16 %v423_v9  ;;  %v375_v19 = vunpack.c.h.bf16 %v423_v9  ;;  %v378_v20 = vunpack.c.l.bf16 %v424_v10  ;;  %v379_v21 = vunpack.c.h.bf16 %v424_v10  ;;  %v428_v22 = vld [vmem:[%s521_s16 + $0x48] sm:$0xff]   ;;  %v536_v23 = vld [vmem:[%s521_s16 + $0x50] sm:$0xff]   ;;  %v539_v24 = vld [vmem:[%s521_s16 + $0x58] sm:$0xff]  }
  0x13   : > { %v382_v25 = vunpack.c.l.bf16 %v425_v15  ;;  %v383_v26 = vunpack.c.h.bf16 %v425_v15  ;;  %v386_v27 = vunpack.c.l.bf16 %v426_v16  ;;  %v387_v28 = vunpack.c.h.bf16 %v426_v16  ;;  %v542_v29 = vld [vmem:[%s521_s16 + $0x60] sm:$0xff]   ;;  %v545_v30 = vld [vmem:[%s521_s16 + $0x68] sm:$0xff]   ;;  %v548_v35 = vld [vmem:[%s521_s16 + $0x70] sm:$0xff]  }
  0x14   : > { %v390_v31 = vunpack.c.l.bf16 %v427_v17  ;;  %v391_v32 = vunpack.c.h.bf16 %v427_v17  ;;  %v394_v33 = vunpack.c.l.bf16 %v428_v22  ;;  %v395_v34 = vunpack.c.h.bf16 %v428_v22  ;;  %v551_v36 = vld [vmem:[%s521_s16 + $0x78] sm:$0xff]  }
  0x15   : > { %v398_v37 = vunpack.c.l.bf16 %v536_v23  ;;  %v399_v38 = vunpack.c.h.bf16 %v536_v23  ;;  %v402_v39 = vunpack.c.l.bf16 %v539_v24  ;;  %v403_v40 = vunpack.c.h.bf16 %v539_v24 }
  0x16   : > { %v406_v41 = vunpack.c.l.bf16 %v542_v29  ;;  %v407_v42 = vunpack.c.h.bf16 %v542_v29  ;;  %v410_v43 = vunpack.c.l.bf16 %v545_v30  ;;  %v411_v44 = vunpack.c.h.bf16 %v545_v30 }
  0x17   : > { %v414_v45 = vunpack.c.l.bf16 %v548_v35  ;;  %v415_v46 = vunpack.c.h.bf16 %v548_v35  ;;  %v418_v47 = vunpack.c.l.bf16 %v551_v36  ;;  %v419_v48 = vunpack.c.h.bf16 %v551_v36 }
  0x18   : > { %v212_v49 = vsel %vm211_vm1, %v358_v4, -inf  ;;  %v213_v50 = vsel %vm211_vm1, %v359_v5, -inf  ;;  %v214_v51 = vsel %vm211_vm1, %v362_v6, -inf  ;;  %v215_v52 = vsel %vm211_vm1, %v363_v7, -inf }
  0x19   : > { %v216_v53 = vsel %vm211_vm1, %v366_v11, -inf  ;;  %v218_v54 = vsel %vm211_vm1, %v367_v12, -inf  ;;  %v220_v55 = vsel %vm211_vm1, %v370_v13, -inf  ;;  %v222_v56 = vsel %vm211_vm1, %v371_v14, -inf }
  0x1a   : > { %v217_v57 = vmax.f32 %v212_v49, %v216_v53  ;;  %v219_v58 = vmax.f32 %v213_v50, %v218_v54  ;;  %v221_v59 = vmax.f32 %v214_v51, %v220_v55  ;;  %v223_v60 = vmax.f32 %v215_v52, %v222_v56  ;;  %v281_v56 = vld [vmem:[%s516_s13] sm:$0x1] }
  0x1b   : > { %v224_v61 = vsel %vm211_vm1, %v374_v18, -inf  ;;  %v226_v62 = vsel %vm211_vm1, %v375_v19, -inf  ;;  %v228_v63 = vsel %vm211_vm1, %v378_v20, -inf  ;;  %v230_v0 = vsel %vm211_vm1, %v379_v21, -inf }
  0x1c   : > { %v225_v1 = vmax.f32 %v217_v57, %v224_v61  ;;  %v227_v2 = vmax.f32 %v219_v58, %v226_v62  ;;  %v229_v3 = vmax.f32 %v221_v59, %v228_v63  ;;  %v231_v4 = vmax.f32 %v223_v60, %v230_v0 }
  0x1d   : > { %v232_v5 = vsel %vm211_vm1, %v382_v25, -inf  ;;  %v234_v6 = vsel %vm211_vm1, %v383_v26, -inf  ;;  %v236_v7 = vsel %vm211_vm1, %v386_v27, -inf  ;;  %v238_v8 = vsel %vm211_vm1, %v387_v28, -inf }
  0x1e   : > { %v233_v9 = vmax.f32 %v225_v1, %v232_v5  ;;  %v235_v10 = vmax.f32 %v227_v2, %v234_v6  ;;  %v237_v11 = vmax.f32 %v229_v3, %v236_v7  ;;  %v239_v12 = vmax.f32 %v231_v4, %v238_v8 }
  0x1f   : > { %v240_v13 = vsel %vm211_vm1, %v390_v31, -inf  ;;  %v242_v14 = vsel %vm211_vm1, %v391_v32, -inf  ;;  %v244_v15 = vsel %vm211_vm1, %v394_v33, -inf  ;;  %v246_v16 = vsel %vm211_vm1, %v395_v34, -inf }
  0x20   : > { %v241_v17 = vmax.f32 %v233_v9, %v240_v13  ;;  %v243_v18 = vmax.f32 %v235_v10, %v242_v14  ;;  %v245_v19 = vmax.f32 %v237_v11, %v244_v15  ;;  %v247_v20 = vmax.f32 %v239_v12, %v246_v16 }
  0x21   : > { %v248_v21 = vsel %vm211_vm1, %v398_v37, -inf  ;;  %v250_v22 = vsel %vm211_vm1, %v399_v38, -inf  ;;  %v252_v23 = vsel %vm211_vm1, %v402_v39, -inf  ;;  %v254_v24 = vsel %vm211_vm1, %v403_v40, -inf }
  0x22   : > { %v249_v25 = vmax.f32 %v241_v17, %v248_v21  ;;  %v251_v26 = vmax.f32 %v243_v18, %v250_v22  ;;  %v253_v27 = vmax.f32 %v245_v19, %v252_v23  ;;  %v255_v28 = vmax.f32 %v247_v20, %v254_v24 }
  0x23   : > { %v256_v29 = vsel %vm211_vm1, %v406_v41, -inf  ;;  %v258_v30 = vsel %vm211_vm1, %v407_v42, -inf  ;;  %v260_v31 = vsel %vm211_vm1, %v410_v43, -inf  ;;  %v262_v32 = vsel %vm211_vm1, %v411_v44, -inf }
  0x24   : > { %v257_v33 = vmax.f32 %v249_v25, %v256_v29  ;;  %v259_v34 = vmax.f32 %v251_v26, %v258_v30  ;;  %v261_v35 = vmax.f32 %v253_v27, %v260_v31  ;;  %v263_v36 = vmax.f32 %v255_v28, %v262_v32 }
  0x25   : > { %v264_v37 = vsel %vm211_vm1, %v414_v45, -inf  ;;  %v266_v38 = vsel %vm211_vm1, %v415_v46, -inf  ;;  %v268_v39 = vsel %vm211_vm1, %v418_v47, -inf  ;;  %v270_v40 = vsel %vm211_vm1, %v419_v48, -inf }
  0x26   : > { %v265_v41 = vmax.f32 %v257_v33, %v264_v37  ;;  %v267_v42 = vmax.f32 %v259_v34, %v266_v38  ;;  %v269_v49 = vmax.f32 %v261_v35, %v268_v39  ;;  %v271_v43 = vmax.f32 %v263_v36, %v270_v40 }
  0x28   : > { %v272_v50 = vmax.f32 %v265_v41, %v267_v42  ;;  %v273_v44 = vmax.f32 %v269_v49, %v271_v43 }
  0x2a   : > { %v274_v51 = vmax.f32 %v272_v50, %v273_v44 }
  0x2c   : > { %v275_v52 = vrot.slane %v274_v51, 4 }
  0x2e   : > { %v276_v53 = vmax.f32 %v274_v51, %v275_v52 }
  0x30   : > { %v277_v54 = vrot.slane %v276_v53, 2 }
  0x32   : > { %v278_v55 = vmax.f32 %v276_v53, %v277_v54 }
  0x34   : > { %v279_v45 = vrot.slane %v278_v55, 1 }
  0x36   : > { %v280_v57 = vmax.f32 %v278_v55, %v279_v45 }
  0x38   : > { %v282_v46 = vmax.f32 %v281_v56, %v280_v57 }
  0x3a   : > { %284 = vst.msk [vmem:[%s516_s13] sm:$0x1] %vm145_vm0, %v282_v46 }
  0x3b PF: > { %s11_s8 = sadd.s32 1, %s482_s8   ;;  %s611_s6 = smov %s478_s7 }
  0x3c   : > { %p8_p5 = scmp.ge.s32.totalorder %s11_s8, 4   ;;  %s612_s7 = smov %s614_s9 }
  0x3e   :  { %10 = sbr.rel (!%p8_p5) target bundleno = 2 (0x2), region = 58 }

// kernel: aspp_forward.9
= control target key start
LH: loop header
LB: loop body
LE: loop exit
PB: predicated region body
PF: predicated region fallthrough
CT: control target
= control target key end

     0   :  { %v183_v0 = vmov 0.0   ;;  %vm184_vm0 = vmmov 0   ;;  %s230_s1 = inlined_call_operand.vmem [shape: bf16[128,128], index: 1, kind: input, shape index: {}]   ;;  %s231_s0 = inlined_call_operand.vmem [shape: bf16[8,128], index: 0, kind: input, shape index: {}]   ;;  %s232_s2 = inlined_call_operand.vmem [shape: bf16[8,128], index: 2, kind: output, shape index: {}]  }
   0x1   :  { %153 = vmatprep.subr.bf16.mxu0 %v183_v0  ;;  %v175_v1 = vld [vmem:[%s230_s1 + $0x38] sm:$0xff]   ;;  %169 = vmatprep.mubr.msk.bf16.mxu0 %vm184_vm0, %v183_v0  ;;  %v176_v2 = vld [vmem:[%s230_s1 + $0x30] sm:$0xff]   ;;  %v177_v3 = vld [vmem:[%s230_s1 + $0x28] sm:$0xff]  }
   0x2   :  { %154 = vmatpush3.bf16.msra.mxu0 %v175_v1  ;;  %v178_v4 = vld [vmem:[%s230_s1 + $0x20] sm:$0xff]   ;;  %v179_v5 = vld [vmem:[%s230_s1 + $0x18] sm:$0xff]   ;;  %v180_v6 = vld [vmem:[%s230_s1 + $0x10] sm:$0xff]  }
   0x3   :  { %155 = vmatprep.subr.bf16.mxu0 %v183_v0  ;;  %v181_v7 = vld [vmem:[%s230_s1 + $0x8] sm:$0xff]   ;;  %v182_v8 = vld [vmem:[%s230_s1] sm:$0xff]  }
   0x4   :  { %v18_v9 = vld [vmem:[%s231_s0] sm:$0xf] }
   0x6   :  { %156 = vmatpush3.bf16.msra.mxu0 %v176_v2 }
   0x7   :  { %157 = vmatprep.subr.bf16.mxu0 %v183_v0 }
   0xa   :  { %158 = vmatpush3.bf16.msra.mxu0 %v177_v3 }
   0xb   :  { %159 = vmatprep.subr.bf16.mxu0 %v183_v0 }
   0xe   :  { %160 = vmatpush3.bf16.msra.mxu0 %v178_v4 }
   0xf   :  { %161 = vmatprep.subr.bf16.mxu0 %v183_v0 }
  0x12   :  { %162 = vmatpush3.bf16.msra.mxu0 %v179_v5 }
  0x13   :  { %163 = vmatprep.subr.bf16.mxu0 %v183_v0 }
  0x16   :  { %164 = vmatpush3.bf16.msra.mxu0 %v180_v6 }
  0x17   :  { %165 = vmatprep.subr.bf16.mxu0 %v183_v0 }
  0x1a   :  { %166 = vmatpush3.bf16.msra.mxu0 %v181_v7 }
  0x1b   :  { %167 = vmatprep.subr.bf16.mxu0 %v183_v0 }
  0x1e   :  { %168 = vmatpush3.bf16.msra.mxu0 %v182_v8 }
  0x21   :  { %170 = vmatmul.mubr.bf16.vlgmr.msra.gmra.mxu0 %v18_v9 }
  0xe1   :  { %v117_v10 = vpop.f32.mrf.mxu0 }
  0xe2   :  { %v129_v11 = vmax.f32 %v117_v10, 0.0 }
  0xe3   :  { %v171_v12 = vpop.f32.mrf.mxu0 }
  0xe4   :  { %v130_v13 = vpack.c.bf16 %v129_v11, %v129_v11 }
  0xe5   :  { %v120_v14 = vpop.f32.mrf.mxu0 }
  0xe6   :  { %131 = vst [vmem:[%s232_s2] sm:$0xf] %v130_v13 }
  0xe7   :  { %v172_v15 = vpop.f32.mrf.mxu0 }

// kernel: aspp_forward.10
= control target key start
LH: loop header
LB: loop body
LE: loop exit
PB: predicated region body
PF: predicated region fallthrough
CT: control target
= control target key end

     0   :  { %s2102_s1 = inlined_call_operand.vmem [shape: bf16[128,128], index: 1, kind: input, shape index: {}]   ;;  %s2103_s0 = inlined_call_operand.vmem [shape: bf16[512,128], index: 0, kind: input, shape index: {}]   ;;  %s2104_s2 = inlined_call_operand.vmem [shape: bf16[512,128], index: 2, kind: output, shape index: {}]  }
   0x1   :  { %v1831_v0 = vld [vmem:[%s2102_s1 + $0x38] sm:$0xff]   ;;  %v1832_v1 = vld [vmem:[%s2102_s1 + $0x30] sm:$0xff]   ;;  %v1833_v2 = vld [vmem:[%s2102_s1 + $0x28] sm:$0xff]  }
   0x2   :  { %1735 = vmatprep.subr.bf16.mxu0 %v1831_v0  ;;  %1815 = vmatprep.subr.bf16.mxu1 %v1831_v0  ;;  %v1834_v3 = vld [vmem:[%s2102_s1 + $0x20] sm:$0xff]   ;;  %v1835_v6 = vld [vmem:[%s2102_s1 + $0x18] sm:$0xff]   ;;  %v1836_v7 = vld [vmem:[%s2102_s1 + $0x10] sm:$0xff]  }
   0x3   :  { %1736 = vmatpush3.bf16.msra.mxu0 %v1831_v0  ;;  %1823 = vmatpush3.bf16.msra.mxu1 %v1831_v0  ;;  %v1839_v4 = vld [vmem:[%s2103_s0] sm:$0xff]   ;;  %v1837_v8 = vld [vmem:[%s2102_s1 + $0x8] sm:$0xff]   ;;  %v1843_v12 = vld [vmem:[%s2103_s0 + $0x10] sm:$0xff]  }
   0x4   :  { %1737 = vmatprep.subr.bf16.mxu0 %v1832_v1  ;;  %1816 = vmatprep.subr.bf16.mxu1 %v1832_v1  ;;  %v1840_v5 = vld [vmem:[%s2103_s0 + $0x80] sm:$0xff]   ;;  %v1841_v10 = vld [vmem:[%s2103_s0 + $0x8] sm:$0xff]   ;;  %v1844_v13 = vld [vmem:[%s2103_s0 + $0x90] sm:$0xff]  }
   0x5   :  { %1751 = vmatprep.mubr.bf16.mxu0 %v1839_v4  ;;  %1783 = vmatprep.mubr.bf16.mxu1 %v1840_v5  ;;  %v1838_v9 = vld [vmem:[%s2102_s1] sm:$0xff]   ;;  %v1842_v11 = vld [vmem:[%s2103_s0 + $0x88] sm:$0xff]   ;;  %v1845_v14 = vld [vmem:[%s2103_s0 + $0x18] sm:$0xff]  }
   0x6   :  { %v1846_v15 = vld [vmem:[%s2103_s0 + $0x98] sm:$0xff]   ;;  %v1847_v16 = vld [vmem:[%s2103_s0 + $0x20] sm:$0xff]   ;;  %v1849_v18 = vld [vmem:[%s2103_s0 + $0x28] sm:$0xff]  }
   0x7   :  { %1738 = vmatpush3.bf16.msra.mxu0 %v1832_v1  ;;  %1824 = vmatpush3.bf16.msra.mxu1 %v1832_v1  ;;  %v1848_v17 = vld [vmem:[%s2103_s0 + $0xa0] sm:$0xff]   ;;  %v1850_v19 = vld [vmem:[%s2103_s0 + $0xa8] sm:$0xff]   ;;  %v1851_v20 = vld [vmem:[%s2103_s0 + $0x30] sm:$0xff]  }
   0x8   :  { %1739 = vmatprep.subr.bf16.mxu0 %v1833_v2  ;;  %1817 = vmatprep.subr.bf16.mxu1 %v1833_v2  ;;  %v1852_v21 = vld [vmem:[%s2103_s0 + $0xb0] sm:$0xff]   ;;  %v1853_v22 = vld [vmem:[%s2103_s0 + $0x38] sm:$0xff]   ;;  %v1855_v24 = vld [vmem:[%s2103_s0 + $0x40] sm:$0xff]  }
   0x9   :  { %v1854_v23 = vld [vmem:[%s2103_s0 + $0xb8] sm:$0xff]   ;;  %v1856_v25 = vld [vmem:[%s2103_s0 + $0xc0] sm:$0xff]   ;;  %v1857_v26 = vld [vmem:[%s2103_s0 + $0x48] sm:$0xff]  }
   0xa   :  { %v1858_v27 = vld [vmem:[%s2103_s0 + $0xc8] sm:$0xff]   ;;  %v1859_v28 = vld [vmem:[%s2103_s0 + $0x50] sm:$0xff]   ;;  %v1861_v30 = vld [vmem:[%s2103_s0 + $0x58] sm:$0xff]  }
   0xb   :  { %1740 = vmatpush3.bf16.msra.mxu0 %v1833_v2  ;;  %1825 = vmatpush3.bf16.msra.mxu1 %v1833_v2  ;;  %v1860_v29 = vld [vmem:[%s2103_s0 + $0xd0] sm:$0xff]   ;;  %v1862_v31 = vld [vmem:[%s2103_s0 + $0xd8] sm:$0xff]   ;;  %v1863_v32 = vld [vmem:[%s2103_s0 + $0x60] sm:$0xff]  }
   0xc   :  { %1741 = vmatprep.subr.bf16.mxu0 %v1834_v3  ;;  %1818 = vmatprep.subr.bf16.mxu1 %v1834_v3  ;;  %v1864_v33 = vld [vmem:[%s2103_s0 + $0xe0] sm:$0xff]   ;;  %v1865_v34 = vld [vmem:[%s2103_s0 + $0x68] sm:$0xff]   ;;  %v1867_v36 = vld [vmem:[%s2103_s0 + $0x70] sm:$0xff]  }
   0xd   :  { %v1866_v35 = vld [vmem:[%s2103_s0 + $0xe8] sm:$0xff]   ;;  %v1868_v37 = vld [vmem:[%s2103_s0 + $0xf0] sm:$0xff]   ;;  %v1869_v38 = vld [vmem:[%s2103_s0 + $0x78] sm:$0xff]  }
   0xe   :  { %v1870_v39 = vld [vmem:[%s2103_s0 + $0xf8] sm:$0xff]  }
   0xf   :  { %1742 = vmatpush3.bf16.msra.mxu0 %v1834_v3  ;;  %1826 = vmatpush3.bf16.msra.mxu1 %v1834_v3 }
  0x10   :  { %1743 = vmatprep.subr.bf16.mxu0 %v1835_v6  ;;  %1819 = vmatprep.subr.bf16.mxu1 %v1835_v6 }
  0x13   :  { %1744 = vmatpush3.bf16.msra.mxu0 %v1835_v6  ;;  %1827 = vmatpush3.bf16.msra.mxu1 %v1835_v6 }
  0x14   :  { %1745 = vmatprep.subr.bf16.mxu0 %v1836_v7  ;;  %1820 = vmatprep.subr.bf16.mxu1 %v1836_v7 }
  0x17   :  { %1746 = vmatpush3.bf16.msra.mxu0 %v1836_v7  ;;  %1828 = vmatpush3.bf16.msra.mxu1 %v1836_v7 }
  0x18   :  { %1747 = vmatprep.subr.bf16.mxu0 %v1837_v8  ;;  %1821 = vmatprep.subr.bf16.mxu1 %v1837_v8 }
  0x1b   :  { %1748 = vmatpush3.bf16.msra.mxu0 %v1837_v8  ;;  %1829 = vmatpush3.bf16.msra.mxu1 %v1837_v8 }
  0x1c   :  { %1749 = vmatprep.subr.bf16.mxu0 %v1838_v9  ;;  %1822 = vmatprep.subr.bf16.mxu1 %v1838_v9 }
  0x1f   :  { %1750 = vmatpush3.bf16.msra.mxu0 %v1838_v9  ;;  %1830 = vmatpush3.bf16.msra.mxu1 %v1838_v9 }
  0x22   :  { %1752 = vmatmul.mubr.bf16.vlgmr.msra.gmra.mxu0 %v1841_v10  ;;  %1784 = vmatmul.mubr.bf16.vlgmr.msra.gmra.mxu1 %v1842_v11 }
  0x23   :  { %1755 = vmatprep.mubr.bf16.mxu0 %v1843_v12  ;;  %1787 = vmatprep.mubr.bf16.mxu1 %v1844_v13 }
  0x2a   :  { %1756 = vmatmul.mubr.bf16.gmra.mxu0 %v1845_v14  ;;  %1788 = vmatmul.mubr.bf16.gmra.mxu1 %v1846_v15 }
  0x2b   :  { %1759 = vmatprep.mubr.bf16.mxu0 %v1847_v16  ;;  %1791 = vmatprep.mubr.bf16.mxu1 %v1848_v17 }
  0x32   :  { %1760 = vmatmul.mubr.bf16.gmra.mxu0 %v1849_v18  ;;  %1792 = vmatmul.mubr.bf16.gmra.mxu1 %v1850_v19 }
  0x33   :  { %1763 = vmatprep.mubr.bf16.mxu0 %v1851_v20  ;;  %1795 = vmatprep.mubr.bf16.mxu1 %v1852_v21 }
  0x3a   :  { %1764 = vmatmul.mubr.bf16.gmra.mxu0 %v1853_v22  ;;  %1796 = vmatmul.mubr.bf16.gmra.mxu1 %v1854_v23 }
  0x3b   :  { %1767 = vmatprep.mubr.bf16.mxu0 %v1855_v24  ;;  %1799 = vmatprep.mubr.bf16.mxu1 %v1856_v25 }
  0x42   :  { %1768 = vmatmul.mubr.bf16.gmra.mxu0 %v1857_v26  ;;  %1800 = vmatmul.mubr.bf16.gmra.mxu1 %v1858_v27 }
  0x43   :  { %1771 = vmatprep.mubr.bf16.mxu0 %v1859_v28  ;;  %1803 = vmatprep.mubr.bf16.mxu1 %v1860_v29 }
  0x4a   :  { %1772 = vmatmul.mubr.bf16.gmra.mxu0 %v1861_v30  ;;  %1804 = vmatmul.mubr.bf16.gmra.mxu1 %v1862_v31 }
  0x4b   :  { %1775 = vmatprep.mubr.bf16.mxu0 %v1863_v32  ;;  %1807 = vmatprep.mubr.bf16.mxu1 %v1864_v33 }
  0x52   :  { %1776 = vmatmul.mubr.bf16.gmra.mxu0 %v1865_v34  ;;  %1808 = vmatmul.mubr.bf16.gmra.mxu1 %v1866_v35 }
  0x53   :  { %1779 = vmatprep.mubr.bf16.mxu0 %v1867_v36  ;;  %1811 = vmatprep.mubr.bf16.mxu1 %v1868_v37 }
  0x5a   :  { %1780 = vmatmul.mubr.bf16.gmra.mxu0 %v1869_v38  ;;  %1812 = vmatmul.mubr.bf16.gmra.mxu1 %v1870_v39 }
  0xe2   :  { %v1753_v40 = vpop.f32.mrf.mxu0  ;;  %v1785_v41 = vpop.f32.mrf.mxu1 }
  0xe3   :  { %v950_v46 = vmax.f32 %v1753_v40, 0.0  ;;  %v982_v47 = vmax.f32 %v1785_v41, 0.0 }
  0xe4   :  { %v498_v42 = vpop.f32.mrf.mxu0  ;;  %v626_v43 = vpop.f32.mrf.mxu1 }
  0xe5   :  { %v948_v50 = vmax.f32 %v498_v42, 0.0  ;;  %v980_v51 = vmax.f32 %v626_v43, 0.0 }
  0xe6   :  { %v1754_v44 = vpop.f32.mrf.mxu0  ;;  %v1786_v45 = vpop.f32.mrf.mxu1 }
  0xe7   :  { %v951_v48 = vmax.f32 %v1754_v44, 0.0  ;;  %v983_v49 = vmax.f32 %v1786_v45, 0.0 }
  0xe8   :  { %v501_v52 = vpop.f32.mrf.mxu0  ;;  %v629_v53 = vpop.f32.mrf.mxu1 }
  0xe9   :  { %v1512_v54 = vpack.c.bf16 %v951_v48, %v950_v46  ;;  %v1592_v55 = vpack.c.bf16 %v983_v49, %v982_v47  ;;  %v949_v56 = vmax.f32 %v501_v52, 0.0  ;;  %v981_v57 = vmax.f32 %v629_v53, 0.0 }
  0xea   :  { %v1757_v58 = vpop.f32.mrf.mxu0  ;;  %v1789_v59 = vpop.f32.mrf.mxu1 }
  0xeb   :  { %1664 = vst [vmem:[%s2104_s2 + $0x8] sm:$0xff] %v1512_v54   ;;  %1680 = vst [vmem:[%s2104_s2 + $0x88] sm:$0xff] %v1592_v55   ;;  %v1507_v60 = vpack.c.bf16 %v949_v56, %v948_v50  ;;  %v1587_v61 = vpack.c.bf16 %v981_v57, %v980_v51  ;;  %v954_v2 = vmax.f32 %v1757_v58, 0.0  ;;  %v986_v3 = vmax.f32 %v1789_v59, 0.0 }
  0xec   :  { %v514_v62 = vpop.f32.mrf.mxu0  ;;  %v642_v63 = vpop.f32.mrf.mxu1 }
  0xed   :  { %1508 = vst [vmem:[%s2104_s2] sm:$0xff] %v1507_v60   ;;  %1679 = vst [vmem:[%s2104_s2 + $0x80] sm:$0xff] %v1587_v61   ;;  %v952_v6 = vmax.f32 %v514_v62, 0.0  ;;  %v984_v7 = vmax.f32 %v642_v63, 0.0 }
  0xee   :  { %v1758_v0 = vpop.f32.mrf.mxu0  ;;  %v1790_v1 = vpop.f32.mrf.mxu1 }
  0xef   :  { %v955_v4 = vmax.f32 %v1758_v0, 0.0  ;;  %v987_v5 = vmax.f32 %v1790_v1, 0.0 }
  0xf0   :  { %v517_v8 = vpop.f32.mrf.mxu0  ;;  %v645_v9 = vpop.f32.mrf.mxu1 }
  0xf1   :  { %v1522_v10 = vpack.c.bf16 %v955_v4, %v954_v2  ;;  %v1602_v11 = vpack.c.bf16 %v987_v5, %v986_v3  ;;  %v953_v12 = vmax.f32 %v517_v8, 0.0  ;;  %v985_v13 = vmax.f32 %v645_v9, 0.0 }
  0xf2   :  { %v1761_v14 = vpop.f32.mrf.mxu0  ;;  %v1793_v15 = vpop.f32.mrf.mxu1 }
  0xf3   :  { %1666 = vst [vmem:[%s2104_s2 + $0x18] sm:$0xff] %v1522_v10   ;;  %1682 = vst [vmem:[%s2104_s2 + $0x98] sm:$0xff] %v1602_v11   ;;  %v1517_v16 = vpack.c.bf16 %v953_v12, %v952_v6  ;;  %v1597_v17 = vpack.c.bf16 %v985_v13, %v984_v7  ;;  %v958_v22 = vmax.f32 %v1761_v14, 0.0  ;;  %v990_v23 = vmax.f32 %v1793_v15, 0.0 }
  0xf4   :  { %v530_v18 = vpop.f32.mrf.mxu0  ;;  %v658_v19 = vpop.f32.mrf.mxu1 }
  0xf5   :  { %1665 = vst [vmem:[%s2104_s2 + $0x10] sm:$0xff] %v1517_v16   ;;  %1681 = vst [vmem:[%s2104_s2 + $0x90] sm:$0xff] %v1597_v17   ;;  %v956_v26 = vmax.f32 %v530_v18, 0.0  ;;  %v988_v27 = vmax.f32 %v658_v19, 0.0 }
  0xf6   :  { %v1762_v20 = vpop.f32.mrf.mxu0  ;;  %v1794_v21 = vpop.f32.mrf.mxu1 }
  0xf7   :  { %v959_v24 = vmax.f32 %v1762_v20, 0.0  ;;  %v991_v25 = vmax.f32 %v1794_v21, 0.0 }
  0xf8   :  { %v533_v28 = vpop.f32.mrf.mxu0  ;;  %v661_v29 = vpop.f32.mrf.mxu1 }
  0xf9   :  { %v1532_v30 = vpack.c.bf16 %v959_v24, %v958_v22  ;;  %v1612_v31 = vpack.c.bf16 %v991_v25, %v990_v23  ;;  %v957_v32 = vmax.f32 %v533_v28, 0.0  ;;  %v989_v33 = vmax.f32 %v661_v29, 0.0 }
  0xfa   :  { %v1765_v34 = vpop.f32.mrf.mxu0  ;;  %v1797_v35 = vpop.f32.mrf.mxu1 }
  0xfb   :  { %1668 = vst [vmem:[%s2104_s2 + $0x28] sm:$0xff] %v1532_v30   ;;  %1684 = vst [vmem:[%s2104_s2 + $0xa8] sm:$0xff] %v1612_v31   ;;  %v1527_v36 = vpack.c.bf16 %v957_v32, %v956_v26  ;;  %v1607_v37 = vpack.c.bf16 %v989_v33, %v988_v27  ;;  %v962_v42 = vmax.f32 %v1765_v34, 0.0  ;;  %v994_v43 = vmax.f32 %v1797_v35, 0.0 }
  0xfc   :  { %v546_v38 = vpop.f32.mrf.mxu0  ;;  %v674_v39 = vpop.f32.mrf.mxu1 }
  0xfd   :  { %1667 = vst [vmem:[%s2104_s2 + $0x20] sm:$0xff] %v1527_v36   ;;  %1683 = vst [vmem:[%s2104_s2 + $0xa0] sm:$0xff] %v1607_v37   ;;  %v960_v46 = vmax.f32 %v546_v38, 0.0  ;;  %v992_v47 = vmax.f32 %v674_v39, 0.0 }
  0xfe   :  { %v1766_v40 = vpop.f32.mrf.mxu0  ;;  %v1798_v41 = vpop.f32.mrf.mxu1 }
  0xff   :  { %v963_v44 = vmax.f32 %v1766_v40, 0.0  ;;  %v995_v45 = vmax.f32 %v1798_v41, 0.0 }
 0x100   :  { %v549_v48 = vpop.f32.mrf.mxu0  ;;  %v677_v49 = vpop.f32.mrf.mxu1 }
 0x101   :  { %v1542_v50 = vpack.c.bf16 %v963_v44, %v962_v42  ;;  %v1622_v51 = vpack.c.bf16 %v995_v45, %v994_v43  ;;  %v961_v52 = vmax.f32 %v549_v48, 0.0  ;;  %v993_v53 = vmax.f32 %v677_v49, 0.0 }
 0x102   :  { %v1769_v54 = vpop.f32.mrf.mxu0  ;;  %v1801_v55 = vpop.f32.mrf.mxu1 }
 0x103   :  { %1670 = vst [vmem:[%s2104_s2 + $0x38] sm:$0xff] %v1542_v50   ;;  %1686 = vst [vmem:[%s2104_s2 + $0xb8] sm:$0xff] %v1622_v51   ;;  %v1537_v56 = vpack.c.bf16 %v961_v52, %v960_v46  ;;  %v1617_v57 = vpack.c.bf16 %v993_v53, %v992_v47  ;;  %v966_v62 = vmax.f32 %v1769_v54, 0.0  ;;  %v998_v63 = vmax.f32 %v1801_v55, 0.0 }
 0x104   :  { %v562_v58 = vpop.f32.mrf.mxu0  ;;  %v690_v59 = vpop.f32.mrf.mxu1 }
 0x105   :  { %1669 = vst [vmem:[%s2104_s2 + $0x30] sm:$0xff] %v1537_v56   ;;  %1685 = vst [vmem:[%s2104_s2 + $0xb0] sm:$0xff] %v1617_v57   ;;  %v964_v2 = vmax.f32 %v562_v58, 0.0  ;;  %v996_v3 = vmax.f32 %v690_v59, 0.0 }
 0x106   :  { %v1770_v60 = vpop.f32.mrf.mxu0  ;;  %v1802_v61 = vpop.f32.mrf.mxu1 }
 0x107   :  { %v967_v0 = vmax.f32 %v1770_v60, 0.0  ;;  %v999_v1 = vmax.f32 %v1802_v61, 0.0 }
 0x108   :  { %v565_v4 = vpop.f32.mrf.mxu0  ;;  %v693_v5 = vpop.f32.mrf.mxu1 }
 0x109   :  { %v1552_v6 = vpack.c.bf16 %v967_v0, %v966_v62  ;;  %v1632_v7 = vpack.c.bf16 %v999_v1, %v998_v63  ;;  %v965_v8 = vmax.f32 %v565_v4, 0.0  ;;  %v997_v9 = vmax.f32 %v693_v5, 0.0 }
 0x10a   :  { %v1773_v10 = vpop.f32.mrf.mxu0  ;;  %v1805_v11 = vpop.f32.mrf.mxu1 }
 0x10b   :  { %1672 = vst [vmem:[%s2104_s2 + $0x48] sm:$0xff] %v1552_v6   ;;  %1688 = vst [vmem:[%s2104_s2 + $0xc8] sm:$0xff] %v1632_v7   ;;  %v1547_v12 = vpack.c.bf16 %v965_v8, %v964_v2  ;;  %v1627_v13 = vpack.c.bf16 %v997_v9, %v996_v3  ;;  %v970_v18 = vmax.f32 %v1773_v10, 0.0  ;;  %v1002_v19 = vmax.f32 %v1805_v11, 0.0 }
 0x10c   :  { %v578_v14 = vpop.f32.mrf.mxu0  ;;  %v706_v15 = vpop.f32.mrf.mxu1 }
 0x10d   :  { %1671 = vst [vmem:[%s2104_s2 + $0x40] sm:$0xff] %v1547_v12   ;;  %1687 = vst [vmem:[%s2104_s2 + $0xc0] sm:$0xff] %v1627_v13   ;;  %v968_v22 = vmax.f32 %v578_v14, 0.0  ;;  %v1000_v23 = vmax.f32 %v706_v15, 0.0 }
 0x10e   :  { %v1774_v16 = vpop.f32.mrf.mxu0  ;;  %v1806_v17 = vpop.f32.mrf.mxu1 }
 0x10f   :  { %v971_v20 = vmax.f32 %v1774_v16, 0.0  ;;  %v1003_v21 = vmax.f32 %v1806_v17, 0.0 }
 0x110   :  { %v581_v24 = vpop.f32.mrf.mxu0  ;;  %v709_v25 = vpop.f32.mrf.mxu1 }
 0x111   :  { %v1562_v26 = vpack.c.bf16 %v971_v20, %v970_v18  ;;  %v1642_v27 = vpack.c.bf16 %v1003_v21, %v1002_v19  ;;  %v969_v28 = vmax.f32 %v581_v24, 0.0  ;;  %v1001_v29 = vmax.f32 %v709_v25, 0.0 }
 0x112   :  { %v1777_v30 = vpop.f32.mrf.mxu0  ;;  %v1809_v31 = vpop.f32.mrf.mxu1 }
 0x113   :  { %1674 = vst [vmem:[%s2104_s2 + $0x58] sm:$0xff] %v1562_v26   ;;  %1690 = vst [vmem:[%s2104_s2 + $0xd8] sm:$0xff] %v1642_v27   ;;  %v1557_v32 = vpack.c.bf16 %v969_v28, %v968_v22  ;;  %v1637_v33 = vpack.c.bf16 %v1001_v29, %v1000_v23  ;;  %v974_v38 = vmax.f32 %v1777_v30, 0.0  ;;  %v1006_v39 = vmax.f32 %v1809_v31, 0.0 }
 0x114   :  { %v594_v34 = vpop.f32.mrf.mxu0  ;;  %v722_v35 = vpop.f32.mrf.mxu1 }
 0x115   :  { %1673 = vst [vmem:[%s2104_s2 + $0x50] sm:$0xff] %v1557_v32   ;;  %1689 = vst [vmem:[%s2104_s2 + $0xd0] sm:$0xff] %v1637_v33   ;;  %v972_v42 = vmax.f32 %v594_v34, 0.0  ;;  %v1004_v43 = vmax.f32 %v722_v35, 0.0 }
 0x116   :  { %v1778_v36 = vpop.f32.mrf.mxu0  ;;  %v1810_v37 = vpop.f32.mrf.mxu1 }
 0x117   :  { %v975_v40 = vmax.f32 %v1778_v36, 0.0  ;;  %v1007_v41 = vmax.f32 %v1810_v37, 0.0 }
 0x118   :  { %v597_v44 = vpop.f32.mrf.mxu0  ;;  %v725_v45 = vpop.f32.mrf.mxu1 }
 0x119   :  { %v1572_v46 = vpack.c.bf16 %v975_v40, %v974_v38  ;;  %v1652_v47 = vpack.c.bf16 %v1007_v41, %v1006_v39  ;;  %v973_v48 = vmax.f32 %v597_v44, 0.0  ;;  %v1005_v49 = vmax.f32 %v725_v45, 0.0 }
 0x11a   :  { %v1781_v50 = vpop.f32.mrf.mxu0  ;;  %v1813_v51 = vpop.f32.mrf.mxu1 }
 0x11b   :  { %1676 = vst [vmem:[%s2104_s2 + $0x68] sm:$0xff] %v1572_v46   ;;  %1692 = vst [vmem:[%s2104_s2 + $0xe8] sm:$0xff] %v1652_v47   ;;  %v1567_v52 = vpack.c.bf16 %v973_v48, %v972_v42  ;;  %v1647_v53 = vpack.c.bf16 %v1005_v49, %v1004_v43  ;;  %v978_v58 = vmax.f32 %v1781_v50, 0.0  ;;  %v1010_v59 = vmax.f32 %v1813_v51, 0.0 }
 0x11c   :  { %v610_v54 = vpop.f32.mrf.mxu0  ;;  %v738_v55 = vpop.f32.mrf.mxu1 }
 0x11d   :  { %1675 = vst [vmem:[%s2104_s2 + $0x60] sm:$0xff] %v1567_v52   ;;  %1691 = vst [vmem:[%s2104_s2 + $0xe0] sm:$0xff] %v1647_v53   ;;  %v976_v62 = vmax.f32 %v610_v54, 0.0  ;;  %v1008_v63 = vmax.f32 %v738_v55, 0.0 }
 0x11e   :  { %v1782_v56 = vpop.f32.mrf.mxu0  ;;  %v1814_v57 = vpop.f32.mrf.mxu1 }
 0x11f   :  { %v979_v60 = vmax.f32 %v1782_v56, 0.0  ;;  %v1011_v61 = vmax.f32 %v1814_v57, 0.0 }
 0x120   :  { %v613_v0 = vpop.f32.mrf.mxu0  ;;  %v741_v1 = vpop.f32.mrf.mxu1 }
 0x121   :  { %v1582_v2 = vpack.c.bf16 %v979_v60, %v978_v58  ;;  %v1662_v3 = vpack.c.bf16 %v1011_v61, %v1010_v59  ;;  %v977_v4 = vmax.f32 %v613_v0, 0.0  ;;  %v1009_v5 = vmax.f32 %v741_v1, 0.0 }
 0x123   :  { %1678 = vst [vmem:[%s2104_s2 + $0x78] sm:$0xff] %v1582_v2   ;;  %1694 = vst [vmem:[%s2104_s2 + $0xf8] sm:$0xff] %v1662_v3   ;;  %v1577_v6 = vpack.c.bf16 %v977_v4, %v976_v62  ;;  %v1657_v7 = vpack.c.bf16 %v1009_v5, %v1008_v63 }
 0x125   :  { %1677 = vst [vmem:[%s2104_s2 + $0x70] sm:$0xff] %v1577_v6   ;;  %1693 = vst [vmem:[%s2104_s2 + $0xf0] sm:$0xff] %v1657_v7  }

// kernel: aspp_forward.15
= control target key start
LH: loop header
LB: loop body
LE: loop exit
PB: predicated region body
PF: predicated region fallthrough
CT: control target
= control target key end

     0   :  { %s3187_s24 = smov 0   ;;  %s3189_s25 = smov 0   ;;  %s3836_s0 = inlined_call_operand.vmem [shape: bf16[2,1,8], index: 0, kind: input, shape index: {}]   ;;  %s3837_s1 = inlined_call_operand.vmem [shape: bf16[6,8,8], index: 1, kind: input, shape index: {}]   ;;  %s3838_s2 = inlined_call_operand.vmem [shape: bf16[2,256,8], index: 2, kind: input, shape index: {}]   ;;  %s3839_s3 = inlined_call_operand.vmem [shape: bf16[2,256,8], index: 3, kind: input, shape index: {}]   ;;  %s3840_s4 = inlined_call_operand.vmem [shape: bf16[2,256,8], index: 4, kind: input, shape index: {}]   ;;  %s3841_s5 = inlined_call_operand.vmem [shape: bf16[2,256,8], index: 5, kind: input, shape index: {}]   ;;  %s3842_s6 = inlined_call_operand.vmem [shape: bf16[2,256,8], index: 6, kind: input, shape index: {}]   ;;  %s3843_s7 = inlined_call_operand.vmem [shape: f32[2,256,8], index: 7, kind: output, shape index: {}]  }
   0x1   :  { %s3191_s26 = smov 0  }
   0x2 LB: > { %s29_s27 = sadd.s32 1, %s3139_s25  ;;  %p2557_p0 = scmp.ge.s32.totalorder %s3143_s26, 1  ;;  %s3143_s26 = sphi %s3191_s26, %s17_s26   ;;  %s3139_s25 = sphi %s3189_s25, %s3935_s25   ;;  %s3135_s24 = sphi %s3187_s24, %s3934_s24  }
   0x3   : > { %p31_p1 = scmp.ge.s32.totalorder %s29_s27, 2  ;;  %p334_p2 = scmp.lt.s32.totalorder %s3143_s26, 3 }
   0x5   : > { %s3937_s27 = smov (%p31_p1, %s29_s27), 0  ;;  %p335_p3 = pnand %p2557_p0, %p334_p2 }
   0x7   : > { %338 = sbr.rel (%p335_p3) target bundleno = 383 (0x17f), region = 48 }
   0xc   : > { %v478_v0 = vld [vmem:[%s3837_s1] sm:$0xf]  ;;  %vm483_vm0 = vcmask 1043456   ;;  %p413_p4 = scmp.lt.s32.totalorder %s3135_s24, 1  ;;  %v3145_v1 = vmov 0.0   ;;  %vm3146_vm1 = vmmov 0  }
   0xd   : > { %2831 = vmatprep.subr.bf16.mxu0 %v3145_v1  ;;  %v485_v2 = vsel %vm483_vm0, %v478_v0, 0  ;;  %2833 = vmatprep.mubr.msk.bf16.mxu0 %vm3146_vm1, %v3145_v1  ;;  %v2571_v3 = vld [vmem:[%s3837_s1 + $0x4] sm:$0xf]  ;;  %v2637_v4 = vld [vmem:[%s3837_s1 + $0xc] sm:$0xf]  ;;  %vm479_vm2 = vcmask 64512  }
   0xe   : > { %2832 = vmatpush3.bf16.msra.mxu0 %v485_v2  ;;  %3010 = vmatprep.subr.msk.bf16.mxu1 %vm483_vm0, %v2571_v3  ;;  %s3939_s24 = smov (!%p413_p4, %s3135_s24), 1  ;;  %v694_v5 = vsel %vm483_vm0, %v2571_v3, 0  ;;  %v2604_v7 = vld [vmem:[%s3837_s1 + $0x8] sm:$0xf]  ;;  %v2703_v9 = vld [vmem:[%s3837_s1 + $0x14] sm:$0xf] }
   0xf   : > { %3008 = vmatpush3.bf16.msra.mxu1 %v694_v5  ;;  %3009 = vmatprep.subr.msk.bf16.mxu0 %vm483_vm0, %v2571_v3  ;;  %s415_s13 = scalar_lea.vmem %s3836_s0, %s3939_s24  ;;  %s3225_s14 = sshll.u32 %s3939_s24, 7  ;;  %v1410_v11 = vsel %vm483_vm0, %v2637_v4, 0  ;;  %v2670_v15 = vld [vmem:[%s3837_s1 + $0x10] sm:$0xf]  ;;  %v1052_v17 = vsel %vm483_vm0, %v2604_v7, 0  ;;  %v2126_v37 = vsel %vm483_vm0, %v2703_v9, 0 }
  0x10   : > { %3012 = vmatprep.subr.msk.bf16.mxu1 %vm483_vm0, %v2637_v4  ;;  %s3232_s17 = scalar_lea.vmem %s3838_s2, %s3225_s14  ;;  %v477_v6 = vld [vmem:[%s415_s13] sm:$0x1]  ;;  %s3270_s30 = scalar_lea.vmem %s3839_s3, %s3225_s14  ;;  %v1768_v30 = vsel %vm483_vm0, %v2670_v15, 0 }
  0x11   : > { %2834 = vmatmul.mubr.msk.bf16.vlgmr.msra.gmra.mxu0 %vm479_vm2, %v477_v6  ;;  %v3041_v8 = vld [vmem:[%s3232_s17 + $0x30] sm:$0xff]   ;;  %v3042_v10 = vld [vmem:[%s3232_s17 + $0x38] sm:$0xff]   ;;  %v3043_v12 = vld [vmem:[%s3232_s17] sm:$0xff]   ;;  %s3281_s10 = scalar_lea.vmem %s3840_s4, %s3225_s14  ;;  %s3316_s13 = scalar_lea.vmem %s3841_s5, %s3225_s14 }
  0x12   : > { %2838 = vmatpush3.bf16.msra.mxu0 %v694_v5  ;;  %2851 = vmatprep.mubr.msk.bf16.mxu1 %vm479_vm2, %v3041_v8  ;;  %v3044_v13 = vld [vmem:[%s3232_s17 + $0x8] sm:$0xff]   ;;  %v3045_v14 = vld [vmem:[%s3232_s17 + $0x40] sm:$0xff]   ;;  %v3047_v16 = vld [vmem:[%s3232_s17 + $0x10] sm:$0xff]  }
  0x13   : > { %3011 = vmatprep.subr.msk.bf16.mxu0 %vm483_vm0, %v2604_v7  ;;  %2852 = vmatmul.mubr.msk.bf16.vlgmr.msra.gmra.mxu1 %vm479_vm2, %v3042_v10  ;;  %v3046_v18 = vld [vmem:[%s3232_s17 + $0x48] sm:$0xff]   ;;  %v3049_v19 = vld [vmem:[%s3232_s17 + $0x50] sm:$0xff]   ;;  %v3048_v20 = vld [vmem:[%s3232_s17 + $0x18] sm:$0xff]  }
  0x14   : > { %2906 = vmatpush3.bf16.msra.mxu1 %v1410_v11  ;;  %2839 = vmatprep.mubr.msk.bf16.mxu0 %vm479_vm2, %v3043_v12  ;;  %v3051_v21 = vld [vmem:[%s3232_s17 + $0x20] sm:$0xff]   ;;  %v3050_v22 = vld [vmem:[%s3232_s17 + $0x58] sm:$0xff]   ;;  %v3052_v24 = vld [vmem:[%s3232_s17 + $0x28] sm:$0xff]  }
  0x15   : > { %3014 = vmatprep.subr.msk.bf16.mxu1 %vm483_vm0, %v2703_v9  ;;  %2855 = vmatprep.mubr.msk.bf16.mxu1 %vm479_vm2, %v3045_v14  ;;  %v3053_v23 = vld [vmem:[%s3232_s17 + $0x60] sm:$0xff]   ;;  %v3054_v26 = vld [vmem:[%s3232_s17 + $0x68] sm:$0xff]   ;;  %v3057_v27 = vld [vmem:[%s3232_s17 + $0x70] sm:$0xff]  }
  0x16   : > { %v3055_v25 = vld [vmem:[%s3270_s30] sm:$0xff]   ;;  %v3056_v28 = vld [vmem:[%s3270_s30 + $0x8] sm:$0xff]   ;;  %v3059_v29 = vld [vmem:[%s3270_s30 + $0x10] sm:$0xff]  }
  0x17   : > { %v3058_v31 = vld [vmem:[%s3232_s17 + $0x78] sm:$0xff]   ;;  %v3061_v32 = vld [vmem:[%s3281_s10] sm:$0xff]   ;;  %v3062_v35 = vld [vmem:[%s3281_s10 + $0x8] sm:$0xff]   ;;  %s3327_s17 = scalar_lea.vmem %s3842_s6, %s3225_s14  ;;  %s2743_s14 = sshll.u32 %s3939_s24, 8 }
  0x18   : > { %v3060_v33 = vld [vmem:[%s3270_s30 + $0x18] sm:$0xff]   ;;  %v3063_v34 = vld [vmem:[%s3270_s30 + $0x20] sm:$0xff]   ;;  %v3065_v36 = vld [vmem:[%s3281_s10 + $0x10] sm:$0xff]   ;;  %s3676_s24 = scalar_lea.vmem %s3843_s7, %s2743_s14 }
  0x19   : > { %2840 = vmatmul.mubr.msk.bf16.vlgmr.msra.gmra.mxu0 %vm479_vm2, %v3044_v13  ;;  %v3064_v38 = vld [vmem:[%s3270_s30 + $0x28] sm:$0xff]   ;;  %v3067_v39 = vld [vmem:[%s3270_s30 + $0x30] sm:$0xff]   ;;  %v3066_v40 = vld [vmem:[%s3281_s10 + $0x18] sm:$0xff]  }
  0x1a   : > { %2843 = vmatprep.mubr.msk.bf16.mxu0 %vm479_vm2, %v3047_v16  ;;  %2872 = vmatpush3.bf16.msra.mxu0 %v1052_v17  ;;  %v3069_v41 = vld [vmem:[%s3281_s10 + $0x20] sm:$0xff]   ;;  %v3068_v42 = vld [vmem:[%s3270_s30 + $0x38] sm:$0xff]   ;;  %v3070_v44 = vld [vmem:[%s3281_s10 + $0x28] sm:$0xff]  }
  0x1b   : > { %3013 = vmatprep.subr.msk.bf16.mxu0 %vm483_vm0, %v2670_v15  ;;  %2856 = vmatmul.mubr.msk.bf16.gmra.mxu1 %vm479_vm2, %v3046_v18  ;;  %v3071_v43 = vld [vmem:[%s3270_s30 + $0x40] sm:$0xff]   ;;  %v3073_v45 = vld [vmem:[%s3281_s10 + $0x30] sm:$0xff]   ;;  %v3072_v46 = vld [vmem:[%s3270_s30 + $0x48] sm:$0xff]  }
  0x1c   : > { %2859 = vmatprep.mubr.msk.bf16.mxu1 %vm479_vm2, %v3049_v19  ;;  %v3075_v47 = vld [vmem:[%s3270_s30 + $0x50] sm:$0xff]   ;;  %v3074_v48 = vld [vmem:[%s3281_s10 + $0x38] sm:$0xff]   ;;  %v3077_v49 = vld [vmem:[%s3281_s10 + $0x40] sm:$0xff]  }
  0x1d   : > { %v3076_v50 = vld [vmem:[%s3270_s30 + $0x58] sm:$0xff]   ;;  %v3079_v51 = vld [vmem:[%s3270_s30 + $0x60] sm:$0xff]   ;;  %v3078_v52 = vld [vmem:[%s3281_s10 + $0x48] sm:$0xff]  }
  0x1e   : > { %v3081_v53 = vld [vmem:[%s3281_s10 + $0x50] sm:$0xff]   ;;  %v3080_v54 = vld [vmem:[%s3270_s30 + $0x68] sm:$0xff]   ;;  %v3082_v56 = vld [vmem:[%s3281_s10 + $0x58] sm:$0xff]  }
  0x1f   : > { %v3083_v55 = vld [vmem:[%s3270_s30 + $0x70] sm:$0xff]   ;;  %v3085_v57 = vld [vmem:[%s3281_s10 + $0x60] sm:$0xff]   ;;  %v3084_v58 = vld [vmem:[%s3270_s30 + $0x78] sm:$0xff]  }
  0x20   : > { %v3087_v59 = vld [vmem:[%s3316_s13] sm:$0xff]   ;;  %v3086_v60 = vld [vmem:[%s3281_s10 + $0x68] sm:$0xff]   ;;  %v3089_v61 = vld [vmem:[%s3281_s10 + $0x70] sm:$0xff]  }
  0x21   : > { %2844 = vmatmul.mubr.msk.bf16.gmra.mxu0 %vm479_vm2, %v3048_v20  ;;  %v3088_v62 = vld [vmem:[%s3316_s13 + $0x8] sm:$0xff]   ;;  %v3091_v63 = vld [vmem:[%s3316_s13 + $0x10] sm:$0xff]   ;;  %v3090_v0 = vld [vmem:[%s3281_s10 + $0x78] sm:$0xff]  }
  0x22   : > { %2847 = vmatprep.mubr.msk.bf16.mxu0 %vm479_vm2, %v3051_v21  ;;  %v3093_v1 = vld [vmem:[%s3327_s17] sm:$0xff]   ;;  %v3092_v2 = vld [vmem:[%s3316_s13 + $0x18] sm:$0xff]   ;;  %v3094_v4 = vld [vmem:[%s3327_s17 + $0x8] sm:$0xff]  }
  0x23   : > { %2860 = vmatmul.mubr.msk.bf16.gmra.mxu1 %vm479_vm2, %v3050_v22  ;;  %v3095_v3 = vld [vmem:[%s3316_s13 + $0x20] sm:$0xff]   ;;  %v3097_v5 = vld [vmem:[%s3327_s17 + $0x10] sm:$0xff]   ;;  %v3096_v6 = vld [vmem:[%s3316_s13 + $0x28] sm:$0xff]  }
  0x24   : > { %2863 = vmatprep.mubr.msk.bf16.mxu1 %vm479_vm2, %v3053_v23  ;;  %v3099_v7 = vld [vmem:[%s3316_s13 + $0x30] sm:$0xff]   ;;  %v3098_v8 = vld [vmem:[%s3327_s17 + $0x18] sm:$0xff]   ;;  %v3101_v9 = vld [vmem:[%s3327_s17 + $0x20] sm:$0xff]  }
  0x25   : > { %v3100_v10 = vld [vmem:[%s3316_s13 + $0x38] sm:$0xff]   ;;  %v3103_v11 = vld [vmem:[%s3316_s13 + $0x40] sm:$0xff]   ;;  %v3102_v12 = vld [vmem:[%s3327_s17 + $0x28] sm:$0xff]  }
  0x26   : > { %v3105_v13 = vld [vmem:[%s3327_s17 + $0x30] sm:$0xff]   ;;  %v3104_v14 = vld [vmem:[%s3316_s13 + $0x48] sm:$0xff]   ;;  %v3106_v16 = vld [vmem:[%s3327_s17 + $0x38] sm:$0xff]  }
  0x27   : > { %v3107_v15 = vld [vmem:[%s3316_s13 + $0x50] sm:$0xff]   ;;  %v3109_v17 = vld [vmem:[%s3327_s17 + $0x40] sm:$0xff]   ;;  %v3108_v18 = vld [vmem:[%s3316_s13 + $0x58] sm:$0xff]  }
  0x28   : > { %v3111_v19 = vld [vmem:[%s3316_s13 + $0x60] sm:$0xff]   ;;  %v3110_v20 = vld [vmem:[%s3327_s17 + $0x48] sm:$0xff]   ;;  %v3113_v21 = vld [vmem:[%s3327_s17 + $0x50] sm:$0xff]  }
  0x29   : > { %2848 = vmatmul.mubr.msk.bf16.gmra.mxu0 %vm479_vm2, %v3052_v24  ;;  %v3112_v22 = vld [vmem:[%s3316_s13 + $0x68] sm:$0xff]   ;;  %v3115_v23 = vld [vmem:[%s3316_s13 + $0x70] sm:$0xff]   ;;  %v3114_v24 = vld [vmem:[%s3327_s17 + $0x58] sm:$0xff]  }
  0x2a   : > { %2873 = vmatprep.mubr.msk.bf16.mxu0 %vm479_vm2, %v3055_v25  ;;  %v3117_v25 = vld [vmem:[%s3327_s17 + $0x60] sm:$0xff]  }
  0x2b   : > { %2864 = vmatmul.mubr.msk.bf16.gmra.mxu1 %vm479_vm2, %v3054_v26  ;;  %v3116_v26 = vld [vmem:[%s3316_s13 + $0x78] sm:$0xff]  }
  0x2c   : > { %2867 = vmatprep.mubr.msk.bf16.mxu1 %vm479_vm2, %v3057_v27  ;;  %v3118_v27 = vld [vmem:[%s3327_s17 + $0x68] sm:$0xff]  }
  0x31   : > { %2874 = vmatmul.mubr.msk.bf16.vlgmr.msra.gmra.mxu0 %vm479_vm2, %v3056_v28  ;;  %v3119_v28 = vld [vmem:[%s3327_s17 + $0x70] sm:$0xff]  }
  0x32   : > { %2877 = vmatprep.mubr.msk.bf16.mxu0 %vm479_vm2, %v3059_v29  ;;  %2940 = vmatpush3.bf16.msra.mxu0 %v1768_v30  ;;  %v3120_v29 = vld [vmem:[%s3327_s17 + $0x78] sm:$0xff]   ;;  %v527_v30 = vlaneseq }
  0x33   : > { %2868 = vmatmul.mubr.msk.bf16.gmra.mxu1 %vm479_vm2, %v3058_v31 }
  0x34   : > { %2907 = vmatprep.mubr.msk.bf16.mxu1 %vm479_vm2, %v3061_v32  ;;  %v528_v31 = vshrl.u32 %v527_v30, 7 }
  0x36   : > { %v529_v32 = vsub.s32 0, %v528_v31 }
  0x39   : > { %2878 = vmatmul.mubr.msk.bf16.gmra.mxu0 %vm479_vm2, %v3060_v33 }
  0x3a   : > { %2881 = vmatprep.mubr.msk.bf16.mxu0 %vm479_vm2, %v3063_v34 }
  0x3b   : > { %2908 = vmatmul.mubr.msk.bf16.vlgmr.msra.gmra.mxu1 %vm479_vm2, %v3062_v35 }
  0x3c   : > { %2974 = vmatpush3.bf16.msra.mxu1 %v2126_v37  ;;  %2911 = vmatprep.mubr.msk.bf16.mxu1 %vm479_vm2, %v3065_v36 }
  0x41   : > { %2882 = vmatmul.mubr.msk.bf16.gmra.mxu0 %vm479_vm2, %v3064_v38 }
  0x42   : > { %2885 = vmatprep.mubr.msk.bf16.mxu0 %vm479_vm2, %v3067_v39 }
  0x43   : > { %2912 = vmatmul.mubr.msk.bf16.gmra.mxu1 %vm479_vm2, %v3066_v40 }
  0x44   : > { %2915 = vmatprep.mubr.msk.bf16.mxu1 %vm479_vm2, %v3069_v41 }
  0x49   : > { %2886 = vmatmul.mubr.msk.bf16.gmra.mxu0 %vm479_vm2, %v3068_v42 }
  0x4a   : > { %2889 = vmatprep.mubr.msk.bf16.mxu0 %vm479_vm2, %v3071_v43 }
  0x4b   : > { %2916 = vmatmul.mubr.msk.bf16.gmra.mxu1 %vm479_vm2, %v3070_v44 }
  0x4c   : > { %2919 = vmatprep.mubr.msk.bf16.mxu1 %vm479_vm2, %v3073_v45 }
  0x51   : > { %2890 = vmatmul.mubr.msk.bf16.gmra.mxu0 %vm479_vm2, %v3072_v46 }
  0x52   : > { %2893 = vmatprep.mubr.msk.bf16.mxu0 %vm479_vm2, %v3075_v47 }
  0x53   : > { %2920 = vmatmul.mubr.msk.bf16.gmra.mxu1 %vm479_vm2, %v3074_v48 }
  0x54   : > { %2923 = vmatprep.mubr.msk.bf16.mxu1 %vm479_vm2, %v3077_v49 }
  0x59   : > { %2894 = vmatmul.mubr.msk.bf16.gmra.mxu0 %vm479_vm2, %v3076_v50 }
  0x5a   : > { %2897 = vmatprep.mubr.msk.bf16.mxu0 %vm479_vm2, %v3079_v51 }
  0x5b   : > { %2924 = vmatmul.mubr.msk.bf16.gmra.mxu1 %vm479_vm2, %v3078_v52 }
  0x5c   : > { %2927 = vmatprep.mubr.msk.bf16.mxu1 %vm479_vm2, %v3081_v53 }
  0x61   : > { %2898 = vmatmul.mubr.msk.bf16.gmra.mxu0 %vm479_vm2, %v3080_v54 }
  0x62   : > { %2901 = vmatprep.mubr.msk.bf16.mxu0 %vm479_vm2, %v3083_v55 }
  0x63   : > { %2928 = vmatmul.mubr.msk.bf16.gmra.mxu1 %vm479_vm2, %v3082_v56 }
  0x64   : > { %2931 = vmatprep.mubr.msk.bf16.mxu1 %vm479_vm2, %v3085_v57 }
  0x69   : > { %2902 = vmatmul.mubr.msk.bf16.gmra.mxu0 %vm479_vm2, %v3084_v58 }
  0x6a   : > { %2941 = vmatprep.mubr.msk.bf16.mxu0 %vm479_vm2, %v3087_v59 }
  0x6b   : > { %2932 = vmatmul.mubr.msk.bf16.gmra.mxu1 %vm479_vm2, %v3086_v60 }
  0x6c   : > { %2935 = vmatprep.mubr.msk.bf16.mxu1 %vm479_vm2, %v3089_v61 }
  0x71   : > { %2942 = vmatmul.mubr.msk.bf16.vlgmr.msra.gmra.mxu0 %vm479_vm2, %v3088_v62 }
  0x72   : > { %2945 = vmatprep.mubr.msk.bf16.mxu0 %vm479_vm2, %v3091_v63 }
  0x73   : > { %2936 = vmatmul.mubr.msk.bf16.gmra.mxu1 %vm479_vm2, %v3090_v0 }
  0x74   : > { %2975 = vmatprep.mubr.msk.bf16.mxu1 %vm479_vm2, %v3093_v1 }
  0x79   : > { %2946 = vmatmul.mubr.msk.bf16.gmra.mxu0 %vm479_vm2, %v3092_v2 }
  0x7a   : > { %2949 = vmatprep.mubr.msk.bf16.mxu0 %vm479_vm2, %v3095_v3 }
  0x7b   : > { %2976 = vmatmul.mubr.msk.bf16.vlgmr.msra.gmra.mxu1 %vm479_vm2, %v3094_v4 }
  0x7c   : > { %2979 = vmatprep.mubr.msk.bf16.mxu1 %vm479_vm2, %v3097_v5 }
  0x81   : > { %2950 = vmatmul.mubr.msk.bf16.gmra.mxu0 %vm479_vm2, %v3096_v6 }
  0x82   : > { %2953 = vmatprep.mubr.msk.bf16.mxu0 %vm479_vm2, %v3099_v7 }
  0x83   : > { %2980 = vmatmul.mubr.msk.bf16.gmra.mxu1 %vm479_vm2, %v3098_v8 }
  0x84   : > { %2983 = vmatprep.mubr.msk.bf16.mxu1 %vm479_vm2, %v3101_v9 }
  0x89   : > { %2954 = vmatmul.mubr.msk.bf16.gmra.mxu0 %vm479_vm2, %v3100_v10 }
  0x8a   : > { %2957 = vmatprep.mubr.msk.bf16.mxu0 %vm479_vm2, %v3103_v11 }
  0x8b   : > { %2984 = vmatmul.mubr.msk.bf16.gmra.mxu1 %vm479_vm2, %v3102_v12 }
  0x8c   : > { %2987 = vmatprep.mubr.msk.bf16.mxu1 %vm479_vm2, %v3105_v13 }
  0x91   : > { %2958 = vmatmul.mubr.msk.bf16.gmra.mxu0 %vm479_vm2, %v3104_v14 }
  0x92   : > { %2961 = vmatprep.mubr.msk.bf16.mxu0 %vm479_vm2, %v3107_v15 }
  0x93   : > { %2988 = vmatmul.mubr.msk.bf16.gmra.mxu1 %vm479_vm2, %v3106_v16 }
  0x94   : > { %2991 = vmatprep.mubr.msk.bf16.mxu1 %vm479_vm2, %v3109_v17 }
  0x99   : > { %2962 = vmatmul.mubr.msk.bf16.gmra.mxu0 %vm479_vm2, %v3108_v18 }
  0x9a   : > { %2965 = vmatprep.mubr.msk.bf16.mxu0 %vm479_vm2, %v3111_v19 }
  0x9b   : > { %2992 = vmatmul.mubr.msk.bf16.gmra.mxu1 %vm479_vm2, %v3110_v20 }
  0x9c   : > { %2995 = vmatprep.mubr.msk.bf16.mxu1 %vm479_vm2, %v3113_v21 }
  0xa1   : > { %2966 = vmatmul.mubr.msk.bf16.gmra.mxu0 %vm479_vm2, %v3112_v22 }
  0xa2   : > { %2969 = vmatprep.mubr.msk.bf16.mxu0 %vm479_vm2, %v3115_v23 }
  0xa3   : > { %2996 = vmatmul.mubr.msk.bf16.gmra.mxu1 %vm479_vm2, %v3114_v24 }
  0xa4   : > { %2999 = vmatprep.mubr.msk.bf16.mxu1 %vm479_vm2, %v3117_v25 }
  0xa9   : > { %2970 = vmatmul.mubr.msk.bf16.gmra.mxu0 %vm479_vm2, %v3116_v26 }
  0xab   : > { %3000 = vmatmul.mubr.msk.bf16.gmra.mxu1 %vm479_vm2, %v3118_v27 }
  0xac   : > { %3003 = vmatprep.mubr.msk.bf16.mxu1 %vm479_vm2, %v3119_v28 }
  0xb3   : > { %3004 = vmatmul.mubr.msk.bf16.gmra.mxu1 %vm479_vm2, %v3120_v29 }
  0xd1   : > { %v521_v33 = vpop.f32.mrf.mxu0 }
  0xd2   : > { %v3435_v34 = vrot.slane %v521_v33, %v529_v32 }
  0xd3   : > { %v2835_v35 = vpop.f32.mrf.mxu0  ;;  %v2853_v36 = vpop.f32.mrf.mxu1 }
  0xd4   : > { %v3438_v38 = vadd.f32 %v2853_v36, %v3435_v34 }
  0xd5   : > { %v524_v37 = vpop.f32.mrf.mxu0  ;;  %v778_v39 = vpop.f32.mrf.mxu1 }
  0xd6   : > { %v3441_v41 = vadd.f32 %v778_v39, %v3435_v34 }
  0xd7   : > { %v2836_v40 = vpop.f32.mrf.mxu0  ;;  %v2854_v42 = vpop.f32.mrf.mxu1 }
  0xd8   : > { %v3444_v44 = vadd.f32 %v2854_v42, %v3435_v34 }
  0xd9   : > { %v2841_v43 = vpop.f32.mrf.mxu0  ;;  %v781_v46 = vpop.f32.mrf.mxu1 }
  0xda   : > { %v3447_v45 = vadd.f32 %v2841_v43, %v3435_v34  ;;  %v3450_v48 = vadd.f32 %v781_v46, %v3435_v34 }
  0xdb   : > { %v730_v47 = vpop.f32.mrf.mxu0  ;;  %v2857_v50 = vpop.f32.mrf.mxu1 }
  0xdc   : > { %v3453_v49 = vadd.f32 %v730_v47, %v3435_v34  ;;  %v3456_v52 = vadd.f32 %v2857_v50, %v3435_v34 }
  0xdd   : > { %v2842_v51 = vpop.f32.mrf.mxu0  ;;  %v794_v54 = vpop.f32.mrf.mxu1 }
  0xde   : > { %v3459_v53 = vadd.f32 %v2842_v51, %v3435_v34  ;;  %v3462_v56 = vadd.f32 %v794_v54, %v3435_v34 }
  0xdf   : > { %v733_v55 = vpop.f32.mrf.mxu0  ;;  %v2858_v58 = vpop.f32.mrf.mxu1 }
  0xe0   : > { %3844 = vst [vmem:[#allocation2_spill] sm:$0xff] %v3462_v56  ;;  %v3465_v57 = vadd.f32 %v733_v55, %v3435_v34  ;;  %v3468_v60 = vadd.f32 %v2858_v58, %v3435_v34 }
  0xe1   : > { %v2845_v59 = vpop.f32.mrf.mxu0  ;;  %v797_v62 = vpop.f32.mrf.mxu1 }
  0xe2   : > { %3845 = vst [vmem:[#allocation3_spill] sm:$0xff] %v3468_v60  ;;  %v3471_v61 = vadd.f32 %v2845_v59, %v3435_v34  ;;  %v3474_v0 = vadd.f32 %v797_v62, %v3435_v34 }
  0xe3   : > { %v746_v63 = vpop.f32.mrf.mxu0  ;;  %v2861_v2 = vpop.f32.mrf.mxu1 }
  0xe4   : > { %3846 = vst [vmem:[#allocation4_spill] sm:$0xff] %v3474_v0  ;;  %v3477_v1 = vadd.f32 %v746_v63, %v3435_v34  ;;  %v3480_v4 = vadd.f32 %v2861_v2, %v3435_v34 }
  0xe5   : > { %v2846_v3 = vpop.f32.mrf.mxu0  ;;  %v810_v6 = vpop.f32.mrf.mxu1 }
  0xe6   : > { %3847 = vst [vmem:[#allocation5_spill] sm:$0xff] %v3480_v4  ;;  %v3483_v5 = vadd.f32 %v2846_v3, %v3435_v34  ;;  %v3486_v8 = vadd.f32 %v810_v6, %v3435_v34 }
  0xe7   : > { %v749_v7 = vpop.f32.mrf.mxu0  ;;  %v2862_v10 = vpop.f32.mrf.mxu1 }
  0xe8   : > { %3848 = vst [vmem:[#allocation6_spill] sm:$0xff] %v3486_v8  ;;  %v3489_v9 = vadd.f32 %v749_v7, %v3435_v34  ;;  %v3492_v12 = vadd.f32 %v2862_v10, %v3435_v34 }
  0xe9   : > { %v2849_v11 = vpop.f32.mrf.mxu0  ;;  %v813_v14 = vpop.f32.mrf.mxu1 }
  0xea   : > { %3849 = vst [vmem:[#allocation7_spill] sm:$0xff] %v3492_v12  ;;  %v3495_v13 = vadd.f32 %v2849_v11, %v3435_v34  ;;  %v3498_v16 = vadd.f32 %v813_v14, %v3435_v34 }
  0xeb   : > { %v762_v15 = vpop.f32.mrf.mxu0  ;;  %v2865_v18 = vpop.f32.mrf.mxu1 }
  0xec   : > { %3850 = vst [vmem:[#allocation8_spill] sm:$0xff] %v3498_v16  ;;  %v3501_v17 = vadd.f32 %v762_v15, %v3435_v34  ;;  %v3504_v20 = vadd.f32 %v2865_v18, %v3435_v34 }
  0xed   : > { %v2850_v19 = vpop.f32.mrf.mxu0  ;;  %v826_v22 = vpop.f32.mrf.mxu1 }
  0xee   : > { %3851 = vst [vmem:[#allocation9_spill] sm:$0xff] %v3504_v20  ;;  %v3507_v21 = vadd.f32 %v2850_v19, %v3435_v34  ;;  %v3510_v24 = vadd.f32 %v826_v22, %v3435_v34 }
  0xef   : > { %v765_v23 = vpop.f32.mrf.mxu0  ;;  %v2866_v26 = vpop.f32.mrf.mxu1 }
  0xf0   : > { %3852 = vst [vmem:[#allocation10_spill] sm:$0xff] %v3510_v24  ;;  %v3513_v25 = vadd.f32 %v765_v23, %v3435_v34  ;;  %v3516_v27 = vadd.f32 %v2866_v26, %v3435_v34 }
  0xf1   : > { %v3518_v28 = vpop.f32.mrf.mxu0  ;;  %v829_v29 = vpop.f32.mrf.mxu1 }
  0xf2   : > { %3853 = vst [vmem:[#allocation11_spill] sm:$0xff] %v3516_v27  ;;  %v3521_v30 = vadd.f32 %v829_v29, %v3435_v34 }
  0xf3   : > { %v3523_v31 = vpop.f32.mrf.mxu0  ;;  %v2869_v32 = vpop.f32.mrf.mxu1 }
  0xf4   : > { %3854 = vst [vmem:[#allocation12_spill] sm:$0xff] %v3521_v30  ;;  %v3526_v33 = vadd.f32 %v2869_v32, %v3435_v34 }
  0xf5   : > { %v3528_v35 = vpop.f32.mrf.mxu0  ;;  %v842_v36 = vpop.f32.mrf.mxu1 }
  0xf6   : > { %3855 = vst [vmem:[#allocation13_spill] sm:$0xff] %v3526_v33  ;;  %v3531_v37 = vadd.f32 %v842_v36, %v3435_v34 }
  0xf7   : > { %v3533_v39 = vpop.f32.mrf.mxu0  ;;  %v2870_v40 = vpop.f32.mrf.mxu1 }
  0xf8   : > { %3856 = vst [vmem:[#allocation14_spill] sm:$0xff] %v3531_v37  ;;  %v3536_v42 = vadd.f32 %v2870_v40, %v3435_v34 }
  0xf9   : > { %v3538_v43 = vpop.f32.mrf.mxu0  ;;  %v845_v46 = vpop.f32.mrf.mxu1 }
  0xfa   : > { %3857 = vst [vmem:[#allocation15_spill] sm:$0xff] %v3536_v42  ;;  %v3541_v47 = vadd.f32 %v845_v46, %v3435_v34 }
  0xfb   : > { %v3543_v50 = vpop.f32.mrf.mxu0  ;;  %v3545_v51 = vpop.f32.mrf.mxu1 }
  0xfc   : > { %3858 = vst [vmem:[#allocation16_spill] sm:$0xff] %v3541_v47 }
  0xfd   : > { %v3547_v54 = vpop.f32.mrf.mxu0  ;;  %v3549_v55 = vpop.f32.mrf.mxu1 }
  0xff   : > { %v3551_v58 = vpop.f32.mrf.mxu0  ;;  %v3553_v59 = vpop.f32.mrf.mxu1 }
 0x101   : > { %v3555_v62 = vpop.f32.mrf.mxu0  ;;  %v3557_v63 = vpop.f32.mrf.mxu1 }
 0x103   : > { %v3559_v2 = vpop.f32.mrf.mxu0  ;;  %v3561_v34 = vpop.f32.mrf.mxu1 }
 0x105   : > { %v3563_v3 = vpop.f32.mrf.mxu0  ;;  %v3565_v6 = vpop.f32.mrf.mxu1 }
 0x107   : > { %v3567_v7 = vpop.f32.mrf.mxu0  ;;  %v3569_v10 = vpop.f32.mrf.mxu1 }
 0x109   : > { %v3571_v11 = vpop.f32.mrf.mxu0  ;;  %v3573_v14 = vpop.f32.mrf.mxu1 }
 0x10b   : > { %v3575_v15 = vpop.f32.mrf.mxu0  ;;  %v3577_v18 = vpop.f32.mrf.mxu1 }
 0x10d   : > { %v3579_v19 = vpop.f32.mrf.mxu0  ;;  %v3581_v22 = vpop.f32.mrf.mxu1 }
 0x10f   : > { %v3583_v23 = vpop.f32.mrf.mxu0  ;;  %v3585_v26 = vpop.f32.mrf.mxu1 }
 0x111   : > { %v3587_v29 = vpop.f32.mrf.mxu0  ;;  %v3589_v32 = vpop.f32.mrf.mxu1 }
 0x113   : > { %v3591_v36 = vpop.f32.mrf.mxu0  ;;  %v3593_v40 = vpop.f32.mrf.mxu1 }
 0x114   : > { %3859 = vst [vmem:[#allocation17_spill] sm:$0xff] %v3591_v36 }
 0x115   : > { %v3595_v46 = vpop.f32.mrf.mxu0  ;;  %v3597_v47 = vpop.f32.mrf.mxu1 }
 0x116   : > { %3860 = vst [vmem:[#allocation18_spill] sm:$0xff] %v3595_v46 }
 0x117   : > { %v3599_v42 = vpop.f32.mrf.mxu0  ;;  %v3601_v37 = vpop.f32.mrf.mxu1 }
 0x118   : > { %3861 = vst [vmem:[#allocation19_spill] sm:$0xff] %v3599_v42 }
 0x119   : > { %v3603_v33 = vpop.f32.mrf.mxu0  ;;  %v3605_v30 = vpop.f32.mrf.mxu1 }
 0x11a   : > { %3862 = vst [vmem:[#allocation20_spill] sm:$0xff] %v3603_v33 }
 0x11b   : > { %v3607_v27 = vpop.f32.mrf.mxu0  ;;  %v3609_v24 = vpop.f32.mrf.mxu1 }
 0x11c   : > { %3863 = vst [vmem:[#allocation21_spill] sm:$0xff] %v3607_v27  ;;  %3864 = vst [vmem:[#allocation22_spill] sm:$0xff] %v3609_v24 }
 0x11d   : > { %v3611_v20 = vpop.f32.mrf.mxu0  ;;  %v3613_v16 = vpop.f32.mrf.mxu1 }
 0x11e   : > { %3865 = vst [vmem:[#allocation23_spill] sm:$0xff] %v3611_v20  ;;  %3866 = vst [vmem:[#allocation24_spill] sm:$0xff] %v3613_v16 }
 0x11f   : > { %v3615_v12 = vpop.f32.mrf.mxu0  ;;  %v3617_v8 = vpop.f32.mrf.mxu1 }
 0x120   : > { %3867 = vst [vmem:[#allocation25_spill] sm:$0xff] %v3615_v12  ;;  %3868 = vst [vmem:[#allocation26_spill] sm:$0xff] %v3617_v8 }
 0x121   : > { %v3619_v4 = vpop.f32.mrf.mxu0  ;;  %v3621_v42 = vpop.f32.mrf.mxu1 }
 0x122   : > { %3869 = vst [vmem:[#allocation27_spill] sm:$0xff] %v3619_v4  ;;  %3870 = vst [vmem:[#allocation28_spill] sm:$0xff] %v3621_v42 }
 0x123   : > { %v3623_v0 = vpop.f32.mrf.mxu0  ;;  %v3625_v33 = vpop.f32.mrf.mxu1 }
 0x124   : > { %3871 = vst [vmem:[#allocation29_spill] sm:$0xff] %v3623_v0  ;;  %3872 = vst [vmem:[#allocation30_spill] sm:$0xff] %v3625_v33 }
 0x125   : > { %v3627_v46 = vpop.f32.mrf.mxu0  ;;  %v3629_v27 = vpop.f32.mrf.mxu1 }
 0x126   : > { %3873 = vst [vmem:[#allocation31_spill] sm:$0xff] %v3627_v46  ;;  %3874 = vst [vmem:[#allocation32_spill] sm:$0xff] %v3629_v27 }
 0x127   : > { %v3631_v60 = vpop.f32.mrf.mxu0  ;;  %v3633_v20 = vpop.f32.mrf.mxu1 }
 0x128   : > { %3875 = vst [vmem:[#allocation33_spill] sm:$0xff] %v3631_v60  ;;  %3876 = vst [vmem:[#allocation34_spill] sm:$0xff] %v3633_v20 }
 0x129   : > { %v3635_v16 = vpop.f32.mrf.mxu0  ;;  %v3637_v12 = vpop.f32.mrf.mxu1 }
 0x12a   : > { %3877 = vst [vmem:[#allocation35_spill] sm:$0xff] %v3635_v16  ;;  %3878 = vst [vmem:[#allocation36_spill] sm:$0xff] %v3637_v12 }
 0x12b   : > { %v3639_v8 = vpop.f32.mrf.mxu0  ;;  %v3641_v4 = vpop.f32.mrf.mxu1 }
 0x12c   : > { %3879 = vst [vmem:[#allocation37_spill] sm:$0xff] %v3639_v8  ;;  %3880 = vst [vmem:[#allocation38_spill] sm:$0xff] %v3641_v4  ;;  %v1217_v8 = vadd.f32 %v3518_v28, %v3447_v45  ;;  %v1216_v28 = vadd.f32 %v3533_v39, %v3465_v57 }
 0x12d   : > { %v3643_v42 = vpop.f32.mrf.mxu0  ;;  %v3645_v0 = vpop.f32.mrf.mxu1 }
 0x12e   : > { %3881 = vst [vmem:[#allocation39_spill] sm:$0xff] %v3643_v42  ;;  %3882 = vst [vmem:[#allocation40_spill] sm:$0xff] %v3645_v0 }
 0x12f   : > { %v3647_v46 = vpop.f32.mrf.mxu0  ;;  %v3649_v27 = vpop.f32.mrf.mxu1 }
 0x130   : > { %3883 = vst [vmem:[#allocation41_spill] sm:$0xff] %v3647_v46  ;;  %3884 = vst [vmem:[#allocation42_spill] sm:$0xff] %v3649_v27  ;;  %v1215_v46 = vadd.f32 %v3523_v31, %v3453_v49  ;;  %v1575_v27 = vadd.f32 %v3545_v51, %v1217_v8 }
 0x131   : > { %v2943_v60 = vpop.f32.mrf.mxu0  ;;  %v3651_v33 = vpop.f32.mrf.mxu1 }
 0x132   : > { %3885 = vst [vmem:[#allocation43_spill] sm:$0xff] %v3651_v33  ;;  %v1933_v33 = vadd.f32 %v2943_v60, %v1575_v27  ;;  %v1574_v27 = vadd.f32 %v3557_v63, %v1216_v28 }
 0x133   : > { %v1804_v20 = vpop.f32.mrf.mxu0  ;;  %v3653_v16 = vpop.f32.mrf.mxu1 }
 0x134   : > { %3886 = vst [vmem:[#allocation44_spill] sm:$0xff] %v3653_v16  ;;  %v1218_v16 = vadd.f32 %v3528_v35, %v3459_v53  ;;  %v1221_v53 = vadd.f32 %v3538_v43, %v3471_v61 }
 0x135   : > { %v2944_v12 = vpop.f32.mrf.mxu0  ;;  %v3655_v24 = vpop.f32.mrf.mxu1 }
 0x136   : > { %3887 = vst [vmem:[#allocation45_spill] sm:$0xff] %v3655_v24  ;;  %v1573_v24 = vadd.f32 %v3549_v55, %v1215_v46 }
 0x137   : > { %v1807_v42 = vpop.f32.mrf.mxu0  ;;  %v3659_v4 = vpop.f32.mrf.mxu1 }
 0x138   : > { %3888 = vst [vmem:[#allocation46_spill] sm:$0xff] %v3659_v4  ;;  %v1576_v4 = vadd.f32 %v3553_v59, %v1218_v16  ;;  %v1931_v49 = vadd.f32 %v1804_v20, %v1573_v24  ;;  %v1219_v20 = vadd.f32 %v3543_v50, %v3477_v1  ;;  %v1932_v51 = vadd.f32 %v1807_v42, %v1574_v27 }
 0x139   : > { %v2947_v0 = vpop.f32.mrf.mxu0  ;;  %v3664_v36 = vpop.f32.mrf.mxu1  ;;  %v1220_v42 = vadd.f32 %v3551_v58, %v3489_v9 }
 0x13a   : > { %v1934_v35 = vadd.f32 %v2944_v12, %v1576_v4  ;;  %v1222_v4 = vadd.f32 %v3547_v54, %v3483_v5  ;;  %v1577_v59 = vadd.f32 %v3565_v6, %v1219_v20 }
 0x13b   : > { %v1820_v56 = vpop.f32.mrf.mxu0  ;;  %v2977_v45 = vpop.f32.mrf.mxu1 }
 0x13c   : > { %v2291_v8 = vadd.f32 %v2977_v45, %v1933_v33  ;;  %v1579_v33 = vadd.f32 %v3561_v34, %v1221_v53  ;;  %v1580_v45 = vadd.f32 %v3569_v10, %v1222_v4  ;;  %v1935_v28 = vadd.f32 %v1820_v56, %v1577_v59 }
 0x13d   : > { %v2948_v31 = vpop.f32.mrf.mxu0  ;;  %v2162_v60 = vpop.f32.mrf.mxu1  ;;  %v1223_v56 = vadd.f32 %v3559_v2, %v3501_v17 }
 0x13e   : > { %v2323_v57 = vmax.f32 %v2291_v8, 0.0  ;;  %v2289_v16 = vadd.f32 %v2162_v60, %v1931_v49  ;;  %v1937_v63 = vadd.f32 %v2947_v0, %v1579_v33  ;;  %v1225_v0 = vadd.f32 %v3555_v62, %v3495_v13 }
 0x13f   : > { %v1823_v39 = vpop.f32.mrf.mxu0  ;;  %v2978_v24 = vpop.f32.mrf.mxu1  ;;  %v1578_v8 = vadd.f32 %v3573_v14, %v1220_v42  ;;  %v1938_v53 = vadd.f32 %v2948_v31, %v1580_v45  ;;  %v1226_v31 = vadd.f32 %v3563_v3, %v3507_v21  ;;  %v1228_v45 = vadd.f32 %v3583_v23, %v3450_v48 }
 0x140   : > { %2355 = vst.msk [vmem:[%s3676_s24 + $0x10] sm:$0xff] %vm479_vm2, %v2323_v57  ;;  %v2321_v55 = vmax.f32 %v2289_v16, 0.0  ;;  %v2292_v43 = vadd.f32 %v2978_v24, %v1934_v35  ;;  %v1583_v27 = vadd.f32 %v3577_v18, %v1225_v0  ;;  %v1581_v16 = vadd.f32 %v3581_v22, %v1223_v56  ;;  %v3891_v56 = vld [vmem:[#allocation22_spill] sm:$0xff] }
 0x141   : > { %v2951_v61 = vpop.f32.mrf.mxu0  ;;  %v2165_v12 = vpop.f32.mrf.mxu1  ;;  %v1936_v35 = vadd.f32 %v1823_v39, %v1578_v8  ;;  %v1224_v39 = vadd.f32 %v3567_v7, %v3513_v25  ;;  %v1584_v33 = vadd.f32 %v3585_v26, %v1226_v31  ;;  %v3894_v31 = vld [vmem:[#allocation24_spill] sm:$0xff] }
 0x142   : > { %2353 = vst.msk [vmem:[%s3676_s24] sm:$0xff] %vm479_vm2, %v2321_v55  ;;  %v2324_v1 = vmax.f32 %v2292_v43, 0.0  ;;  %v2290_v34 = vadd.f32 %v2165_v12, %v1932_v51  ;;  %v1941_v20 = vadd.f32 %v2951_v61, %v1583_v27  ;;  %v1229_v55 = vadd.f32 %v3571_v11, %v3438_v38 }
 0x143   : > { %v1836_v50 = vpop.f32.mrf.mxu0  ;;  %v2981_v46 = vpop.f32.mrf.mxu1  ;;  %v1582_v43 = vadd.f32 %v3589_v32, %v1224_v39  ;;  %v1227_v12 = vadd.f32 %v3575_v15, %v3441_v41  ;;  %v3896_v39 = vld [vmem:[#allocation19_spill] sm:$0xff] }
 0x144   : > { %2356 = vst.msk [vmem:[%s3676_s24 + $0x18] sm:$0xff] %vm479_vm2, %v2324_v1  ;;  %v2322_v5 = vmax.f32 %v2290_v34, 0.0  ;;  %v2295_v6 = vadd.f32 %v2981_v46, %v1937_v63  ;;  %v1939_v51 = vadd.f32 %v1836_v50, %v1581_v16  ;;  %v1587_v63 = vadd.f32 %v3593_v40, %v1229_v55 }
 0x145   : > { %v2952_v54 = vpop.f32.mrf.mxu0  ;;  %v2178_v49 = vpop.f32.mrf.mxu1  ;;  %v1230_v50 = vadd.f32 %v3579_v19, %v3444_v44  ;;  %v1585_v42 = vadd.f32 %v3597_v47, %v1227_v12 }
 0x146   : > { %2354 = vst.msk [vmem:[%s3676_s24 + $0x8] sm:$0xff] %vm479_vm2, %v2322_v5  ;;  %v2327_v9 = vmax.f32 %v2295_v6, 0.0  ;;  %v2293_v10 = vadd.f32 %v2178_v49, %v1935_v28  ;;  %v1942_v4 = vadd.f32 %v2952_v54, %v1584_v33  ;;  %v1233_v6 = vadd.f32 %v3587_v29, %v3456_v52 }
 0x147   : > { %v1839_v58 = vpop.f32.mrf.mxu0  ;;  %v2982_v60 = vpop.f32.mrf.mxu1  ;;  %v1588_v5 = vadd.f32 %v3601_v37, %v1230_v50  ;;  %v1586_v49 = vadd.f32 %v3605_v30, %v1228_v45 }
 0x148   : > { %2359 = vst.msk [vmem:[%s3676_s24 + $0x30] sm:$0xff] %vm479_vm2, %v2327_v9  ;;  %v2325_v13 = vmax.f32 %v2293_v10, 0.0  ;;  %v2296_v14 = vadd.f32 %v2982_v60, %v1938_v53  ;;  %v1940_v1 = vadd.f32 %v1839_v58, %v1582_v43  ;;  %v3889_v53 = vld [vmem:[#allocation2_spill] sm:$0xff]  ;;  %v3890_v9 = vld [vmem:[#allocation17_spill] sm:$0xff]  ;;  %v1591_v60 = vadd.f32 %v3891_v56, %v1233_v6 }
 0x149   : > { %v2955_v62 = vpop.f32.mrf.mxu0  ;;  %v2181_v57 = vpop.f32.mrf.mxu1  ;;  %v1231_v58 = vadd.f32 %v3890_v9, %v3889_v53  ;;  %v3898_v43 = vld [vmem:[#allocation5_spill] sm:$0xff]  ;;  %v3909_v9 = vld [vmem:[#allocation34_spill] sm:$0xff] }
 0x14a   : > { %2357 = vst.msk [vmem:[%s3676_s24 + $0x20] sm:$0xff] %vm479_vm2, %v2325_v13  ;;  %v2328_v17 = vmax.f32 %v2296_v14, 0.0  ;;  %v2294_v18 = vadd.f32 %v2181_v57, %v1936_v35  ;;  %v1945_v46 = vadd.f32 %v2955_v62, %v1587_v63  ;;  %v3892_v35 = vld [vmem:[#allocation3_spill] sm:$0xff]  ;;  %v3893_v13 = vld [vmem:[#allocation18_spill] sm:$0xff] }
 0x14b   : > { %v1852_v2 = vpop.f32.mrf.mxu0  ;;  %v2985_v24 = vpop.f32.mrf.mxu1  ;;  %v1234_v62 = vadd.f32 %v3893_v13, %v3892_v35  ;;  %v1589_v57 = vadd.f32 %v3894_v31, %v1231_v58  ;;  %v3912_v13 = vld [vmem:[#allocation36_spill] sm:$0xff] }
 0x14c   : > { %2360 = vst.msk [vmem:[%s3676_s24 + $0x38] sm:$0xff] %vm479_vm2, %v2328_v17  ;;  %v2326_v21 = vmax.f32 %v2294_v18, 0.0  ;;  %v2299_v22 = vadd.f32 %v2985_v24, %v1941_v20  ;;  %v1943_v54 = vadd.f32 %v1852_v2, %v1585_v42  ;;  %v3895_v18 = vld [vmem:[#allocation4_spill] sm:$0xff]  ;;  %v3903_v42 = vld [vmem:[#allocation30_spill] sm:$0xff] }
 0x14d   : > { %v2956_v3 = vpop.f32.mrf.mxu0  ;;  %v2194_v61 = vpop.f32.mrf.mxu1  ;;  %v1232_v24 = vadd.f32 %v3896_v39, %v3895_v18  ;;  %v3915_v39 = vld [vmem:[#allocation38_spill] sm:$0xff] }
 0x14e   : > { %2358 = vst.msk [vmem:[%s3676_s24 + $0x28] sm:$0xff] %vm479_vm2, %v2326_v21  ;;  %v2331_v25 = vmax.f32 %v2299_v22, 0.0  ;;  %v2297_v26 = vadd.f32 %v2194_v61, %v1939_v51  ;;  %v1946_v8 = vadd.f32 %v2956_v3, %v1588_v5  ;;  %v3897_v51 = vld [vmem:[#allocation26_spill] sm:$0xff]  ;;  %v3905_v5 = vld [vmem:[#allocation23_spill] sm:$0xff] }
 0x14f   : > { %v1855_v7 = vpop.f32.mrf.mxu0  ;;  %v2986_v59 = vpop.f32.mrf.mxu1  ;;  %v1592_v21 = vadd.f32 %v3897_v51, %v1234_v62 }
 0x150   : > { %2363 = vst.msk [vmem:[%s3676_s24 + $0x50] sm:$0xff] %vm479_vm2, %v2331_v25  ;;  %v2329_v38 = vmax.f32 %v2297_v26, 0.0  ;;  %v2300_v32 = vadd.f32 %v2986_v59, %v1942_v4  ;;  %v1944_v27 = vadd.f32 %v1855_v7, %v1586_v49  ;;  %v3899_v4 = vld [vmem:[#allocation20_spill] sm:$0xff] }
 0x151   : > { %v2959_v11 = vpop.f32.mrf.mxu0  ;;  %v2197_v34 = vpop.f32.mrf.mxu1  ;;  %v1237_v25 = vadd.f32 %v3899_v4, %v3898_v43  ;;  %v3900_v26 = vld [vmem:[#allocation28_spill] sm:$0xff] }
 0x152   : > { %2361 = vst.msk [vmem:[%s3676_s24 + $0x40] sm:$0xff] %vm479_vm2, %v2329_v38  ;;  %v2332_v41 = vmax.f32 %v2300_v32, 0.0  ;;  %v2298_v40 = vadd.f32 %v2197_v34, %v1940_v1  ;;  %v1949_v16 = vadd.f32 %v2959_v11, %v1591_v60  ;;  %v1590_v12 = vadd.f32 %v3900_v26, %v1232_v24  ;;  %v3901_v11 = vld [vmem:[#allocation6_spill] sm:$0xff]  ;;  %v3902_v32 = vld [vmem:[#allocation21_spill] sm:$0xff]  ;;  %v3918_v4 = vld [vmem:[#allocation40_spill] sm:$0xff] }
 0x153   : > { %v1868_v15 = vpop.f32.mrf.mxu0  ;;  %v2989_v28 = vpop.f32.mrf.mxu1  ;;  %v1235_v50 = vadd.f32 %v3902_v32, %v3901_v11  ;;  %v3921_v11 = vld [vmem:[#allocation42_spill] sm:$0xff] }
 0x154   : > { %2364 = vst.msk [vmem:[%s3676_s24 + $0x58] sm:$0xff] %vm479_vm2, %v2332_v41  ;;  %v2330_v44 = vmax.f32 %v2298_v40, 0.0  ;;  %v2303_v47 = vadd.f32 %v2989_v28, %v1945_v46  ;;  %v1947_v3 = vadd.f32 %v1868_v15, %v1589_v57  ;;  %v1595_v46 = vadd.f32 %v3903_v42, %v1237_v25  ;;  %v3904_v28 = vld [vmem:[#allocation7_spill] sm:$0xff] }
 0x155   : > { %v2960_v19 = vpop.f32.mrf.mxu0  ;;  %v2210_v0 = vpop.f32.mrf.mxu1 }
 0x156   : > { %2362 = vst.msk [vmem:[%s3676_s24 + $0x48] sm:$0xff] %vm479_vm2, %v2330_v44  ;;  %v2335_v48 = vmax.f32 %v2303_v47, 0.0  ;;  %v2301_v37 = vadd.f32 %v2210_v0, %v1943_v54  ;;  %v1950_v59 = vadd.f32 %v2960_v19, %v1592_v21  ;;  %v1238_v54 = vadd.f32 %v3905_v5, %v3904_v28  ;;  %v3906_v19 = vld [vmem:[#allocation32_spill] sm:$0xff]  ;;  %v3924_v28 = vld [vmem:[#allocation43_spill] sm:$0xff] }
 0x157   : > { %v1871_v23 = vpop.f32.mrf.mxu0  ;;  %v2990_v10 = vpop.f32.mrf.mxu1  ;;  %v1593_v47 = vadd.f32 %v3906_v19, %v1235_v50 }
 0x158   : > { %2367 = vst.msk [vmem:[%s3676_s24 + $0x70] sm:$0xff] %vm479_vm2, %v2335_v48  ;;  %v2333_v52 = vmax.f32 %v2301_v37, 0.0  ;;  %v2304_v30 = vadd.f32 %v2990_v10, %v1946_v8  ;;  %v1948_v41 = vadd.f32 %v1871_v23, %v1590_v12  ;;  %v3907_v48 = vld [vmem:[#allocation8_spill] sm:$0xff]  ;;  %v3908_v23 = vld [vmem:[#allocation25_spill] sm:$0xff]  ;;  %v1596_v58 = vadd.f32 %v3909_v9, %v1238_v54  ;;  %v3928_v9 = vld [vmem:[#allocation15_spill] sm:$0xff] }
 0x159   : > { %v2963_v29 = vpop.f32.mrf.mxu0  ;;  %v2213_v14 = vpop.f32.mrf.mxu1  ;;  %v1236_v37 = vadd.f32 %v3908_v23, %v3907_v48 }
 0x15a   : > { %2365 = vst.msk [vmem:[%s3676_s24 + $0x60] sm:$0xff] %vm479_vm2, %v2333_v52  ;;  %v2336_v20 = vmax.f32 %v2304_v30, 0.0  ;;  %v2302_v2 = vadd.f32 %v2213_v14, %v1944_v27  ;;  %v1953_v6 = vadd.f32 %v2963_v29, %v1595_v46  ;;  %v3910_v52 = vld [vmem:[#allocation9_spill] sm:$0xff]  ;;  %v3911_v29 = vld [vmem:[#allocation27_spill] sm:$0xff] }
 0x15b   : > { %v1884_v17 = vpop.f32.mrf.mxu0  ;;  %v2993_v33 = vpop.f32.mrf.mxu1  ;;  %v1241_v30 = vadd.f32 %v3911_v29, %v3910_v52  ;;  %v1594_v62 = vadd.f32 %v3912_v13, %v1236_v37  ;;  %v3922_v46 = vld [vmem:[#allocation13_spill] sm:$0xff]  ;;  %v3931_v13 = vld [vmem:[#allocation16_spill] sm:$0xff] }
 0x15c   : > { %2368 = vst.msk [vmem:[%s3676_s24 + $0x78] sm:$0xff] %vm479_vm2, %v2336_v20  ;;  %v2334_v22 = vmax.f32 %v2302_v2, 0.0  ;;  %v2307_v61 = vadd.f32 %v2993_v33, %v1949_v16  ;;  %v1951_v10 = vadd.f32 %v1884_v17, %v1593_v47  ;;  %v3913_v20 = vld [vmem:[#allocation10_spill] sm:$0xff]  ;;  %v3914_v17 = vld [vmem:[#allocation29_spill] sm:$0xff] }
 0x15d   : > { %v2964_v55 = vpop.f32.mrf.mxu0  ;;  %v2226_v7 = vpop.f32.mrf.mxu1  ;;  %v1239_v2 = vadd.f32 %v3914_v17, %v3913_v20  ;;  %v1599_v24 = vadd.f32 %v3915_v39, %v1241_v30  ;;  %v3925_v47 = vld [vmem:[#allocation14_spill] sm:$0xff] }
 0x15e   : > { %2366 = vst.msk [vmem:[%s3676_s24 + $0x68] sm:$0xff] %vm479_vm2, %v2334_v22  ;;  %v2339_v63 = vmax.f32 %v2307_v61, 0.0  ;;  %v2305_v38 = vadd.f32 %v2226_v7, %v1947_v3  ;;  %v1954_v14 = vadd.f32 %v2964_v55, %v1596_v58  ;;  %v3916_v3 = vld [vmem:[#allocation11_spill] sm:$0xff] }
 0x15f   : > { %v1887_v1 = vpop.f32.mrf.mxu0  ;;  %v2994_v34 = vpop.f32.mrf.mxu1  ;;  %v3917_v22 = vld [vmem:[#allocation31_spill] sm:$0xff]  ;;  %v1597_v25 = vadd.f32 %v3918_v4, %v1239_v2 }
 0x160   : > { %2371 = vst.msk [vmem:[%s3676_s24 + $0x90] sm:$0xff] %vm479_vm2, %v2339_v63  ;;  %v2337_v15 = vmax.f32 %v2305_v38, 0.0  ;;  %v2308_v45 = vadd.f32 %v2994_v34, %v1950_v59  ;;  %v1952_v33 = vadd.f32 %v1887_v1, %v1594_v62  ;;  %v1242_v55 = vadd.f32 %v3917_v22, %v3916_v3  ;;  %v3919_v59 = vld [vmem:[#allocation12_spill] sm:$0xff]  ;;  %v3920_v63 = vld [vmem:[#allocation33_spill] sm:$0xff]  ;;  %v3929_v58 = vld [vmem:[#allocation39_spill] sm:$0xff] }
 0x161   : > { %v2967_v40 = vpop.f32.mrf.mxu0  ;;  %v2229_v44 = vpop.f32.mrf.mxu1  ;;  %v1240_v1 = vadd.f32 %v3920_v63, %v3919_v59  ;;  %v3932_v62 = vld [vmem:[#allocation41_spill] sm:$0xff] }
 0x162   : > { %2369 = vst.msk [vmem:[%s3676_s24 + $0x80] sm:$0xff] %vm479_vm2, %v2337_v15  ;;  %v2340_v0 = vmax.f32 %v2308_v45, 0.0  ;;  %v2306_v8 = vadd.f32 %v2229_v44, %v1948_v41  ;;  %v1957_v7 = vadd.f32 %v2967_v40, %v1599_v24  ;;  %v1600_v32 = vadd.f32 %v3921_v11, %v1242_v55  ;;  %v3923_v41 = vld [vmem:[#allocation35_spill] sm:$0xff] }
 0x163   : > { %v1900_v49 = vpop.f32.mrf.mxu0  ;;  %v2997_v53 = vpop.f32.mrf.mxu1  ;;  %v1245_v15 = vadd.f32 %v3923_v41, %v3922_v46  ;;  %v1598_v5 = vadd.f32 %v3924_v28, %v1240_v1 }
 0x164   : > { %2372 = vst.msk [vmem:[%s3676_s24 + $0x98] sm:$0xff] %vm479_vm2, %v2340_v0  ;;  %v2338_v56 = vmax.f32 %v2306_v8, 0.0  ;;  %v2311_v27 = vadd.f32 %v2997_v53, %v1953_v6  ;;  %v1955_v50 = vadd.f32 %v1900_v49, %v1597_v25  ;;  %v3926_v6 = vld [vmem:[#allocation37_spill] sm:$0xff]  ;;  %v3927_v8 = vld [vmem:[#allocation44_spill] sm:$0xff] }
 0x165   : > { %v2968_v60 = vpop.f32.mrf.mxu0  ;;  %v2242_v35 = vpop.f32.mrf.mxu1  ;;  %v1243_v0 = vadd.f32 %v3926_v6, %v3925_v47  ;;  %v1603_v48 = vadd.f32 %v3927_v8, %v1245_v15 }
 0x166   : > { %2370 = vst.msk [vmem:[%s3676_s24 + $0x88] sm:$0xff] %vm479_vm2, %v2338_v56  ;;  %v2343_v31 = vmax.f32 %v2311_v27, 0.0  ;;  %v2309_v16 = vadd.f32 %v2242_v35, %v1951_v10  ;;  %v1958_v54 = vadd.f32 %v2968_v60, %v1600_v32  ;;  %v1246_v10 = vadd.f32 %v3929_v58, %v3928_v9  ;;  %v3930_v27 = vld [vmem:[#allocation45_spill] sm:$0xff] }
 0x167   : > { %v1903_v57 = vpop.f32.mrf.mxu0  ;;  %v2998_v18 = vpop.f32.mrf.mxu1  ;;  %v1601_v52 = vadd.f32 %v3930_v27, %v1243_v0 }
 0x168   : > { %2375 = vst.msk [vmem:[%s3676_s24 + $0xb0] sm:$0xff] %vm479_vm2, %v2343_v31  ;;  %v2341_v51 = vmax.f32 %v2309_v16, 0.0  ;;  %v2312_v21 = vadd.f32 %v2998_v18, %v1954_v14  ;;  %v1956_v23 = vadd.f32 %v1903_v57, %v1598_v5  ;;  %v1244_v14 = vadd.f32 %v3932_v62, %v3931_v13  ;;  %v3933_v57 = vld [vmem:[#allocation46_spill] sm:$0xff] }
 0x169   : > { %v2971_v61 = vpop.f32.mrf.mxu0  ;;  %v2245_v43 = vpop.f32.mrf.mxu1  ;;  %v1604_v16 = vadd.f32 %v3933_v57, %v1246_v10 }
 0x16a   : > { %2373 = vst.msk [vmem:[%s3676_s24 + $0xa0] sm:$0xff] %vm479_vm2, %v2341_v51  ;;  %v2344_v26 = vmax.f32 %v2312_v21, 0.0  ;;  %v2310_v12 = vadd.f32 %v2245_v43, %v1952_v33  ;;  %v1961_v29 = vadd.f32 %v2971_v61, %v1603_v48  ;;  %v1602_v24 = vadd.f32 %v3664_v36, %v1244_v14 }
 0x16b   : > { %v3001_v38 = vpop.f32.mrf.mxu1  ;;  %v1916_v40 = vpop.f32.mrf.mxu0 }
 0x16c   : > { %2376 = vst.msk [vmem:[%s3676_s24 + $0xb8] sm:$0xff] %vm479_vm2, %v2344_v26  ;;  %v2342_v34 = vmax.f32 %v2310_v12, 0.0  ;;  %v2315_v42 = vadd.f32 %v3001_v38, %v1957_v7  ;;  %v1959_v20 = vadd.f32 %v1916_v40, %v1601_v52 }
 0x16d   : > { %v2258_v45 = vpop.f32.mrf.mxu1  ;;  %v2972_v56 = vpop.f32.mrf.mxu0 }
 0x16e   : > { %2374 = vst.msk [vmem:[%s3676_s24 + $0xa8] sm:$0xff] %vm479_vm2, %v2342_v34  ;;  %v2347_v44 = vmax.f32 %v2315_v42, 0.0  ;;  %v2313_v19 = vadd.f32 %v2258_v45, %v1955_v50  ;;  %v1962_v33 = vadd.f32 %v2972_v56, %v1604_v16 }
 0x16f   : > { %v3002_v49 = vpop.f32.mrf.mxu1  ;;  %v1919_v18 = vpop.f32.mrf.mxu0 }
 0x170   : > { %2379 = vst.msk [vmem:[%s3676_s24 + $0xd0] sm:$0xff] %vm479_vm2, %v2347_v44  ;;  %v2345_v37 = vmax.f32 %v2313_v19, 0.0  ;;  %v2316_v53 = vadd.f32 %v3002_v49, %v1958_v54  ;;  %v1960_v22 = vadd.f32 %v1919_v18, %v1602_v24 }
 0x171   : > { %v2261_v60 = vpop.f32.mrf.mxu1 }
 0x172   : > { %2377 = vst.msk [vmem:[%s3676_s24 + $0xc0] sm:$0xff] %vm479_vm2, %v2345_v37  ;;  %v2348_v30 = vmax.f32 %v2316_v53, 0.0  ;;  %v2314_v35 = vadd.f32 %v2261_v60, %v1956_v23 }
 0x173   : > { %v3005_v31 = vpop.f32.mrf.mxu1 }
 0x174   : > { %2380 = vst.msk [vmem:[%s3676_s24 + $0xd8] sm:$0xff] %vm479_vm2, %v2348_v30  ;;  %v2346_v17 = vmax.f32 %v2314_v35, 0.0  ;;  %v2319_v2 = vadd.f32 %v3005_v31, %v1961_v29 }
 0x175   : > { %v2274_v39 = vpop.f32.mrf.mxu1 }
 0x176   : > { %2378 = vst.msk [vmem:[%s3676_s24 + $0xc8] sm:$0xff] %vm479_vm2, %v2346_v17  ;;  %v2351_v51 = vmax.f32 %v2319_v2, 0.0  ;;  %v2317_v21 = vadd.f32 %v2274_v39, %v1959_v20 }
 0x177   : > { %v3006_v3 = vpop.f32.mrf.mxu1 }
 0x178   : > { %2383 = vst.msk [vmem:[%s3676_s24 + $0xf0] sm:$0xff] %vm479_vm2, %v2351_v51  ;;  %v2349_v55 = vmax.f32 %v2317_v21, 0.0  ;;  %v2320_v61 = vadd.f32 %v3006_v3, %v1962_v33 }
 0x179   : > { %v2277_v43 = vpop.f32.mrf.mxu1 }
 0x17a   : > { %2381 = vst.msk [vmem:[%s3676_s24 + $0xe0] sm:$0xff] %vm479_vm2, %v2349_v55  ;;  %v2352_v4 = vmax.f32 %v2320_v61, 0.0  ;;  %v2318_v25 = vadd.f32 %v2277_v43, %v1960_v22 }
 0x17c   : > { %2384 = vst.msk [vmem:[%s3676_s24 + $0xf8] sm:$0xff] %vm479_vm2, %v2352_v4  ;;  %v2350_v36 = vmax.f32 %v2318_v25, 0.0 }
 0x17e   : > { %2382 = vst.msk [vmem:[%s3676_s24 + $0xe8] sm:$0xff] %vm479_vm2, %v2350_v36 }
 0x17f PF: > { %s17_s26 = sadd.s32 1, %s3143_s26   ;;  %s3934_s24 = smov %s3139_s25 }
 0x180   : > { %p14_p5 = scmp.ge.s32.totalorder %s17_s26, 4   ;;  %s3935_s25 = smov %s3937_s27 }
 0x182   :  { %16 = sbr.rel (!%p14_p5) target bundleno = 2 (0x2), region = 98 }

</bundles_post_ra>
